<compile_context>
chip_gen: v5e
topology: v5e:2x2
jax: 0.10.0
libtpu: 0.0.40
codegen_flags: <defaults>
</compile_context>

<pallas_src>
import functools

import jax
import jax.numpy as jnp
from jax.experimental import pallas as pl
from jax.experimental.pallas import tpu as pltpu

TM_BASE = 1024                       # lane-axis (M) tile for the matmul kernel
VMEM_LIMIT = 48 * 1024 * 1024        # keep under v7x's 64 MiB physical VMEM


def _round_up(x, m):
    return ((x + m - 1) // m) * m


# ----------------------------- Pallas kernels ------------------------------

def _mm_kernel(w_ref, a_ref, b_ref, o_ref, *, act):
    """out (Cout, TM) = W (Cout, K) @ A (K, TM) + bias, fused activation.

    K and Cout live fully inside one block, so there is no reduction grid
    axis, no accumulator scratch and no pl.when phases."""
    y = jnp.dot(w_ref[...], a_ref[...], preferred_element_type=jnp.float32)
    y = y + b_ref[...]                       # (Cout, TM) + (Cout, 1)
    if act == "relu":
        y = jnp.maximum(y, 0.0)
    elif act == "tanh":
        y = jnp.tanh(y)
    o_ref[...] = y


def _in_kernel(x_ref, o_ref, *, relu):
    """InstanceNorm2d (affine=False, eps=1e-5) over the lane (spatial) axis.

    x_ref is a (rows, H*W) block where rows index (channel, sample) pairs, so
    every sublane carries a useful normalization row."""
    x = x_ref[...]
    mean = jnp.mean(x, axis=-1, keepdims=True)
    var = jnp.mean(jnp.square(x - mean), axis=-1, keepdims=True)
    y = (x - mean) * jax.lax.rsqrt(var + 1e-5)
    if relu:
        y = jnp.maximum(y, 0.0)
    o_ref[...] = y


def _in_res_kernel(x_ref, r_ref, o_ref):
    """InstanceNorm2d (no act) fused with residual add: out = r + IN(x)."""
    x = x_ref[...]
    mean = jnp.mean(x, axis=-1, keepdims=True)
    var = jnp.mean(jnp.square(x - mean), axis=-1, keepdims=True)
    y = (x - mean) * jax.lax.rsqrt(var + 1e-5)
    o_ref[...] = r_ref[...] + y


# ----------------------------- kernel wrappers ------------------------------

def matmul_bias_act(wt, a, bias, act="none"):
    """wt: (Cout, K) bf16, a: (K, M) bf16, bias: (Cout,) -> (Cout, M) f32."""
    Cout, K = wt.shape
    _, M = a.shape
    TM = min(TM_BASE, _round_up(M, 128))
    Mp = _round_up(M, TM)
    if Mp != M:
        a = jnp.pad(a, ((0, 0), (0, Mp - M)))
    b2 = bias.reshape(Cout, 1).astype(jnp.float32)

    out = pl.pallas_call(
        functools.partial(_mm_kernel, act=act),
        out_shape=jax.ShapeDtypeStruct((Cout, Mp), jnp.float32),
        grid=(Mp // TM,),
        in_specs=[pl.BlockSpec((Cout, K), lambda i: (0, 0)),
                  pl.BlockSpec((K, TM), lambda i: (0, i)),
                  pl.BlockSpec((Cout, 1), lambda i: (0, 0))],
        out_specs=pl.BlockSpec((Cout, TM), lambda i: (0, i)),
        compiler_params=pltpu.CompilerParams(
            dimension_semantics=("parallel",),
            vmem_limit_bytes=VMEM_LIMIT),
    )(wt, a, b2)
    if Mp != M:
        out = out[:, :M]
    return out


def _pick_rows_tile(rows, hw, budget_bytes=4 * 1024 * 1024):
    """Largest divisor of `rows` that is a multiple of 8 (or the full extent)
    and whose f32 block fits a per-buffer VMEM budget."""
    cap = max(1, budget_bytes // max(1, hw * 4))
    best = None
    for d in range(1, rows + 1):
        if rows % d:
            continue
        if (d % 8 == 0 or d == rows) and d <= cap:
            best = d
    if best is not None:
        return best
    for d in range(8, rows + 1, 8):
        if rows % d == 0:
            return d
    return rows


def instance_norm(x, relu=True, residual=None):
    """x: (C, N, H, W) f32. 2D (C*N, H*W) view: lane-dense spatial axis and
    full sublane utilization; tiled over rows with a 'parallel' grid axis."""
    C, N, H, W = x.shape
    HW = H * W
    rows = C * N
    x2 = x.reshape(rows, HW)
    R = _pick_rows_tile(rows, HW)
    grid = (rows // R,)
    spec = pl.BlockSpec((R, HW), lambda i: (i, 0))
    cparams = pltpu.CompilerParams(dimension_semantics=("parallel",),
                                   vmem_limit_bytes=VMEM_LIMIT)
    if residual is None:
        out = pl.pallas_call(
            functools.partial(_in_kernel, relu=relu),
            out_shape=jax.ShapeDtypeStruct((rows, HW), jnp.float32),
            grid=grid,
            in_specs=[spec],
            out_specs=spec,
            compiler_params=cparams,
        )(x2)
    else:
        r2 = residual.reshape(rows, HW)
        out = pl.pallas_call(
            _in_res_kernel,
            out_shape=jax.ShapeDtypeStruct((rows, HW), jnp.float32),
            grid=grid,
            in_specs=[spec, spec],
            out_specs=spec,
            input_output_aliases={1: 0},     # write in place over the residual
            compiler_params=cparams,
        )(x2, r2)
    return out.reshape(C, N, H, W)


# ------------------------------ conv plumbing -------------------------------
# TODO(synk): im2col patch extraction is pure-JAX slicing glue (materialized in
# HBM, in bf16 to halve the traffic); fusing it into the matmul kernel via an
# output-row-blocked direct-conv kernel would remove that round-trip but is
# not done here.

def conv2d(x, w, b, stride=1, padding=0, act="none"):
    """x: (Cin, N, H, W); w: (Cout, Cin, KH, KW) (PyTorch layout); reflect pad."""
    Cout, Cin, KH, KW = w.shape
    if padding > 0:
        x = jnp.pad(x, ((0, 0), (0, 0), (padding, padding), (padding, padding)),
                    mode="reflect")
    x = x.astype(jnp.bfloat16)
    _, N, Hp, Wp = x.shape
    Ho = (Hp - KH) // stride + 1
    Wo = (Wp - KW) // stride + 1
    cols = []
    for ky in range(KH):
        for kx in range(KW):
            cols.append(x[:, :, ky:ky + stride * (Ho - 1) + 1:stride,
                          kx:kx + stride * (Wo - 1) + 1:stride])
    patches = jnp.stack(cols, axis=1)                      # (Cin, KH*KW, N, Ho, Wo)
    a = patches.reshape(Cin * KH * KW, N * Ho * Wo)        # K ordering: (Cin, ky, kx)
    wt = w.reshape(Cout, Cin * KH * KW).astype(jnp.bfloat16)
    out = matmul_bias_act(wt, a, b, act=act)               # (Cout, N*Ho*Wo) f32
    return out.reshape(Cout, N, Ho, Wo)


def conv_transpose2d(x, w, b):
    """ConvTranspose2d(k=3, s=2, p=1, output_padding=1) via the 4-phase
    sub-pixel decomposition, fused into ONE block-structured matmul.

    x: (Cin, N, H, W); w: (Cin, Cout, 3, 3) (native PyTorch ConvTranspose2d
    layout -- no kernel flipping needed)."""
    Cin, Cout, KH, KW = w.shape
    assert (KH, KW) == (3, 3)
    _, N, H, W = x.shape
    M = N * H * W
    xb = x.astype(jnp.bfloat16)

    # Shifted copies: x01[i,j]=x[i,j+1], x10[i,j]=x[i+1,j], x11[i,j]=x[i+1,j+1]
    zcol = jnp.zeros((Cin, N, H, 1), jnp.bfloat16)
    zrow = jnp.zeros((Cin, N, 1, W), jnp.bfloat16)
    x01 = jnp.concatenate([xb[:, :, :, 1:], zcol], axis=3)
    x10 = jnp.concatenate([xb[:, :, 1:, :], zrow], axis=2)
    x11 = jnp.concatenate([x10[:, :, :, 1:], zcol], axis=3)

    # A column-blocks: [x, x(i,j+1), x(i+1,j), x(i+1,j+1)]  -> (4*Cin, M)
    a = jnp.concatenate([t.reshape(Cin, M) for t in (xb, x01, x10, x11)], axis=0)

    wf = w.astype(jnp.float32)

    def tap(ky, kx):                         # (Cout, Cin)
        return wf[:, :, ky, kx].T

    Z = jnp.zeros((Cout, Cin), jnp.float32)
    # Row-blocks = output phases out[2i+a, 2j+b]; derived from oy = 2*iy - 1 + ky.
    wblk = jnp.concatenate([
        jnp.concatenate([tap(1, 1), Z, Z, Z], axis=1),                          # (0,0)
        jnp.concatenate([tap(1, 2), tap(1, 0), Z, Z], axis=1),                  # (0,1)
        jnp.concatenate([tap(2, 1), Z, tap(0, 1), Z], axis=1),                  # (1,0)
        jnp.concatenate([tap(2, 2), tap(2, 0), tap(0, 2), tap(0, 0)], axis=1),  # (1,1)
    ], axis=0).astype(jnp.bfloat16)          # (4*Cout, 4*Cin)

    bias4 = jnp.tile(b, 4)                   # each phase gets the bias once
    out_all = matmul_bias_act(wblk, a, bias4)            # (4*Cout, M) f32

    # Interleave: out[:, :, 2i+a, 2j+b] = phase_ab[:, :, i, j]
    ph = out_all.reshape(2, 2, Cout, N, H, W)            # (a, b, co, n, h, w)
    out = ph.transpose(2, 3, 4, 0, 5, 1).reshape(Cout, N, 2 * H, 2 * W)
    return out


# --------------------------------- model ------------------------------------

def init_params(key, img_channels=3, num_features=8, num_residuals=2):
    """Deterministic synthetic init (N(0, 0.02)); PyTorch weight layouts:
    Conv2d -> (Cout, Cin, KH, KW); ConvTranspose2d -> (Cin, Cout, KH, KW)."""
    keys = iter(jax.random.split(key, 128))

    def conv_p(cout, cin, kh, kw):
        return {"w": jax.random.normal(next(keys), (cout, cin, kh, kw),
                                       jnp.float32) * 0.02,
                "b": jax.random.normal(next(keys), (cout,), jnp.float32) * 0.02}

    def convT_p(cin, cout, kh, kw):
        return {"w": jax.random.normal(next(keys), (cin, cout, kh, kw),
                                       jnp.float32) * 0.02,
                "b": jax.random.normal(next(keys), (cout,), jnp.float32) * 0.02}

    nf = num_features
    p = {"initial": conv_p(nf, img_channels, 7, 7),
         "down": [conv_p(nf * 2, nf, 3, 3), conv_p(nf * 4, nf * 2, 3, 3)],
         "res": [[conv_p(nf * 4, nf * 4, 3, 3), conv_p(nf * 4, nf * 4, 3, 3)]
                 for _ in range(num_residuals)],
         "up": [convT_p(nf * 4, nf * 2, 3, 3), convT_p(nf * 2, nf, 3, 3)],
         "last": conv_p(img_channels, nf, 7, 7)}
    return p


def generator_forward(x_nchw, params):
    # NCHW -> internal channels-first (C, N, H, W) so conv outputs are
    # lane-dense along the big N*H*W axis.
    x = jnp.transpose(x_nchw, (1, 0, 2, 3)).astype(jnp.float32)

    # initial: Conv2d(k=7, s=1, p=3, reflect) + ReLU (fused)
    x = conv2d(x, params["initial"]["w"], params["initial"]["b"],
               stride=1, padding=3, act="relu")

    # down blocks: Conv2d(k=3, s=2, p=1, reflect) + InstanceNorm + ReLU
    for dp in params["down"]:
        x = conv2d(x, dp["w"], dp["b"], stride=2, padding=1)
        x = instance_norm(x, relu=True)

    # residual blocks: x + IN(conv(ReLU(IN(conv(x)))))
    for rp in params["res"]:
        h = conv2d(x, rp[0]["w"], rp[0]["b"], stride=1, padding=1)
        h = instance_norm(h, relu=True)
        h = conv2d(h, rp[1]["w"], rp[1]["b"], stride=1, padding=1)
        x = instance_norm(h, relu=False, residual=x)

    # up blocks: ConvTranspose2d(k=3, s=2, p=1, out_p=1) + InstanceNorm + ReLU
    for up in params["up"]:
        x = conv_transpose2d(x, up["w"], up["b"])
        x = instance_norm(x, relu=True)

    # TODO(synk): original module asserts spatial == [256, 256]; we run a small
    # spatial size here (architecture preserves H, W, checked in __main__).
    # last: Conv2d(k=7, s=1, p=3, reflect) + tanh (fused into matmul kernel)
    x = conv2d(x, params["last"]["w"], params["last"]["b"],
               stride=1, padding=3, act="tanh")

    return jnp.transpose(x, (1, 0, 2, 3))  # (C, N, H, W) -> NCHW


if __name__ == "__main__":
    key = jax.random.PRNGKey(0)
    kx, kp = jax.random.split(key)

    img_channels, num_features, num_residuals = 3, 8, 2
    N, H, W = 2, 32, 32  # small spatial instead of the paper's 256x256

    x = jax.random.normal(kx, (N, img_channels, H, W), jnp.float32)
    params = init_params(kp, img_channels, num_features, num_residuals)

    fwd = jax.jit(functools.partial(generator_forward, params=params))
    y = fwd(x)
    jax.block_until_ready(y)

    assert y.shape == (N, img_channels, H, W), y.shape
    assert bool(jnp.all(jnp.isfinite(y)))
    assert bool(jnp.all(jnp.abs(y) <= 1.0 + 1e-6))  # tanh range
    print("KERNEL_OK")
</pallas_src>

<mosaic_0001>
module attributes {stable_mosaic.version = 11 : i64} {
  func.func @_mm_kernel(%arg0: i32, %arg1: memref<8x147xbf16, #tpu.memory_space<vmem>>, %arg2: memref<147x1024xbf16, #tpu.memory_space<vmem>>, %arg3: memref<8x1xf32, #tpu.memory_space<vmem>>, %arg4: memref<8x1024xf32, #tpu.memory_space<vmem>>) attributes {dimension_semantics = [#tpu.dimension_semantics<parallel>], iteration_bounds = array<i64: 2>, scalar_prefetch = 0 : i64, scratch_operands = 0 : i64, tpu.core_type = #tpu.core_type<tc>, window_params = [{pipeline_mode = #tpu.pipeline_mode<synchronous>, transform_indices = @transform_0, window_bounds = array<i64: 8, 147>}, {transform_indices = @transform_1, window_bounds = array<i64: 147, 1024>}, {pipeline_mode = #tpu.pipeline_mode<synchronous>, transform_indices = @transform_2, window_bounds = array<i64: 8, 1>}, {transform_indices = @transform_3, window_bounds = array<i64: 8, 1024>}]} {
    %c0 = arith.constant 0 : index
    %c0_0 = arith.constant 0 : index
    %0 = vector.load %arg1[%c0, %c0_0] : memref<8x147xbf16, #tpu.memory_space<vmem>>, vector<8x147xbf16>
    %c0_1 = arith.constant 0 : index
    %c0_2 = arith.constant 0 : index
    %1 = vector.load %arg2[%c0_1, %c0_2] : memref<147x1024xbf16, #tpu.memory_space<vmem>>, vector<147x1024xbf16>
    %cst = arith.constant dense<0.000000e+00> : vector<8x1024xf32>
    %2 = tpu.matmul %0, %1, %cst {dimension_numbers = #tpu.dot_dimension_numbers<[1], [0], [0], [1], [0, 0, 1, 1], [], []>} : vector<8x147xbf16>, vector<147x1024xbf16>, vector<8x1024xf32> -> vector<8x1024xf32>
    %c0_3 = arith.constant 0 : index
    %c0_4 = arith.constant 0 : index
    %3 = vector.load %arg3[%c0_3, %c0_4] : memref<8x1xf32, #tpu.memory_space<vmem>>, vector<8x1xf32>
    %4 = vector.broadcast %3 : vector<8x1xf32> to vector<8x1024xf32>
    %5 = arith.addf %2, %4 : vector<8x1024xf32>
    %cst_5 = arith.constant 0.000000e+00 : f32
    %6 = vector.broadcast %cst_5 : f32 to vector<8x1024xf32>
    %7 = arith.maximumf %5, %6 : vector<8x1024xf32>
    %c0_6 = arith.constant 0 : index
    %c0_7 = arith.constant 0 : index
    %8 = vector.load %arg4[%c0_6, %c0_7] : memref<8x1024xf32, #tpu.memory_space<vmem>>, vector<8x1024xf32>
    tpu.vector_store %arg4[%c0_6, %c0_7], %7 {strides = array<i32>} : memref<8x1024xf32, #tpu.memory_space<vmem>>, vector<8x1024xf32>,
    return
  }
  func.func @transform_0(%arg0: i32) -> (i32, i32) {
    %c0_i32 = arith.constant 0 : i32
    %c0_i32_0 = arith.constant 0 : i32
    %c0_i32_1 = arith.constant 0 : i32
    return %c0_i32, %c0_i32_0 : i32, i32
  }
  func.func @transform_1(%arg0: i32) -> (i32, i32) {
    %c0_i32 = arith.constant 0 : i32
    %c0_i32_0 = arith.constant 0 : i32
    return %c0_i32, %arg0 : i32, i32
  }
  func.func @transform_2(%arg0: i32) -> (i32, i32) {
    %c0_i32 = arith.constant 0 : i32
    %c0_i32_0 = arith.constant 0 : i32
    %c0_i32_1 = arith.constant 0 : i32
    return %c0_i32, %c0_i32_0 : i32, i32
  }
  func.func @transform_3(%arg0: i32) -> (i32, i32) {
    %c0_i32 = arith.constant 0 : i32
    %c0_i32_0 = arith.constant 0 : i32
    return %c0_i32, %arg0 : i32, i32
  }
}

module attributes {stable_mosaic.version = 11 : i64} {
  func.func @_in_kernel(%arg0: i32, %arg1: memref<32x256xf32, #tpu.memory_space<vmem>>, %arg2: memref<32x256xf32, #tpu.memory_space<vmem>>) attributes {dimension_semantics = [#tpu.dimension_semantics<parallel>], iteration_bounds = array<i64: 1>, scalar_prefetch = 0 : i64, scratch_operands = 0 : i64, tpu.core_type = #tpu.core_type<tc>, window_params = [{transform_indices = @transform_0, window_bounds = array<i64: 32, 256>}, {transform_indices = @transform_1, window_bounds = array<i64: 32, 256>}]} {
    %c0 = arith.constant 0 : index
    %c0_0 = arith.constant 0 : index
    %0 = vector.load %arg1[%c0, %c0_0] : memref<32x256xf32, #tpu.memory_space<vmem>>, vector<32x256xf32>
    %cst = arith.constant dense<0.000000e+00> : vector<32xf32>
    %1 = vector.multi_reduction <add>, %0, %cst [1] : vector<32x256xf32> to vector<32xf32>
    %2 = vector.shape_cast %1 : vector<32xf32> to vector<32x1xf32>
    %cst_1 = arith.constant 2.560000e+02 : f32
    %3 = vector.broadcast %cst_1 : f32 to vector<32x1xf32>
    %4 = arith.divf %2, %3 : vector<32x1xf32>
    %5 = vector.broadcast %4 : vector<32x1xf32> to vector<32x256xf32>
    %6 = arith.subf %0, %5 : vector<32x256xf32>
    %7 = arith.mulf %6, %6 : vector<32x256xf32>
    %cst_2 = arith.constant dense<0.000000e+00> : vector<32xf32>
    %8 = vector.multi_reduction <add>, %7, %cst_2 [1] : vector<32x256xf32> to vector<32xf32>
    %9 = vector.shape_cast %8 : vector<32xf32> to vector<32x1xf32>
    %cst_3 = arith.constant 2.560000e+02 : f32
    %10 = vector.broadcast %cst_3 : f32 to vector<32x1xf32>
    %11 = arith.divf %9, %10 : vector<32x1xf32>
    %12 = vector.broadcast %4 : vector<32x1xf32> to vector<32x256xf32>
    %13 = arith.subf %0, %12 : vector<32x256xf32>
    %cst_4 = arith.constant 9.99999974E-6 : f32
    %14 = vector.broadcast %cst_4 : f32 to vector<32x1xf32>
    %15 = arith.addf %11, %14 : vector<32x1xf32>
    %16 = math.rsqrt %15 : vector<32x1xf32>
    %17 = vector.broadcast %16 : vector<32x1xf32> to vector<32x256xf32>
    %18 = arith.mulf %13, %17 : vector<32x256xf32>
    %cst_5 = arith.constant 0.000000e+00 : f32
    %19 = vector.broadcast %cst_5 : f32 to vector<32x256xf32>
    %20 = arith.maximumf %18, %19 : vector<32x256xf32>
    %c0_6 = arith.constant 0 : index
    %c0_7 = arith.constant 0 : index
    %21 = vector.load %arg2[%c0_6, %c0_7] : memref<32x256xf32, #tpu.memory_space<vmem>>, vector<32x256xf32>
    tpu.vector_store %arg2[%c0_6, %c0_7], %20 {strides = array<i32>} : memref<32x256xf32, #tpu.memory_space<vmem>>, vector<32x256xf32>,
    return
  }
  func.func @transform_0(%arg0: i32) -> (i32, i32) {
    %c0_i32 = arith.constant 0 : i32
    %c0_i32_0 = arith.constant 0 : i32
    return %arg0, %c0_i32 : i32, i32
  }
  func.func @transform_1(%arg0: i32) -> (i32, i32) {
    %c0_i32 = arith.constant 0 : i32
    %c0_i32_0 = arith.constant 0 : i32
    return %arg0, %c0_i32 : i32, i32
  }
}

module attributes {stable_mosaic.version = 11 : i64} {
  func.func @_mm_kernel(%arg0: i32, %arg1: memref<16x72xbf16, #tpu.memory_space<vmem>>, %arg2: memref<72x512xbf16, #tpu.memory_space<vmem>>, %arg3: memref<16x1xf32, #tpu.memory_space<vmem>>, %arg4: memref<16x512xf32, #tpu.memory_space<vmem>>) attributes {dimension_semantics = [#tpu.dimension_semantics<parallel>], iteration_bounds = array<i64: 1>, scalar_prefetch = 0 : i64, scratch_operands = 0 : i64, tpu.core_type = #tpu.core_type<tc>, window_params = [{pipeline_mode = #tpu.pipeline_mode<synchronous>, transform_indices = @transform_0, window_bounds = array<i64: 16, 72>}, {transform_indices = @transform_1, window_bounds = array<i64: 72, 512>}, {pipeline_mode = #tpu.pipeline_mode<synchronous>, transform_indices = @transform_2, window_bounds = array<i64: 16, 1>}, {transform_indices = @transform_3, window_bounds = array<i64: 16, 512>}]} {
    %c0 = arith.constant 0 : index
    %c0_0 = arith.constant 0 : index
    %0 = vector.load %arg1[%c0, %c0_0] : memref<16x72xbf16, #tpu.memory_space<vmem>>, vector<16x72xbf16>
    %c0_1 = arith.constant 0 : index
    %c0_2 = arith.constant 0 : index
    %1 = vector.load %arg2[%c0_1, %c0_2] : memref<72x512xbf16, #tpu.memory_space<vmem>>, vector<72x512xbf16>
    %cst = arith.constant dense<0.000000e+00> : vector<16x512xf32>
    %2 = tpu.matmul %0, %1, %cst {dimension_numbers = #tpu.dot_dimension_numbers<[1], [0], [0], [1], [0, 0, 1, 1], [], []>} : vector<16x72xbf16>, vector<72x512xbf16>, vector<16x512xf32> -> vector<16x512xf32>
    %c0_3 = arith.constant 0 : index
    %c0_4 = arith.constant 0 : index
    %3 = vector.load %arg3[%c0_3, %c0_4] : memref<16x1xf32, #tpu.memory_space<vmem>>, vector<16x1xf32>
    %4 = vector.broadcast %3 : vector<16x1xf32> to vector<16x512xf32>
    %5 = arith.addf %2, %4 : vector<16x512xf32>
    %c0_5 = arith.constant 0 : index
    %c0_6 = arith.constant 0 : index
    %6 = vector.load %arg4[%c0_5, %c0_6] : memref<16x512xf32, #tpu.memory_space<vmem>>, vector<16x512xf32>
    tpu.vector_store %arg4[%c0_5, %c0_6], %5 {strides = array<i32>} : memref<16x512xf32, #tpu.memory_space<vmem>>, vector<16x512xf32>,
    return
  }
  func.func @transform_0(%arg0: i32) -> (i32, i32) {
    %c0_i32 = arith.constant 0 : i32
    %c0_i32_0 = arith.constant 0 : i32
    %c0_i32_1 = arith.constant 0 : i32
    return %c0_i32, %c0_i32_0 : i32, i32
  }
  func.func @transform_1(%arg0: i32) -> (i32, i32) {
    %c0_i32 = arith.constant 0 : i32
    %c0_i32_0 = arith.constant 0 : i32
    return %c0_i32, %arg0 : i32, i32
  }
  func.func @transform_2(%arg0: i32) -> (i32, i32) {
    %c0_i32 = arith.constant 0 : i32
    %c0_i32_0 = arith.constant 0 : i32
    %c0_i32_1 = arith.constant 0 : i32
    return %c0_i32, %c0_i32_0 : i32, i32
  }
  func.func @transform_3(%arg0: i32) -> (i32, i32) {
    %c0_i32 = arith.constant 0 : i32
    %c0_i32_0 = arith.constant 0 : i32
    return %c0_i32, %arg0 : i32, i32
  }
}

module attributes {stable_mosaic.version = 11 : i64} {
  func.func @_mm_kernel(%arg0: i32, %arg1: memref<32x144xbf16, #tpu.memory_space<vmem>>, %arg2: memref<144x128xbf16, #tpu.memory_space<vmem>>, %arg3: memref<32x1xf32, #tpu.memory_space<vmem>>, %arg4: memref<32x128xf32, #tpu.memory_space<vmem>>) attributes {dimension_semantics = [#tpu.dimension_semantics<parallel>], iteration_bounds = array<i64: 1>, scalar_prefetch = 0 : i64, scratch_operands = 0 : i64, tpu.core_type = #tpu.core_type<tc>, window_params = [{pipeline_mode = #tpu.pipeline_mode<synchronous>, transform_indices = @transform_0, window_bounds = array<i64: 32, 144>}, {transform_indices = @transform_1, window_bounds = array<i64: 144, 128>}, {pipeline_mode = #tpu.pipeline_mode<synchronous>, transform_indices = @transform_2, window_bounds = array<i64: 32, 1>}, {transform_indices = @transform_3, window_bounds = array<i64: 32, 128>}]} {
    %c0 = arith.constant 0 : index
    %c0_0 = arith.constant 0 : index
    %0 = vector.load %arg1[%c0, %c0_0] : memref<32x144xbf16, #tpu.memory_space<vmem>>, vector<32x144xbf16>
    %c0_1 = arith.constant 0 : index
    %c0_2 = arith.constant 0 : index
    %1 = vector.load %arg2[%c0_1, %c0_2] : memref<144x128xbf16, #tpu.memory_space<vmem>>, vector<144x128xbf16>
    %cst = arith.constant dense<0.000000e+00> : vector<32x128xf32>
    %2 = tpu.matmul %0, %1, %cst {dimension_numbers = #tpu.dot_dimension_numbers<[1], [0], [0], [1], [0, 0, 1, 1], [], []>} : vector<32x144xbf16>, vector<144x128xbf16>, vector<32x128xf32> -> vector<32x128xf32>
    %c0_3 = arith.constant 0 : index
    %c0_4 = arith.constant 0 : index
    %3 = vector.load %arg3[%c0_3, %c0_4] : memref<32x1xf32, #tpu.memory_space<vmem>>, vector<32x1xf32>
    %4 = vector.broadcast %3 : vector<32x1xf32> to vector<32x128xf32>
    %5 = arith.addf %2, %4 : vector<32x128xf32>
    %c0_5 = arith.constant 0 : index
    %c0_6 = arith.constant 0 : index
    %6 = vector.load %arg4[%c0_5, %c0_6] : memref<32x128xf32, #tpu.memory_space<vmem>>, vector<32x128xf32>
    tpu.vector_store %arg4[%c0_5, %c0_6], %5 {strides = array<i32>} : memref<32x128xf32, #tpu.memory_space<vmem>>, vector<32x128xf32>,
    return
  }
  func.func @transform_0(%arg0: i32) -> (i32, i32) {
    %c0_i32 = arith.constant 0 : i32
    %c0_i32_0 = arith.constant 0 : i32
    %c0_i32_1 = arith.constant 0 : i32
    return %c0_i32, %c0_i32_0 : i32, i32
  }
  func.func @transform_1(%arg0: i32) -> (i32, i32) {
    %c0_i32 = arith.constant 0 : i32
    %c0_i32_0 = arith.constant 0 : i32
    return %c0_i32, %arg0 : i32, i32
  }
  func.func @transform_2(%arg0: i32) -> (i32, i32) {
    %c0_i32 = arith.constant 0 : i32
    %c0_i32_0 = arith.constant 0 : i32
    %c0_i32_1 = arith.constant 0 : i32
    return %c0_i32, %c0_i32_0 : i32, i32
  }
  func.func @transform_3(%arg0: i32) -> (i32, i32) {
    %c0_i32 = arith.constant 0 : i32
    %c0_i32_0 = arith.constant 0 : i32
    return %c0_i32, %arg0 : i32, i32
  }
}

module attributes {stable_mosaic.version = 11 : i64} {
  func.func @_in_kernel(%arg0: i32, %arg1: memref<64x64xf32, #tpu.memory_space<vmem>>, %arg2: memref<64x64xf32, #tpu.memory_space<vmem>>) attributes {dimension_semantics = [#tpu.dimension_semantics<parallel>], iteration_bounds = array<i64: 1>, scalar_prefetch = 0 : i64, scratch_operands = 0 : i64, tpu.core_type = #tpu.core_type<tc>, window_params = [{transform_indices = @transform_0, window_bounds = array<i64: 64, 64>}, {transform_indices = @transform_1, window_bounds = array<i64: 64, 64>}]} {
    %c0 = arith.constant 0 : index
    %c0_0 = arith.constant 0 : index
    %0 = vector.load %arg1[%c0, %c0_0] : memref<64x64xf32, #tpu.memory_space<vmem>>, vector<64x64xf32>
    %cst = arith.constant dense<0.000000e+00> : vector<64xf32>
    %1 = vector.multi_reduction <add>, %0, %cst [1] : vector<64x64xf32> to vector<64xf32>
    %2 = vector.shape_cast %1 : vector<64xf32> to vector<64x1xf32>
    %cst_1 = arith.constant 6.400000e+01 : f32
    %3 = vector.broadcast %cst_1 : f32 to vector<64x1xf32>
    %4 = arith.divf %2, %3 : vector<64x1xf32>
    %5 = vector.broadcast %4 : vector<64x1xf32> to vector<64x64xf32>
    %6 = arith.subf %0, %5 : vector<64x64xf32>
    %7 = arith.mulf %6, %6 : vector<64x64xf32>
    %cst_2 = arith.constant dense<0.000000e+00> : vector<64xf32>
    %8 = vector.multi_reduction <add>, %7, %cst_2 [1] : vector<64x64xf32> to vector<64xf32>
    %9 = vector.shape_cast %8 : vector<64xf32> to vector<64x1xf32>
    %cst_3 = arith.constant 6.400000e+01 : f32
    %10 = vector.broadcast %cst_3 : f32 to vector<64x1xf32>
    %11 = arith.divf %9, %10 : vector<64x1xf32>
    %12 = vector.broadcast %4 : vector<64x1xf32> to vector<64x64xf32>
    %13 = arith.subf %0, %12 : vector<64x64xf32>
    %cst_4 = arith.constant 9.99999974E-6 : f32
    %14 = vector.broadcast %cst_4 : f32 to vector<64x1xf32>
    %15 = arith.addf %11, %14 : vector<64x1xf32>
    %16 = math.rsqrt %15 : vector<64x1xf32>
    %17 = vector.broadcast %16 : vector<64x1xf32> to vector<64x64xf32>
    %18 = arith.mulf %13, %17 : vector<64x64xf32>
    %cst_5 = arith.constant 0.000000e+00 : f32
    %19 = vector.broadcast %cst_5 : f32 to vector<64x64xf32>
    %20 = arith.maximumf %18, %19 : vector<64x64xf32>
    %c0_6 = arith.constant 0 : index
    %c0_7 = arith.constant 0 : index
    %21 = vector.load %arg2[%c0_6, %c0_7] : memref<64x64xf32, #tpu.memory_space<vmem>>, vector<64x64xf32>
    tpu.vector_store %arg2[%c0_6, %c0_7], %20 {strides = array<i32>} : memref<64x64xf32, #tpu.memory_space<vmem>>, vector<64x64xf32>,
    return
  }
  func.func @transform_0(%arg0: i32) -> (i32, i32) {
    %c0_i32 = arith.constant 0 : i32
    %c0_i32_0 = arith.constant 0 : i32
    return %arg0, %c0_i32 : i32, i32
  }
  func.func @transform_1(%arg0: i32) -> (i32, i32) {
    %c0_i32 = arith.constant 0 : i32
    %c0_i32_0 = arith.constant 0 : i32
    return %arg0, %c0_i32 : i32, i32
  }
}

module attributes {stable_mosaic.version = 11 : i64} {
  func.func @_mm_kernel(%arg0: i32, %arg1: memref<32x288xbf16, #tpu.memory_space<vmem>>, %arg2: memref<288x128xbf16, #tpu.memory_space<vmem>>, %arg3: memref<32x1xf32, #tpu.memory_space<vmem>>, %arg4: memref<32x128xf32, #tpu.memory_space<vmem>>) attributes {dimension_semantics = [#tpu.dimension_semantics<parallel>], iteration_bounds = array<i64: 1>, scalar_prefetch = 0 : i64, scratch_operands = 0 : i64, tpu.core_type = #tpu.core_type<tc>, window_params = [{pipeline_mode = #tpu.pipeline_mode<synchronous>, transform_indices = @transform_0, window_bounds = array<i64: 32, 288>}, {transform_indices = @transform_1, window_bounds = array<i64: 288, 128>}, {pipeline_mode = #tpu.pipeline_mode<synchronous>, transform_indices = @transform_2, window_bounds = array<i64: 32, 1>}, {transform_indices = @transform_3, window_bounds = array<i64: 32, 128>}]} {
    %c0 = arith.constant 0 : index
    %c0_0 = arith.constant 0 : index
    %0 = vector.load %arg1[%c0, %c0_0] : memref<32x288xbf16, #tpu.memory_space<vmem>>, vector<32x288xbf16>
    %c0_1 = arith.constant 0 : index
    %c0_2 = arith.constant 0 : index
    %1 = vector.load %arg2[%c0_1, %c0_2] : memref<288x128xbf16, #tpu.memory_space<vmem>>, vector<288x128xbf16>
    %cst = arith.constant dense<0.000000e+00> : vector<32x128xf32>
    %2 = tpu.matmul %0, %1, %cst {dimension_numbers = #tpu.dot_dimension_numbers<[1], [0], [0], [1], [0, 0, 1, 1], [], []>} : vector<32x288xbf16>, vector<288x128xbf16>, vector<32x128xf32> -> vector<32x128xf32>
    %c0_3 = arith.constant 0 : index
    %c0_4 = arith.constant 0 : index
    %3 = vector.load %arg3[%c0_3, %c0_4] : memref<32x1xf32, #tpu.memory_space<vmem>>, vector<32x1xf32>
    %4 = vector.broadcast %3 : vector<32x1xf32> to vector<32x128xf32>
    %5 = arith.addf %2, %4 : vector<32x128xf32>
    %c0_5 = arith.constant 0 : index
    %c0_6 = arith.constant 0 : index
    %6 = vector.load %arg4[%c0_5, %c0_6] : memref<32x128xf32, #tpu.memory_space<vmem>>, vector<32x128xf32>
    tpu.vector_store %arg4[%c0_5, %c0_6], %5 {strides = array<i32>} : memref<32x128xf32, #tpu.memory_space<vmem>>, vector<32x128xf32>,
    return
  }
  func.func @transform_0(%arg0: i32) -> (i32, i32) {
    %c0_i32 = arith.constant 0 : i32
    %c0_i32_0 = arith.constant 0 : i32
    %c0_i32_1 = arith.constant 0 : i32
    return %c0_i32, %c0_i32_0 : i32, i32
  }
  func.func @transform_1(%arg0: i32) -> (i32, i32) {
    %c0_i32 = arith.constant 0 : i32
    %c0_i32_0 = arith.constant 0 : i32
    return %c0_i32, %arg0 : i32, i32
  }
  func.func @transform_2(%arg0: i32) -> (i32, i32) {
    %c0_i32 = arith.constant 0 : i32
    %c0_i32_0 = arith.constant 0 : i32
    %c0_i32_1 = arith.constant 0 : i32
    return %c0_i32, %c0_i32_0 : i32, i32
  }
  func.func @transform_3(%arg0: i32) -> (i32, i32) {
    %c0_i32 = arith.constant 0 : i32
    %c0_i32_0 = arith.constant 0 : i32
    return %c0_i32, %arg0 : i32, i32
  }
}

module attributes {stable_mosaic.version = 11 : i64} {
  func.func @_in_res_kernel(%arg0: i32, %arg1: memref<64x64xf32, #tpu.memory_space<vmem>>, %arg2: memref<64x64xf32, #tpu.memory_space<vmem>>, %arg3: memref<64x64xf32, #tpu.memory_space<vmem>>) attributes {dimension_semantics = [#tpu.dimension_semantics<parallel>], iteration_bounds = array<i64: 1>, scalar_prefetch = 0 : i64, scratch_operands = 0 : i64, tpu.core_type = #tpu.core_type<tc>, window_params = [{transform_indices = @transform_0, window_bounds = array<i64: 64, 64>}, {transform_indices = @transform_1, window_bounds = array<i64: 64, 64>}, {transform_indices = @transform_2, window_bounds = array<i64: 64, 64>}]} {
    %c0 = arith.constant 0 : index
    %c0_0 = arith.constant 0 : index
    %0 = vector.load %arg1[%c0, %c0_0] : memref<64x64xf32, #tpu.memory_space<vmem>>, vector<64x64xf32>
    %cst = arith.constant dense<0.000000e+00> : vector<64xf32>
    %1 = vector.multi_reduction <add>, %0, %cst [1] : vector<64x64xf32> to vector<64xf32>
    %2 = vector.shape_cast %1 : vector<64xf32> to vector<64x1xf32>
    %cst_1 = arith.constant 6.400000e+01 : f32
    %3 = vector.broadcast %cst_1 : f32 to vector<64x1xf32>
    %4 = arith.divf %2, %3 : vector<64x1xf32>
    %5 = vector.broadcast %4 : vector<64x1xf32> to vector<64x64xf32>
    %6 = arith.subf %0, %5 : vector<64x64xf32>
    %7 = arith.mulf %6, %6 : vector<64x64xf32>
    %cst_2 = arith.constant dense<0.000000e+00> : vector<64xf32>
    %8 = vector.multi_reduction <add>, %7, %cst_2 [1] : vector<64x64xf32> to vector<64xf32>
    %9 = vector.shape_cast %8 : vector<64xf32> to vector<64x1xf32>
    %cst_3 = arith.constant 6.400000e+01 : f32
    %10 = vector.broadcast %cst_3 : f32 to vector<64x1xf32>
    %11 = arith.divf %9, %10 : vector<64x1xf32>
    %12 = vector.broadcast %4 : vector<64x1xf32> to vector<64x64xf32>
    %13 = arith.subf %0, %12 : vector<64x64xf32>
    %cst_4 = arith.constant 9.99999974E-6 : f32
    %14 = vector.broadcast %cst_4 : f32 to vector<64x1xf32>
    %15 = arith.addf %11, %14 : vector<64x1xf32>
    %16 = math.rsqrt %15 : vector<64x1xf32>
    %17 = vector.broadcast %16 : vector<64x1xf32> to vector<64x64xf32>
    %18 = arith.mulf %13, %17 : vector<64x64xf32>
    %c0_5 = arith.constant 0 : index
    %c0_6 = arith.constant 0 : index
    %19 = vector.load %arg2[%c0_5, %c0_6] : memref<64x64xf32, #tpu.memory_space<vmem>>, vector<64x64xf32>
    %20 = arith.addf %19, %18 : vector<64x64xf32>
    %c0_7 = arith.constant 0 : index
    %c0_8 = arith.constant 0 : index
    %21 = vector.load %arg3[%c0_7, %c0_8] : memref<64x64xf32, #tpu.memory_space<vmem>>, vector<64x64xf32>
    tpu.vector_store %arg3[%c0_7, %c0_8], %20 {strides = array<i32>} : memref<64x64xf32, #tpu.memory_space<vmem>>, vector<64x64xf32>,
    return
  }
  func.func @transform_0(%arg0: i32) -> (i32, i32) {
    %c0_i32 = arith.constant 0 : i32
    %c0_i32_0 = arith.constant 0 : i32
    return %arg0, %c0_i32 : i32, i32
  }
  func.func @transform_1(%arg0: i32) -> (i32, i32) {
    %c0_i32 = arith.constant 0 : i32
    %c0_i32_0 = arith.constant 0 : i32
    return %arg0, %c0_i32 : i32, i32
  }
  func.func @transform_2(%arg0: i32) -> (i32, i32) {
    %c0_i32 = arith.constant 0 : i32
    %c0_i32_0 = arith.constant 0 : i32
    return %arg0, %c0_i32 : i32, i32
  }
}

module attributes {stable_mosaic.version = 11 : i64} {
  func.func @_mm_kernel(%arg0: i32, %arg1: memref<64x128xbf16, #tpu.memory_space<vmem>>, %arg2: memref<128x128xbf16, #tpu.memory_space<vmem>>, %arg3: memref<64x1xf32, #tpu.memory_space<vmem>>, %arg4: memref<64x128xf32, #tpu.memory_space<vmem>>) attributes {dimension_semantics = [#tpu.dimension_semantics<parallel>], iteration_bounds = array<i64: 1>, scalar_prefetch = 0 : i64, scratch_operands = 0 : i64, tpu.core_type = #tpu.core_type<tc>, window_params = [{pipeline_mode = #tpu.pipeline_mode<synchronous>, transform_indices = @transform_0, window_bounds = array<i64: 64, 128>}, {transform_indices = @transform_1, window_bounds = array<i64: 128, 128>}, {pipeline_mode = #tpu.pipeline_mode<synchronous>, transform_indices = @transform_2, window_bounds = array<i64: 64, 1>}, {transform_indices = @transform_3, window_bounds = array<i64: 64, 128>}]} {
    %c0 = arith.constant 0 : index
    %c0_0 = arith.constant 0 : index
    %0 = vector.load %arg1[%c0, %c0_0] : memref<64x128xbf16, #tpu.memory_space<vmem>>, vector<64x128xbf16>
    %c0_1 = arith.constant 0 : index
    %c0_2 = arith.constant 0 : index
    %1 = vector.load %arg2[%c0_1, %c0_2] : memref<128x128xbf16, #tpu.memory_space<vmem>>, vector<128x128xbf16>
    %cst = arith.constant dense<0.000000e+00> : vector<64x128xf32>
    %2 = tpu.matmul %0, %1, %cst {dimension_numbers = #tpu.dot_dimension_numbers<[1], [0], [0], [1], [0, 0, 1, 1], [], []>} : vector<64x128xbf16>, vector<128x128xbf16>, vector<64x128xf32> -> vector<64x128xf32>
    %c0_3 = arith.constant 0 : index
    %c0_4 = arith.constant 0 : index
    %3 = vector.load %arg3[%c0_3, %c0_4] : memref<64x1xf32, #tpu.memory_space<vmem>>, vector<64x1xf32>
    %4 = vector.broadcast %3 : vector<64x1xf32> to vector<64x128xf32>
    %5 = arith.addf %2, %4 : vector<64x128xf32>
    %c0_5 = arith.constant 0 : index
    %c0_6 = arith.constant 0 : index
    %6 = vector.load %arg4[%c0_5, %c0_6] : memref<64x128xf32, #tpu.memory_space<vmem>>, vector<64x128xf32>
    tpu.vector_store %arg4[%c0_5, %c0_6], %5 {strides = array<i32>} : memref<64x128xf32, #tpu.memory_space<vmem>>, vector<64x128xf32>,
    return
  }
  func.func @transform_0(%arg0: i32) -> (i32, i32) {
    %c0_i32 = arith.constant 0 : i32
    %c0_i32_0 = arith.constant 0 : i32
    %c0_i32_1 = arith.constant 0 : i32
    return %c0_i32, %c0_i32_0 : i32, i32
  }
  func.func @transform_1(%arg0: i32) -> (i32, i32) {
    %c0_i32 = arith.constant 0 : i32
    %c0_i32_0 = arith.constant 0 : i32
    return %c0_i32, %arg0 : i32, i32
  }
  func.func @transform_2(%arg0: i32) -> (i32, i32) {
    %c0_i32 = arith.constant 0 : i32
    %c0_i32_0 = arith.constant 0 : i32
    %c0_i32_1 = arith.constant 0 : i32
    return %c0_i32, %c0_i32_0 : i32, i32
  }
  func.func @transform_3(%arg0: i32) -> (i32, i32) {
    %c0_i32 = arith.constant 0 : i32
    %c0_i32_0 = arith.constant 0 : i32
    return %c0_i32, %arg0 : i32, i32
  }
}

module attributes {stable_mosaic.version = 11 : i64} {
  func.func @_mm_kernel(%arg0: i32, %arg1: memref<32x64xbf16, #tpu.memory_space<vmem>>, %arg2: memref<64x512xbf16, #tpu.memory_space<vmem>>, %arg3: memref<32x1xf32, #tpu.memory_space<vmem>>, %arg4: memref<32x512xf32, #tpu.memory_space<vmem>>) attributes {dimension_semantics = [#tpu.dimension_semantics<parallel>], iteration_bounds = array<i64: 1>, scalar_prefetch = 0 : i64, scratch_operands = 0 : i64, tpu.core_type = #tpu.core_type<tc>, window_params = [{pipeline_mode = #tpu.pipeline_mode<synchronous>, transform_indices = @transform_0, window_bounds = array<i64: 32, 64>}, {transform_indices = @transform_1, window_bounds = array<i64: 64, 512>}, {pipeline_mode = #tpu.pipeline_mode<synchronous>, transform_indices = @transform_2, window_bounds = array<i64: 32, 1>}, {transform_indices = @transform_3, window_bounds = array<i64: 32, 512>}]} {
    %c0 = arith.constant 0 : index
    %c0_0 = arith.constant 0 : index
    %0 = vector.load %arg1[%c0, %c0_0] : memref<32x64xbf16, #tpu.memory_space<vmem>>, vector<32x64xbf16>
    %c0_1 = arith.constant 0 : index
    %c0_2 = arith.constant 0 : index
    %1 = vector.load %arg2[%c0_1, %c0_2] : memref<64x512xbf16, #tpu.memory_space<vmem>>, vector<64x512xbf16>
    %cst = arith.constant dense<0.000000e+00> : vector<32x512xf32>
    %2 = tpu.matmul %0, %1, %cst {dimension_numbers = #tpu.dot_dimension_numbers<[1], [0], [0], [1], [0, 0, 1, 1], [], []>} : vector<32x64xbf16>, vector<64x512xbf16>, vector<32x512xf32> -> vector<32x512xf32>
    %c0_3 = arith.constant 0 : index
    %c0_4 = arith.constant 0 : index
    %3 = vector.load %arg3[%c0_3, %c0_4] : memref<32x1xf32, #tpu.memory_space<vmem>>, vector<32x1xf32>
    %4 = vector.broadcast %3 : vector<32x1xf32> to vector<32x512xf32>
    %5 = arith.addf %2, %4 : vector<32x512xf32>
    %c0_5 = arith.constant 0 : index
    %c0_6 = arith.constant 0 : index
    %6 = vector.load %arg4[%c0_5, %c0_6] : memref<32x512xf32, #tpu.memory_space<vmem>>, vector<32x512xf32>
    tpu.vector_store %arg4[%c0_5, %c0_6], %5 {strides = array<i32>} : memref<32x512xf32, #tpu.memory_space<vmem>>, vector<32x512xf32>,
    return
  }
  func.func @transform_0(%arg0: i32) -> (i32, i32) {
    %c0_i32 = arith.constant 0 : i32
    %c0_i32_0 = arith.constant 0 : i32
    %c0_i32_1 = arith.constant 0 : i32
    return %c0_i32, %c0_i32_0 : i32, i32
  }
  func.func @transform_1(%arg0: i32) -> (i32, i32) {
    %c0_i32 = arith.constant 0 : i32
    %c0_i32_0 = arith.constant 0 : i32
    return %c0_i32, %arg0 : i32, i32
  }
  func.func @transform_2(%arg0: i32) -> (i32, i32) {
    %c0_i32 = arith.constant 0 : i32
    %c0_i32_0 = arith.constant 0 : i32
    %c0_i32_1 = arith.constant 0 : i32
    return %c0_i32, %c0_i32_0 : i32, i32
  }
  func.func @transform_3(%arg0: i32) -> (i32, i32) {
    %c0_i32 = arith.constant 0 : i32
    %c0_i32_0 = arith.constant 0 : i32
    return %c0_i32, %arg0 : i32, i32
  }
}

module attributes {stable_mosaic.version = 11 : i64} {
  func.func @_in_kernel(%arg0: i32, %arg1: memref<16x1024xf32, #tpu.memory_space<vmem>>, %arg2: memref<16x1024xf32, #tpu.memory_space<vmem>>) attributes {dimension_semantics = [#tpu.dimension_semantics<parallel>], iteration_bounds = array<i64: 1>, scalar_prefetch = 0 : i64, scratch_operands = 0 : i64, tpu.core_type = #tpu.core_type<tc>, window_params = [{transform_indices = @transform_0, window_bounds = array<i64: 16, 1024>}, {transform_indices = @transform_1, window_bounds = array<i64: 16, 1024>}]} {
    %c0 = arith.constant 0 : index
    %c0_0 = arith.constant 0 : index
    %0 = vector.load %arg1[%c0, %c0_0] : memref<16x1024xf32, #tpu.memory_space<vmem>>, vector<16x1024xf32>
    %cst = arith.constant dense<0.000000e+00> : vector<16xf32>
    %1 = vector.multi_reduction <add>, %0, %cst [1] : vector<16x1024xf32> to vector<16xf32>
    %2 = vector.shape_cast %1 : vector<16xf32> to vector<16x1xf32>
    %cst_1 = arith.constant 1.024000e+03 : f32
    %3 = vector.broadcast %cst_1 : f32 to vector<16x1xf32>
    %4 = arith.divf %2, %3 : vector<16x1xf32>
    %5 = vector.broadcast %4 : vector<16x1xf32> to vector<16x1024xf32>
    %6 = arith.subf %0, %5 : vector<16x1024xf32>
    %7 = arith.mulf %6, %6 : vector<16x1024xf32>
    %cst_2 = arith.constant dense<0.000000e+00> : vector<16xf32>
    %8 = vector.multi_reduction <add>, %7, %cst_2 [1] : vector<16x1024xf32> to vector<16xf32>
    %9 = vector.shape_cast %8 : vector<16xf32> to vector<16x1xf32>
    %cst_3 = arith.constant 1.024000e+03 : f32
    %10 = vector.broadcast %cst_3 : f32 to vector<16x1xf32>
    %11 = arith.divf %9, %10 : vector<16x1xf32>
    %12 = vector.broadcast %4 : vector<16x1xf32> to vector<16x1024xf32>
    %13 = arith.subf %0, %12 : vector<16x1024xf32>
    %cst_4 = arith.constant 9.99999974E-6 : f32
    %14 = vector.broadcast %cst_4 : f32 to vector<16x1xf32>
    %15 = arith.addf %11, %14 : vector<16x1xf32>
    %16 = math.rsqrt %15 : vector<16x1xf32>
    %17 = vector.broadcast %16 : vector<16x1xf32> to vector<16x1024xf32>
    %18 = arith.mulf %13, %17 : vector<16x1024xf32>
    %cst_5 = arith.constant 0.000000e+00 : f32
    %19 = vector.broadcast %cst_5 : f32 to vector<16x1024xf32>
    %20 = arith.maximumf %18, %19 : vector<16x1024xf32>
    %c0_6 = arith.constant 0 : index
    %c0_7 = arith.constant 0 : index
    %21 = vector.load %arg2[%c0_6, %c0_7] : memref<16x1024xf32, #tpu.memory_space<vmem>>, vector<16x1024xf32>
    tpu.vector_store %arg2[%c0_6, %c0_7], %20 {strides = array<i32>} : memref<16x1024xf32, #tpu.memory_space<vmem>>, vector<16x1024xf32>,
    return
  }
  func.func @transform_0(%arg0: i32) -> (i32, i32) {
    %c0_i32 = arith.constant 0 : i32
    %c0_i32_0 = arith.constant 0 : i32
    return %arg0, %c0_i32 : i32, i32
  }
  func.func @transform_1(%arg0: i32) -> (i32, i32) {
    %c0_i32 = arith.constant 0 : i32
    %c0_i32_0 = arith.constant 0 : i32
    return %arg0, %c0_i32 : i32, i32
  }
}

module attributes {stable_mosaic.version = 11 : i64} {
  func.func @_mm_kernel(%arg0: i32, %arg1: memref<3x392xbf16, #tpu.memory_space<vmem>>, %arg2: memref<392x1024xbf16, #tpu.memory_space<vmem>>, %arg3: memref<3x1xf32, #tpu.memory_space<vmem>>, %arg4: memref<3x1024xf32, #tpu.memory_space<vmem>>) attributes {dimension_semantics = [#tpu.dimension_semantics<parallel>], iteration_bounds = array<i64: 2>, scalar_prefetch = 0 : i64, scratch_operands = 0 : i64, tpu.core_type = #tpu.core_type<tc>, window_params = [{pipeline_mode = #tpu.pipeline_mode<synchronous>, transform_indices = @transform_0, window_bounds = array<i64: 3, 392>}, {transform_indices = @transform_1, window_bounds = array<i64: 392, 1024>}, {pipeline_mode = #tpu.pipeline_mode<synchronous>, transform_indices = @transform_2, window_bounds = array<i64: 3, 1>}, {transform_indices = @transform_3, window_bounds = array<i64: 3, 1024>}]} {
    %c0 = arith.constant 0 : index
    %c0_0 = arith.constant 0 : index
    %0 = vector.load %arg1[%c0, %c0_0] : memref<3x392xbf16, #tpu.memory_space<vmem>>, vector<3x392xbf16>
    %c0_1 = arith.constant 0 : index
    %c0_2 = arith.constant 0 : index
    %1 = vector.load %arg2[%c0_1, %c0_2] : memref<392x1024xbf16, #tpu.memory_space<vmem>>, vector<392x1024xbf16>
    %cst = arith.constant dense<0.000000e+00> : vector<3x1024xf32>
    %2 = tpu.matmul %0, %1, %cst {dimension_numbers = #tpu.dot_dimension_numbers<[1], [0], [0], [1], [0, 0, 1, 1], [], []>} : vector<3x392xbf16>, vector<392x1024xbf16>, vector<3x1024xf32> -> vector<3x1024xf32>
    %c0_3 = arith.constant 0 : index
    %c0_4 = arith.constant 0 : index
    %3 = vector.load %arg3[%c0_3, %c0_4] : memref<3x1xf32, #tpu.memory_space<vmem>>, vector<3x1xf32>
    %4 = vector.broadcast %3 : vector<3x1xf32> to vector<3x1024xf32>
    %5 = arith.addf %2, %4 : vector<3x1024xf32>
    %6 = math.tanh %5 : vector<3x1024xf32>
    %c0_5 = arith.constant 0 : index
    %c0_6 = arith.constant 0 : index
    %7 = vector.load %arg4[%c0_5, %c0_6] : memref<3x1024xf32, #tpu.memory_space<vmem>>, vector<3x1024xf32>
    tpu.vector_store %arg4[%c0_5, %c0_6], %6 {strides = array<i32>} : memref<3x1024xf32, #tpu.memory_space<vmem>>, vector<3x1024xf32>,
    return
  }
  func.func @transform_0(%arg0: i32) -> (i32, i32) {
    %c0_i32 = arith.constant 0 : i32
    %c0_i32_0 = arith.constant 0 : i32
    %c0_i32_1 = arith.constant 0 : i32
    return %c0_i32, %c0_i32_0 : i32, i32
  }
  func.func @transform_1(%arg0: i32) -> (i32, i32) {
    %c0_i32 = arith.constant 0 : i32
    %c0_i32_0 = arith.constant 0 : i32
    return %c0_i32, %arg0 : i32, i32
  }
  func.func @transform_2(%arg0: i32) -> (i32, i32) {
    %c0_i32 = arith.constant 0 : i32
    %c0_i32_0 = arith.constant 0 : i32
    %c0_i32_1 = arith.constant 0 : i32
    return %c0_i32, %c0_i32_0 : i32, i32
  }
  func.func @transform_3(%arg0: i32) -> (i32, i32) {
    %c0_i32 = arith.constant 0 : i32
    %c0_i32_0 = arith.constant 0 : i32
    return %c0_i32, %arg0 : i32, i32
  }
}

</mosaic_0001>

<bundles_post_ra>
// kernel: tile.1
= control target key start
LH: loop header
LB: loop body
LE: loop exit
PB: predicated region body
PF: predicated region fallthrough
CT: control target
= control target key end

     0   :  { %s66_s8 = smov 125   ;;  %s67_s9 = smov 123   ;;  %vm7_vm0 = vcmask 7168   ;;  %s117_s0 = inlined_call_operand.vmem [shape: f32[4,8], index: 0, kind: input, shape index: {}]   ;;  %s118_s1 = inlined_call_operand.vmem [shape: f32[32,1], index: 1, kind: output, shape index: {}]  }
   0x1   :  { %v4_v0 = vld [vmem:[%s117_s0] sm:$0xf]  ;;  %s65_s0 = smov 127   ;;  %s68_s10 = smov 126  }
   0x2   :  { %5 = vst [vmem:[#allocation0] sm:$0xf] %v4_v0  ;;  %s69_s11 = smov 124   ;;  %s70_s12 = smov 122  }
   0x3   :  { %s71_s13 = smov 121  }
   0x9   :  { %v9_v1 = vld [vmem:[#allocation0] sm:$0xf]  }
   0xa   :  { %v21_v2 = vld [vmem:[#allocation0] sm:$0xf]   ;;  %10 = vrot.lane.b32.xlu0 %v9_v1, %s65_s0 }
   0xb   :  { %22 = vrot.lane.b32.xlu1 %v21_v2, %s66_s8  ;;  %v33_v3 = vld [vmem:[#allocation0] sm:$0xf]  }
   0xc   :  { %34 = vrot.lane.b32.xlu2 %v33_v3, %s67_s9  ;;  %v15_v4 = vld [vmem:[#allocation0] sm:$0xf]  }
   0xd   :  { %v27_v5 = vld [vmem:[#allocation0] sm:$0xf]  }
   0xe   :  { %v39_v6 = vld [vmem:[#allocation0] sm:$0xf]  }
   0xf   :  { %v45_v7 = vld [vmem:[#allocation0] sm:$0xf]  }
  0x10   :  { %v6_v8 = vld [vmem:[#allocation0] sm:$0xf]  }
  0x11   :  { %8 = vst.msk [vmem:[%s118_s1] ss:$8 sm:$0xf] %vm7_vm0, %v6_v8  }
  0x12   :  { %16 = vrot.lane.b32.xlu0 %v15_v4, %s68_s10 }
  0x13   :  { %28 = vrot.lane.b32.xlu1 %v27_v5, %s69_s11 }
  0x14   :  { %40 = vrot.lane.b32.xlu2 %v39_v6, %s70_s12 }
  0x1a   :  { %46 = vrot.lane.b32.xlu0 %v45_v7, %s71_s13 }
  0x66   :  { %v35_v9 = vpop.permute.xlu2 %34  }
  0x67   :  { %55 = vst.msk [vmem:[%s118_s1 + $0x5] ss:$8 sm:$0xf] %vm7_vm0, %v35_v9  }
  0x6e   :  { %v41_v10 = vpop.permute.xlu2 %40  }
  0x6f   :  { %56 = vst.msk [vmem:[%s118_s1 + $0x6] ss:$8 sm:$0xf] %vm7_vm0, %v41_v10  }
  0x7c   :  { %v11_v11 = vpop.permute.xlu0 %10  }
  0x7d   :  { %v23_v12 = vpop.permute.xlu1 %22   ;;  %51 = vst.msk [vmem:[%s118_s1 + $0x1] ss:$8 sm:$0xf] %vm7_vm0, %v11_v11  }
  0x7e   :  { %53 = vst.msk [vmem:[%s118_s1 + $0x3] ss:$8 sm:$0xf] %vm7_vm0, %v23_v12  }
  0x84   :  { %v17_v13 = vpop.permute.xlu0 %16  }
  0x85   :  { %v29_v14 = vpop.permute.xlu1 %28   ;;  %52 = vst.msk [vmem:[%s118_s1 + $0x2] ss:$8 sm:$0xf] %vm7_vm0, %v17_v13  }
  0x86   :  { %54 = vst.msk [vmem:[%s118_s1 + $0x4] ss:$8 sm:$0xf] %vm7_vm0, %v29_v14  }
  0x8c   :  { %v47_v15 = vpop.permute.xlu0 %46  }
  0x8d   :  { %57 = vst.msk [vmem:[%s118_s1 + $0x7] ss:$8 sm:$0xf] %vm7_vm0, %v47_v15  }

// kernel: tile.14
= control target key start
LH: loop header
LB: loop body
LE: loop exit
PB: predicated region body
PF: predicated region fallthrough
CT: control target
= control target key end

     0   :  { %2 = vsyncpa [#allocation1], 0  ;;  %s48_s8 = smov [#allocation0]   ;;  %s65_s0 = inlined_call_operand.hbm [shape: f32[8], index: 0, kind: input, shape index: {}]   ;;  %s66_s1 = inlined_call_operand.vmem [shape: f32[4,8], index: 1, kind: output, shape index: {}]  }
   0x1   :  { %s8_s0 = sshll.u32 %s65_s0, 4  ;;  %s10_s9 = sshll.u32 %s48_s8, 4  ;;  %s9_s0 = int_to_ptr.hbm [resolvable:$true] %s8_s0  ;;  %s11_s9 = int_to_ptr.vmem [resolvable:$true] %s10_s9 }
   0x2   :  { %13 = dma.hbm_to_vmem [thread:$0]  %s9_s0, 16, %s11_s9, [#allocation1]  }
   0x3   :  { %46 = dma.done.wait [#allocation1], 16  }
   0x4   :  { %47 = vsyncadd [#allocation1], 4294967280  ;;  %v18_v0 = vld [vmem:[#allocation0] ss:$0 sm:$0xff] }
   0x5   :  { %19 = vst [vmem:[%s66_s1] sm:$0xf] %v18_v0 }
   0x6   :  { %20 = vsyncpa [#allocation1], 1 }

// kernel: tile.0
= control target key start
LH: loop header
LB: loop body
LE: loop exit
PB: predicated region body
PF: predicated region fallthrough
CT: control target
= control target key end

     0   :  { %s176_s8 = smov 127   ;;  %s177_s9 = smov 123   ;;  %vm7_vm0 = vcmask 7168   ;;  %s331_s0 = inlined_call_operand.vmem [shape: f32[4,16], index: 0, kind: input, shape index: {}]   ;;  %s332_s1 = inlined_call_operand.vmem [shape: f32[64,1], index: 1, kind: output, shape index: {}]  }
   0x1   :  { %v4_v0 = vld [vmem:[%s331_s0] sm:$0xf]  ;;  %s175_s0 = smov 125   ;;  %s178_s10 = smov 124  }
   0x2   :  { %5 = vst [vmem:[#allocation0] sm:$0xf] %v4_v0  ;;  %s179_s11 = smov 126   ;;  %s180_s12 = smov 122  }
   0x3   :  { %s181_s13 = smov 120   ;;  %s182_s14 = smov 121  }
   0x4   :  { %s183_s15 = smov 119   ;;  %s184_s16 = smov 117  }
   0x5   :  { %s185_s17 = smov 118   ;;  %s186_s18 = smov 116  }
   0x6   :  { %s187_s19 = smov 114   ;;  %s188_s20 = smov 115  }
   0x7   :  { %s189_s21 = smov 113  }
   0x9   :  { %v26_v1 = vld [vmem:[#allocation0] sm:$0xf]  }
   0xa   :  { %v10_v2 = vld [vmem:[#allocation0] sm:$0xf]   ;;  %27 = vrot.lane.b32.xlu1 %v26_v1, %s175_s0 }
   0xb   :  { %11 = vrot.lane.b32.xlu0 %v10_v2, %s176_s8  ;;  %v42_v3 = vld [vmem:[#allocation0] sm:$0xf]  }
   0xc   :  { %43 = vrot.lane.b32.xlu2 %v42_v3, %s177_s9  ;;  %v34_v4 = vld [vmem:[#allocation0] sm:$0xf]  }
   0xd   :  { %v18_v5 = vld [vmem:[#allocation0] sm:$0xf]  }
   0xe   :  { %v50_v6 = vld [vmem:[#allocation0] sm:$0xf]  }
   0xf   :  { %v66_v7 = vld [vmem:[#allocation0] sm:$0xf]  }
  0x10   :  { %v58_v8 = vld [vmem:[#allocation0] sm:$0xf]  }
  0x11   :  { %v74_v9 = vld [vmem:[#allocation0] sm:$0xf]  }
  0x12   :  { %35 = vrot.lane.b32.xlu1 %v34_v4, %s178_s10  ;;  %v90_v10 = vld [vmem:[#allocation0] sm:$0xf]  }
  0x13   :  { %19 = vrot.lane.b32.xlu0 %v18_v5, %s179_s11  ;;  %v82_v11 = vld [vmem:[#allocation0] sm:$0xf]  }
  0x14   :  { %51 = vrot.lane.b32.xlu2 %v50_v6, %s180_s12  ;;  %v98_v12 = vld [vmem:[#allocation0] sm:$0xf]  }
  0x15   :  { %v114_v13 = vld [vmem:[#allocation0] sm:$0xf]  }
  0x16   :  { %v106_v14 = vld [vmem:[#allocation0] sm:$0xf]  }
  0x17   :  { %v122_v15 = vld [vmem:[#allocation0] sm:$0xf]  }
  0x18   :  { %v6_v22 = vld [vmem:[#allocation0] sm:$0xf]  }
  0x19   :  { %8 = vst.msk [vmem:[%s332_s1] ss:$16 sm:$0x3] %vm7_vm0, %v6_v22  }
  0x1a   :  { %67 = vrot.lane.b32.xlu1 %v66_v7, %s181_s13  ;;  %9 = vst.msk [vmem:[%s332_s1] ss:$16 sm:$0xc] %vm7_vm0, %v6_v22  }
  0x1b   :  { %59 = vrot.lane.b32.xlu0 %v58_v8, %s182_s14 }
  0x1c   :  { %75 = vrot.lane.b32.xlu2 %v74_v9, %s183_s15 }
  0x22   :  { %91 = vrot.lane.b32.xlu1 %v90_v10, %s184_s16 }
  0x23   :  { %83 = vrot.lane.b32.xlu0 %v82_v11, %s185_s17 }
  0x24   :  { %99 = vrot.lane.b32.xlu2 %v98_v12, %s186_s18 }
  0x2a   :  { %115 = vrot.lane.b32.xlu1 %v114_v13, %s187_s19 }
  0x2b   :  { %107 = vrot.lane.b32.xlu0 %v106_v14, %s188_s20 }
  0x2c   :  { %123 = vrot.lane.b32.xlu2 %v122_v15, %s189_s21 }
  0x66   :  { %v44_v16 = vpop.permute.xlu2 %43  }
  0x67   :  { %138 = vst.msk [vmem:[%s332_s1 + $0x5] ss:$16 sm:$0x3] %vm7_vm0, %v44_v16  }
  0x68   :  { %139 = vst.msk [vmem:[%s332_s1 + $0x5] ss:$16 sm:$0xc] %vm7_vm0, %v44_v16  }
  0x6e   :  { %v52_v17 = vpop.permute.xlu2 %51  }
  0x6f   :  { %140 = vst.msk [vmem:[%s332_s1 + $0x6] ss:$16 sm:$0x3] %vm7_vm0, %v52_v17  }
  0x70   :  { %141 = vst.msk [vmem:[%s332_s1 + $0x6] ss:$16 sm:$0xc] %vm7_vm0, %v52_v17  }
  0x76   :  { %v76_v18 = vpop.permute.xlu2 %75  }
  0x77   :  { %146 = vst.msk [vmem:[%s332_s1 + $0x9] ss:$16 sm:$0x3] %vm7_vm0, %v76_v18  }
  0x78   :  { %147 = vst.msk [vmem:[%s332_s1 + $0x9] ss:$16 sm:$0xc] %vm7_vm0, %v76_v18  }
  0x7c   :  { %v28_v19 = vpop.permute.xlu1 %27  }
  0x7d   :  { %v12_v20 = vpop.permute.xlu0 %11   ;;  %134 = vst.msk [vmem:[%s332_s1 + $0x3] ss:$16 sm:$0x3] %vm7_vm0, %v28_v19  }
  0x7e   :  { %135 = vst.msk [vmem:[%s332_s1 + $0x3] ss:$16 sm:$0xc] %vm7_vm0, %v28_v19   ;;  %v100_v21 = vpop.permute.xlu2 %99  }
  0x7f   :  { %130 = vst.msk [vmem:[%s332_s1 + $0x1] ss:$16 sm:$0x3] %vm7_vm0, %v12_v20  }
  0x80   :  { %131 = vst.msk [vmem:[%s332_s1 + $0x1] ss:$16 sm:$0xc] %vm7_vm0, %v12_v20  }
  0x81   :  { %152 = vst.msk [vmem:[%s332_s1 + $0xc] ss:$16 sm:$0x3] %vm7_vm0, %v100_v21  }
  0x82   :  { %153 = vst.msk [vmem:[%s332_s1 + $0xc] ss:$16 sm:$0xc] %vm7_vm0, %v100_v21  }
  0x84   :  { %v36_v23 = vpop.permute.xlu1 %35  }
  0x85   :  { %v20_v24 = vpop.permute.xlu0 %19   ;;  %136 = vst.msk [vmem:[%s332_s1 + $0x4] ss:$16 sm:$0x3] %vm7_vm0, %v36_v23  }
  0x86   :  { %137 = vst.msk [vmem:[%s332_s1 + $0x4] ss:$16 sm:$0xc] %vm7_vm0, %v36_v23   ;;  %v124_v25 = vpop.permute.xlu2 %123  }
  0x87   :  { %132 = vst.msk [vmem:[%s332_s1 + $0x2] ss:$16 sm:$0x3] %vm7_vm0, %v20_v24  }
  0x88   :  { %133 = vst.msk [vmem:[%s332_s1 + $0x2] ss:$16 sm:$0xc] %vm7_vm0, %v20_v24  }
  0x89   :  { %158 = vst.msk [vmem:[%s332_s1 + $0xf] ss:$16 sm:$0x3] %vm7_vm0, %v124_v25  }
  0x8a   :  { %159 = vst.msk [vmem:[%s332_s1 + $0xf] ss:$16 sm:$0xc] %vm7_vm0, %v124_v25  }
  0x8c   :  { %v68_v26 = vpop.permute.xlu1 %67  }
  0x8d   :  { %v60_v27 = vpop.permute.xlu0 %59   ;;  %144 = vst.msk [vmem:[%s332_s1 + $0x8] ss:$16 sm:$0x3] %vm7_vm0, %v68_v26  }
  0x8e   :  { %145 = vst.msk [vmem:[%s332_s1 + $0x8] ss:$16 sm:$0xc] %vm7_vm0, %v68_v26  }
  0x8f   :  { %142 = vst.msk [vmem:[%s332_s1 + $0x7] ss:$16 sm:$0x3] %vm7_vm0, %v60_v27  }
  0x90   :  { %143 = vst.msk [vmem:[%s332_s1 + $0x7] ss:$16 sm:$0xc] %vm7_vm0, %v60_v27  }
  0x94   :  { %v92_v28 = vpop.permute.xlu1 %91  }
  0x95   :  { %v84_v29 = vpop.permute.xlu0 %83   ;;  %150 = vst.msk [vmem:[%s332_s1 + $0xb] ss:$16 sm:$0x3] %vm7_vm0, %v92_v28  }
  0x96   :  { %151 = vst.msk [vmem:[%s332_s1 + $0xb] ss:$16 sm:$0xc] %vm7_vm0, %v92_v28  }
  0x97   :  { %148 = vst.msk [vmem:[%s332_s1 + $0xa] ss:$16 sm:$0x3] %vm7_vm0, %v84_v29  }
  0x98   :  { %149 = vst.msk [vmem:[%s332_s1 + $0xa] ss:$16 sm:$0xc] %vm7_vm0, %v84_v29  }
  0x9c   :  { %v116_v30 = vpop.permute.xlu1 %115  }
  0x9d   :  { %v108_v31 = vpop.permute.xlu0 %107   ;;  %156 = vst.msk [vmem:[%s332_s1 + $0xe] ss:$16 sm:$0x3] %vm7_vm0, %v116_v30  }
  0x9e   :  { %157 = vst.msk [vmem:[%s332_s1 + $0xe] ss:$16 sm:$0xc] %vm7_vm0, %v116_v30  }
  0x9f   :  { %154 = vst.msk [vmem:[%s332_s1 + $0xd] ss:$16 sm:$0x3] %vm7_vm0, %v108_v31  }
  0xa0   :  { %155 = vst.msk [vmem:[%s332_s1 + $0xd] ss:$16 sm:$0xc] %vm7_vm0, %v108_v31  }

// kernel: tile.10
= control target key start
LH: loop header
LB: loop body
LE: loop exit
PB: predicated region body
PF: predicated region fallthrough
CT: control target
= control target key end

     0   :  { %2 = vsyncpa [#allocation1], 0  ;;  %s48_s8 = smov [#allocation0]   ;;  %s65_s0 = inlined_call_operand.hbm [shape: f32[16], index: 0, kind: input, shape index: {}]   ;;  %s66_s1 = inlined_call_operand.vmem [shape: f32[4,16], index: 1, kind: output, shape index: {}]  }
   0x1   :  { %s8_s0 = sshll.u32 %s65_s0, 4  ;;  %s10_s9 = sshll.u32 %s48_s8, 4  ;;  %s9_s0 = int_to_ptr.hbm [resolvable:$true] %s8_s0  ;;  %s11_s9 = int_to_ptr.vmem [resolvable:$true] %s10_s9 }
   0x2   :  { %13 = dma.hbm_to_vmem [thread:$0]  %s9_s0, 16, %s11_s9, [#allocation1]  }
   0x3   :  { %46 = dma.done.wait [#allocation1], 16  }
   0x4   :  { %47 = vsyncadd [#allocation1], 4294967280  ;;  %v18_v0 = vld [vmem:[#allocation0] ss:$0 sm:$0xff] }
   0x5   :  { %19 = vst [vmem:[%s66_s1] sm:$0xf] %v18_v0 }
   0x6   :  { %20 = vsyncpa [#allocation1], 1 }

// kernel: generator_forward.18
= control target key start
LH: loop header
LB: loop body
LE: loop exit
PB: predicated region body
PF: predicated region fallthrough
CT: control target
= control target key end

     0   :  { %s1586_s12 = smov 0   ;;  %s1588_s13 = smov 0   ;;  %s2006_s0 = inlined_call_operand.vmem [shape: bf16[8,147], index: 0, kind: input, shape index: {}]   ;;  %s2007_s1 = inlined_call_operand.vmem [shape: bf16[147,2048], index: 1, kind: input, shape index: {}]   ;;  %s2008_s2 = inlined_call_operand.vmem [shape: f32[8,1], index: 2, kind: input, shape index: {}]   ;;  %s2009_s3 = inlined_call_operand.vmem [shape: f32[8,2048], index: 3, kind: output, shape index: {}]  }
   0x1   :  { %s1590_s14 = smov 0  }
   0x2 LB: > { %s1131_s15 = sadd.s32 4294967295, %s1562_s14   ;;  %s1603_s16 = sadd.s32 1, %s1562_s14   ;;  %s1562_s14 = sphi %s1590_s14, %s2012_s14   ;;  %s1558_s13 = sphi %s1588_s13, %s2011_s13   ;;  %s1554_s12 = sphi %s1586_s12, %s2010_s12  }
   0x3   : > { %s38_s17 = ssub.s32 %s1562_s14, %s1603_s16  ;;  %s41_s18 = sadd.s32 1, %s1558_s13 }
   0x4   : > { %p39_p0 = scmp.eq.s32.totalorder %s38_s17, 0  ;;  %p48_p1 = scmp.ne.s32.totalorder %s1558_s13, %s1554_s12 }
   0x5   : > { %p49_p2 = scmp.eq.s32.totalorder %s1562_s14, 0  ;;  %p1134_p4 = scmp.ge.s32.totalorder %s1562_s14, 2 }
   0x6   : > { %s1612_s19 = scalar_select %p39_p0, %s1558_s13, %s41_s18  }
   0x7   : > { %p50_p3 = por %p49_p2, %p48_p1  ;;  %127 = sbr.rel (%p1134_p4) target bundleno = 92 (0x5c), region = 24 }
   0xc   : > { %130 = sbr.rel (!%p50_p3) target bundleno = 92 (0x5c), region = 28  ;;  %s132_s20 = sand.u32 (%p50_p3), 1, %s1558_s13  }
   0xd   : > { %s1438_s21 = sshll.u32 (%p50_p3), %s1562_s14, 5  ;;  %s1511_s22 = smul.u32 (%p50_p3), 608, %s132_s20 }
   0xe   : > { %s1620_s25 = scalar_lea.vmem (%p50_p3), %s2007_s1, %s1438_s21 }
   0xf   : > { %v150_v0 = vld [vmem:[%s1620_s25] sm:$0xff] (%p50_p3)  ;;  %v152_v1 = vld [vmem:[%s1620_s25 + $0x8] sm:$0xff] (%p50_p3)  ;;  %v154_v2 = vld [vmem:[%s1620_s25 + $0x10] sm:$0xff] (%p50_p3)  ;;  %s1625_s26 = scalar_lea.vmem (%p50_p3), [#allocation2], %s1511_s22 }
  0x10   : > { %151 = vst [vmem:[%s1625_s26] sm:$0xff] (%p50_p3), %v150_v0  ;;  %v156_v3 = vld [vmem:[%s1620_s25 + $0x18] sm:$0xff] (%p50_p3)  ;;  %v158_v4 = vld [vmem:[%s1620_s25 + $0x40] sm:$0xff] (%p50_p3)  ;;  %v160_v5 = vld [vmem:[%s1620_s25 + $0x48] sm:$0xff] (%p50_p3) }
  0x11   : > { %153 = vst [vmem:[%s1625_s26 + $0x8] sm:$0xff] %v152_v1  ;;  %v162_v6 = vld [vmem:[%s1620_s25 + $0x50] sm:$0xff]  ;;  %v164_v7 = vld [vmem:[%s1620_s25 + $0x58] sm:$0xff]  ;;  %v166_v8 = vld [vmem:[%s1620_s25 + $0x80] sm:$0xff] }
  0x12   : > { %155 = vst [vmem:[%s1625_s26 + $0x10] sm:$0xff] %v154_v2  ;;  %v168_v9 = vld [vmem:[%s1620_s25 + $0x88] sm:$0xff]  ;;  %v170_v10 = vld [vmem:[%s1620_s25 + $0x90] sm:$0xff]  ;;  %v172_v11 = vld [vmem:[%s1620_s25 + $0x98] sm:$0xff] }
  0x13   : > { %157 = vst [vmem:[%s1625_s26 + $0x18] sm:$0xff] %v156_v3  ;;  %v174_v12 = vld [vmem:[%s1620_s25 + $0xc0] sm:$0xff]  ;;  %v176_v13 = vld [vmem:[%s1620_s25 + $0xc8] sm:$0xff]  ;;  %v178_v14 = vld [vmem:[%s1620_s25 + $0xd0] sm:$0xff] }
  0x14   : > { %159 = vst [vmem:[%s1625_s26 + $0x20] sm:$0xff] %v158_v4  ;;  %v180_v15 = vld [vmem:[%s1620_s25 + $0xd8] sm:$0xff]  ;;  %v182_v16 = vld [vmem:[%s1620_s25 + $0x100] sm:$0xff]  ;;  %v184_v17 = vld [vmem:[%s1620_s25 + $0x108] sm:$0xff] }
  0x15   : > { %161 = vst [vmem:[%s1625_s26 + $0x28] sm:$0xff] %v160_v5  ;;  %v186_v18 = vld [vmem:[%s1620_s25 + $0x110] sm:$0xff]  ;;  %v188_v19 = vld [vmem:[%s1620_s25 + $0x118] sm:$0xff]  ;;  %v190_v20 = vld [vmem:[%s1620_s25 + $0x140] sm:$0xff] }
  0x16   : > { %163 = vst [vmem:[%s1625_s26 + $0x30] sm:$0xff] %v162_v6  ;;  %v192_v21 = vld [vmem:[%s1620_s25 + $0x148] sm:$0xff]  ;;  %v194_v22 = vld [vmem:[%s1620_s25 + $0x150] sm:$0xff]  ;;  %v196_v23 = vld [vmem:[%s1620_s25 + $0x158] sm:$0xff] }
  0x17   : > { %165 = vst [vmem:[%s1625_s26 + $0x38] sm:$0xff] %v164_v7  ;;  %v198_v24 = vld [vmem:[%s1620_s25 + $0x180] sm:$0xff]  ;;  %v200_v25 = vld [vmem:[%s1620_s25 + $0x188] sm:$0xff]  ;;  %v202_v26 = vld [vmem:[%s1620_s25 + $0x190] sm:$0xff] }
  0x18   : > { %167 = vst [vmem:[%s1625_s26 + $0x40] sm:$0xff] %v166_v8  ;;  %v204_v27 = vld [vmem:[%s1620_s25 + $0x198] sm:$0xff]  ;;  %v206_v28 = vld [vmem:[%s1620_s25 + $0x1c0] sm:$0xff]  ;;  %v208_v29 = vld [vmem:[%s1620_s25 + $0x1c8] sm:$0xff] }
  0x19   : > { %169 = vst [vmem:[%s1625_s26 + $0x48] sm:$0xff] %v168_v9  ;;  %v210_v30 = vld [vmem:[%s1620_s25 + $0x1d0] sm:$0xff]  ;;  %v212_v31 = vld [vmem:[%s1620_s25 + $0x1d8] sm:$0xff]  ;;  %v214_v32 = vld [vmem:[%s1620_s25 + $0x200] sm:$0xff] }
  0x1a   : > { %171 = vst [vmem:[%s1625_s26 + $0x50] sm:$0xff] %v170_v10  ;;  %v216_v33 = vld [vmem:[%s1620_s25 + $0x208] sm:$0xff]  ;;  %v218_v34 = vld [vmem:[%s1620_s25 + $0x210] sm:$0xff]  ;;  %v220_v35 = vld [vmem:[%s1620_s25 + $0x218] sm:$0xff] }
  0x1b   : > { %173 = vst [vmem:[%s1625_s26 + $0x58] sm:$0xff] %v172_v11  ;;  %v222_v36 = vld [vmem:[%s1620_s25 + $0x240] sm:$0xff]  ;;  %v224_v37 = vld [vmem:[%s1620_s25 + $0x248] sm:$0xff]  ;;  %v226_v38 = vld [vmem:[%s1620_s25 + $0x250] sm:$0xff] }
  0x1c   : > { %175 = vst [vmem:[%s1625_s26 + $0x60] sm:$0xff] %v174_v12  ;;  %v228_v39 = vld [vmem:[%s1620_s25 + $0x258] sm:$0xff]  ;;  %v230_v40 = vld [vmem:[%s1620_s25 + $0x280] sm:$0xff]  ;;  %v232_v41 = vld [vmem:[%s1620_s25 + $0x288] sm:$0xff] }
  0x1d   : > { %177 = vst [vmem:[%s1625_s26 + $0x68] sm:$0xff] %v176_v13  ;;  %v234_v42 = vld [vmem:[%s1620_s25 + $0x290] sm:$0xff]  ;;  %v236_v43 = vld [vmem:[%s1620_s25 + $0x298] sm:$0xff]  ;;  %v238_v44 = vld [vmem:[%s1620_s25 + $0x2c0] sm:$0xff] }
  0x1e   : > { %179 = vst [vmem:[%s1625_s26 + $0x70] sm:$0xff] %v178_v14  ;;  %v240_v45 = vld [vmem:[%s1620_s25 + $0x2c8] sm:$0xff]  ;;  %v242_v46 = vld [vmem:[%s1620_s25 + $0x2d0] sm:$0xff]  ;;  %v244_v47 = vld [vmem:[%s1620_s25 + $0x2d8] sm:$0xff] }
  0x1f   : > { %181 = vst [vmem:[%s1625_s26 + $0x78] sm:$0xff] %v180_v15  ;;  %v246_v48 = vld [vmem:[%s1620_s25 + $0x300] sm:$0xff]  ;;  %v248_v49 = vld [vmem:[%s1620_s25 + $0x308] sm:$0xff]  ;;  %v250_v50 = vld [vmem:[%s1620_s25 + $0x310] sm:$0xff] }
  0x20   : > { %183 = vst [vmem:[%s1625_s26 + $0x80] sm:$0xff] %v182_v16  ;;  %v252_v51 = vld [vmem:[%s1620_s25 + $0x318] sm:$0xff]  ;;  %v254_v52 = vld [vmem:[%s1620_s25 + $0x340] sm:$0xff]  ;;  %v256_v53 = vld [vmem:[%s1620_s25 + $0x348] sm:$0xff] }
  0x21   : > { %185 = vst [vmem:[%s1625_s26 + $0x88] sm:$0xff] %v184_v17  ;;  %v258_v54 = vld [vmem:[%s1620_s25 + $0x350] sm:$0xff]  ;;  %v260_v55 = vld [vmem:[%s1620_s25 + $0x358] sm:$0xff]  ;;  %v262_v56 = vld [vmem:[%s1620_s25 + $0x380] sm:$0xff] }
  0x22   : > { %187 = vst [vmem:[%s1625_s26 + $0x90] sm:$0xff] %v186_v18  ;;  %v264_v57 = vld [vmem:[%s1620_s25 + $0x388] sm:$0xff]  ;;  %v266_v58 = vld [vmem:[%s1620_s25 + $0x390] sm:$0xff]  ;;  %v268_v59 = vld [vmem:[%s1620_s25 + $0x398] sm:$0xff] }
  0x23   : > { %189 = vst [vmem:[%s1625_s26 + $0x98] sm:$0xff] %v188_v19  ;;  %v270_v60 = vld [vmem:[%s1620_s25 + $0x3c0] sm:$0xff]  ;;  %v272_v61 = vld [vmem:[%s1620_s25 + $0x3c8] sm:$0xff]  ;;  %v274_v62 = vld [vmem:[%s1620_s25 + $0x3d0] sm:$0xff] }
  0x24   : > { %191 = vst [vmem:[%s1625_s26 + $0xa0] sm:$0xff] %v190_v20  ;;  %v276_v63 = vld [vmem:[%s1620_s25 + $0x3d8] sm:$0xff]  ;;  %v278_v0 = vld [vmem:[%s1620_s25 + $0x400] sm:$0xff]  ;;  %v280_v1 = vld [vmem:[%s1620_s25 + $0x408] sm:$0xff] }
  0x25   : > { %193 = vst [vmem:[%s1625_s26 + $0xa8] sm:$0xff] %v192_v21  ;;  %v282_v2 = vld [vmem:[%s1620_s25 + $0x410] sm:$0xff]  ;;  %v284_v3 = vld [vmem:[%s1620_s25 + $0x418] sm:$0xff]  ;;  %v286_v4 = vld [vmem:[%s1620_s25 + $0x440] sm:$0xff] }
  0x26   : > { %195 = vst [vmem:[%s1625_s26 + $0xb0] sm:$0xff] %v194_v22  ;;  %v288_v5 = vld [vmem:[%s1620_s25 + $0x448] sm:$0xff]  ;;  %v290_v6 = vld [vmem:[%s1620_s25 + $0x450] sm:$0xff]  ;;  %v292_v7 = vld [vmem:[%s1620_s25 + $0x458] sm:$0xff] }
  0x27   : > { %197 = vst [vmem:[%s1625_s26 + $0xb8] sm:$0xff] %v196_v23  ;;  %v294_v8 = vld [vmem:[%s1620_s25 + $0x480] sm:$0xff]  ;;  %v296_v9 = vld [vmem:[%s1620_s25 + $0x488] sm:$0xff]  ;;  %v298_v10 = vld [vmem:[%s1620_s25 + $0x490] sm:$0xff] }
  0x28   : > { %199 = vst [vmem:[%s1625_s26 + $0xc0] sm:$0xff] %v198_v24  ;;  %v300_v11 = vld [vmem:[%s1620_s25 + $0x498] sm:$0xff] }
  0x29   : > { %201 = vst [vmem:[%s1625_s26 + $0xc8] sm:$0xff] %v200_v25 }
  0x2a   : > { %203 = vst [vmem:[%s1625_s26 + $0xd0] sm:$0xff] %v202_v26 }
  0x2b   : > { %205 = vst [vmem:[%s1625_s26 + $0xd8] sm:$0xff] %v204_v27 }
  0x2c   : > { %207 = vst [vmem:[%s1625_s26 + $0xe0] sm:$0xff] %v206_v28 }
  0x2d   : > { %209 = vst [vmem:[%s1625_s26 + $0xe8] sm:$0xff] %v208_v29 }
  0x2e   : > { %211 = vst [vmem:[%s1625_s26 + $0xf0] sm:$0xff] %v210_v30 }
  0x2f   : > { %213 = vst [vmem:[%s1625_s26 + $0xf8] sm:$0xff] %v212_v31 }
  0x30   : > { %215 = vst [vmem:[%s1625_s26 + $0x100] sm:$0xff] %v214_v32 }
  0x31   : > { %217 = vst [vmem:[%s1625_s26 + $0x108] sm:$0xff] %v216_v33 }
  0x32   : > { %219 = vst [vmem:[%s1625_s26 + $0x110] sm:$0xff] %v218_v34 }
  0x33   : > { %221 = vst [vmem:[%s1625_s26 + $0x118] sm:$0xff] %v220_v35 }
  0x34   : > { %223 = vst [vmem:[%s1625_s26 + $0x120] sm:$0xff] %v222_v36 }
  0x35   : > { %225 = vst [vmem:[%s1625_s26 + $0x128] sm:$0xff] %v224_v37 }
  0x36   : > { %227 = vst [vmem:[%s1625_s26 + $0x130] sm:$0xff] %v226_v38 }
  0x37   : > { %229 = vst [vmem:[%s1625_s26 + $0x138] sm:$0xff] %v228_v39 }
  0x38   : > { %231 = vst [vmem:[%s1625_s26 + $0x140] sm:$0xff] %v230_v40 }
  0x39   : > { %233 = vst [vmem:[%s1625_s26 + $0x148] sm:$0xff] %v232_v41 }
  0x3a   : > { %235 = vst [vmem:[%s1625_s26 + $0x150] sm:$0xff] %v234_v42 }
  0x3b   : > { %237 = vst [vmem:[%s1625_s26 + $0x158] sm:$0xff] %v236_v43 }
  0x3c   : > { %239 = vst [vmem:[%s1625_s26 + $0x160] sm:$0xff] %v238_v44 }
  0x3d   : > { %241 = vst [vmem:[%s1625_s26 + $0x168] sm:$0xff] %v240_v45 }
  0x3e   : > { %243 = vst [vmem:[%s1625_s26 + $0x170] sm:$0xff] %v242_v46 }
  0x3f   : > { %245 = vst [vmem:[%s1625_s26 + $0x178] sm:$0xff] %v244_v47 }
  0x40   : > { %247 = vst [vmem:[%s1625_s26 + $0x180] sm:$0xff] %v246_v48 }
  0x41   : > { %249 = vst [vmem:[%s1625_s26 + $0x188] sm:$0xff] %v248_v49 }
  0x42   : > { %251 = vst [vmem:[%s1625_s26 + $0x190] sm:$0xff] %v250_v50 }
  0x43   : > { %253 = vst [vmem:[%s1625_s26 + $0x198] sm:$0xff] %v252_v51 }
  0x44   : > { %255 = vst [vmem:[%s1625_s26 + $0x1a0] sm:$0xff] %v254_v52 }
  0x45   : > { %257 = vst [vmem:[%s1625_s26 + $0x1a8] sm:$0xff] %v256_v53 }
  0x46   : > { %259 = vst [vmem:[%s1625_s26 + $0x1b0] sm:$0xff] %v258_v54 }
  0x47   : > { %261 = vst [vmem:[%s1625_s26 + $0x1b8] sm:$0xff] %v260_v55 }
  0x48   : > { %263 = vst [vmem:[%s1625_s26 + $0x1c0] sm:$0xff] %v262_v56 }
  0x49   : > { %265 = vst [vmem:[%s1625_s26 + $0x1c8] sm:$0xff] %v264_v57 }
  0x4a   : > { %267 = vst [vmem:[%s1625_s26 + $0x1d0] sm:$0xff] %v266_v58 }
  0x4b   : > { %269 = vst [vmem:[%s1625_s26 + $0x1d8] sm:$0xff] %v268_v59 }
  0x4c   : > { %271 = vst [vmem:[%s1625_s26 + $0x1e0] sm:$0xff] %v270_v60 }
  0x4d   : > { %273 = vst [vmem:[%s1625_s26 + $0x1e8] sm:$0xff] %v272_v61 }
  0x4e   : > { %275 = vst [vmem:[%s1625_s26 + $0x1f0] sm:$0xff] %v274_v62 }
  0x4f   : > { %277 = vst [vmem:[%s1625_s26 + $0x1f8] sm:$0xff] %v276_v63 }
  0x50   : > { %279 = vst [vmem:[%s1625_s26 + $0x200] sm:$0xff] %v278_v0 }
  0x51   : > { %281 = vst [vmem:[%s1625_s26 + $0x208] sm:$0xff] %v280_v1 }
  0x52   : > { %283 = vst [vmem:[%s1625_s26 + $0x210] sm:$0xff] %v282_v2 }
  0x53   : > { %285 = vst [vmem:[%s1625_s26 + $0x218] sm:$0xff] %v284_v3 }
  0x54   : > { %287 = vst [vmem:[%s1625_s26 + $0x220] sm:$0xff] %v286_v4 }
  0x55   : > { %289 = vst [vmem:[%s1625_s26 + $0x228] sm:$0xff] %v288_v5 }
  0x56   : > { %291 = vst [vmem:[%s1625_s26 + $0x230] sm:$0xff] %v290_v6 }
  0x57   : > { %293 = vst [vmem:[%s1625_s26 + $0x238] sm:$0xff] %v292_v7 }
  0x58   : > { %295 = vst [vmem:[%s1625_s26 + $0x240] sm:$0xff] %v294_v8 }
  0x59   : > { %297 = vst [vmem:[%s1625_s26 + $0x248] sm:$0xff] %v296_v9 }
  0x5a   : > { %299 = vst [vmem:[%s1625_s26 + $0x250] sm:$0xff] %v298_v10 }
  0x5b   : > { %301 = vst [vmem:[%s1625_s26 + $0x258] sm:$0xff] %v300_v11 }
  0x5c PF: > { %p1137_p5 = scmp.ge.s32.totalorder %s1562_s14, 1  ;;  %p306_p6 = scmp.lt.s32.totalorder %s1562_s14, 3 }
  0x5e   : > { %p307_p7 = pnand %p1137_p5, %p306_p6 }
  0x5f   : > { %s313_s27 = sand.u32 (!%p307_p7), 1, %s1554_s12   ;;  %s1138_s7 = sshll.u32 (!%p307_p7), %s1131_s15, 3 }
  0x60   : > { %310 = sbr.rel (%p307_p7) target bundleno = 337 (0x151), region = 51  ;;  %p338_p8 = scmp.lt.s32.totalorder (!%p307_p7), %s1138_s7, 15 }
  0x61   : > { %s1512_s28 = smul.u32 (!%p307_p7), 608, %s313_s27 }
  0x63   : > { %s1779_s29 = scalar_lea.vmem (!%p307_p7), [#allocation2], %s1512_s28 }
  0x65   : > { %vm817_vm0 = vcmask 1040384   ;;  %vm818_vm1 = vcmask 1041408   ;;  %v1564_v12 = vmov 65535   ;;  %v1366_v14 = vld [vmem:[%s1779_s29 + $0x1c0] sm:$0xf]  ;;  %vm813_vm2 = vcmask 154624  }
  0x66   : > { %v819_v13 = vsel %vm817_vm0, 4294967295, %v1564_v12  ;;  %v1499_v15 = vld [vmem:[%s1779_s29 + $0x1dc] sm:$0xf0]  ;;  %v1374_v19 = vld [vmem:[%s1779_s29 + $0x1c8] sm:$0xf]  ;;  %s2014_s7 = smov (!%p338_p8, %s1138_s7), 15 }
  0x67   : > { %v417_v16 = vld [vmem:[%s1779_s29 + $0x240] sm:$0x33]  ;;  %v1367_v17 = vor.u32 %v1499_v15, %v1366_v14  ;;  %v1500_v20 = vld [vmem:[%s1779_s29 + $0x1e4] sm:$0xf0]  ;;  %v1787_v23 = vsel %vm818_vm1, %v819_v13, 0  ;;  %s1139_s8 = sshll.u32 %s2014_s7, 3 }
  0x68   : > { %v653_v18 = vunpack.c.l.b16 %v417_v16  ;;  %v1334_v21 = vld [vmem:[%s1779_s29 + $0x180] sm:$0xf]  ;;  %v654_v22 = vunpack.c.h.b16 %v417_v16  ;;  %v1375_v24 = vor.u32 %v1500_v20, %v1374_v19  ;;  %v1342_v32 = vld [vmem:[%s1779_s29 + $0x188] sm:$0xf]  ;;  %v1495_v35 = vld [vmem:[%s1779_s29 + $0x1c4] sm:$0xf]  ;;  %s1986_s11 = scalar_lea.vmem %s2009_s3, %s1139_s8 }
  0x69   : > { %v1491_v25 = vld [vmem:[%s1779_s29 + $0x19c] sm:$0xf0]  ;;  %845 = vmatpush.bf16.msra.mxu0 %v1367_v17  ;;  %v1492_v33 = vld [vmem:[%s1779_s29 + $0x1a4] sm:$0xf0]  ;;  %v1368_v40 = vld [vmem:[%s1779_s29 + $0x1e0] sm:$0xf0] }
  0x6a   : > { %v1398_v26 = vld [vmem:[%s1779_s29 + $0x200] sm:$0xf]  ;;  %v733_v28 = vpack.c.b16 %v653_v18, %v653_v18  ;;  %v1335_v29 = vor.u32 %v1491_v25, %v1334_v21  ;;  %v734_v30 = vpack.c.b16 %v654_v22, %v654_v22  ;;  %897 = vmatpush.bf16.msra.mxu1 %v1375_v24  ;;  %v1343_v34 = vor.u32 %v1492_v33, %v1342_v32  ;;  %v1503_v41 = vld [vmem:[%s1779_s29 + $0x204] sm:$0xf]  ;;  %v1310_v43 = vld [vmem:[%s1779_s29 + $0x148] sm:$0xf] }
  0x6b   : > { %v1794_v27 = vld [vmem:[%s2006_s0] sm:$0xff]  ;;  %v1484_v44 = vld [vmem:[%s1779_s29 + $0x164] sm:$0xf0]  ;;  %v1371_v50 = vor.u32 %v1495_v35, %v1368_v40  ;;  %v1496_v1 = vld [vmem:[%s1779_s29 + $0x1cc] sm:$0xf] }
  0x6c   : > { %v1507_v31 = vld [vmem:[%s1779_s29 + $0x21c] sm:$0xf0]  ;;  %v822_v38 = vand.u32 %v1787_v23, %v733_v28  ;;  %v825_v39 = vand.u32 %v1787_v23, %v734_v30  ;;  %v1400_v42 = vld [vmem:[%s1779_s29 + $0x220] sm:$0xf0]  ;;  %v1810_v45 = vld [vmem:[%s1779_s29 + $0x248] sm:$0x33]  ;;  %v429_v49 = vunpack.c.h.b16 %v1794_v27  ;;  %v1311_v54 = vor.u32 %v1484_v44, %v1310_v43 }
  0x6d   : > { %v1302_v36 = vld [vmem:[%s1779_s29 + $0x140] sm:$0xf]  ;;  %846 = vmatpush.bf16.msra.mxu0 %v1335_v29  ;;  %v1399_v46 = vor.u32 %v1507_v31, %v1398_v26  ;;  %v655_v48 = vunpack.c.l.b16 %v1810_v45  ;;  %v1403_v51 = vor.u32 %v1503_v41, %v1400_v42  ;;  %v1487_v56 = vld [vmem:[%s1779_s29 + $0x184] sm:$0xf]  ;;  %v1278_v58 = vld [vmem:[%s1779_s29 + $0x108] sm:$0xf]  ;;  %v656_v33 = vunpack.c.h.b16 %v1810_v45 }
  0x6e   : > { %v1483_v37 = vld [vmem:[%s1779_s29 + $0x15c] sm:$0xf0]  ;;  %864 = vmatpush.bf16.msra.mxu2 %v822_v38  ;;  %890 = vmatpush.bf16.msra.mxu3 %v825_v39  ;;  %v1336_v57 = vld [vmem:[%s1779_s29 + $0x1a0] sm:$0xf0]  ;;  %v1476_v59 = vld [vmem:[%s1779_s29 + $0x124] sm:$0xf0]  ;;  %v1823_v0 = vpack.c.b16 %v429_v49, %v429_v49 }
  0x6f   : > { %v1303_v47 = vor.u32 %v1483_v37, %v1302_v36  ;;  %898 = vmatpush.bf16.msra.mxu1 %v1343_v34  ;;  %v1270_v52 = vld [vmem:[%s1779_s29 + $0x100] sm:$0xf]  ;;  %v735_v55 = vpack.c.b16 %v655_v48, %v655_v48  ;;  %v1406_v60 = vld [vmem:[%s1779_s29 + $0x208] sm:$0xf]  ;;  %v1376_v2 = vld [vmem:[%s1779_s29 + $0x1e8] sm:$0xf0]  ;;  %v1339_v3 = vor.u32 %v1487_v56, %v1336_v57  ;;  %v1279_v6 = vor.u32 %v1476_v59, %v1278_v58 }
  0x70   : > { %v1475_v53 = vld [vmem:[%s1779_s29 + $0x11c] sm:$0xf0]  ;;  %v1508_v61 = vld [vmem:[%s1779_s29 + $0x224] sm:$0xf0]  ;;  %v1479_v8 = vld [vmem:[%s1779_s29 + $0x144] sm:$0xf]  ;;  %v1379_v10 = vor.u32 %v1496_v1, %v1376_v2 }
  0x71   : > { %847 = vmatpush.bf16.msra.mxu0 %v1303_v47  ;;  %v828_v62 = vand.u32 %v1787_v23, %v735_v55  ;;  %v1271_v63 = vor.u32 %v1475_v53, %v1270_v52  ;;  %v1238_v4 = vld [vmem:[%s1779_s29 + $0xc0] sm:$0xf]  ;;  %v1407_v7 = vor.u32 %v1508_v61, %v1406_v60  ;;  %v1304_v9 = vld [vmem:[%s1779_s29 + $0x160] sm:$0xf0]  ;;  %v1246_v11 = vld [vmem:[%s1779_s29 + $0xc8] sm:$0xf]  ;;  %v428_v53 = vunpack.c.l.b16 %v1794_v27 }
  0x72   : > { %865 = vmatpush.bf16.msra.mxu2 %v1399_v46  ;;  %891 = vmatpush.bf16.msra.mxu3 %v1403_v51  ;;  %v1467_v5 = vld [vmem:[%s1779_s29 + $0xdc] sm:$0xf0]  ;;  %v1468_v12 = vld [vmem:[%s1779_s29 + $0xe4] sm:$0xf0]  ;;  %v1488_v14 = vld [vmem:[%s1779_s29 + $0x18c] sm:$0xf]  ;;  %v1307_v16 = vor.u32 %v1479_v8, %v1304_v9  ;;  %v736_v46 = vpack.c.b16 %v656_v33, %v656_v33 }
  0x73   : > { %899 = vmatpush.bf16.msra.mxu1 %v1311_v54  ;;  %v1239_v13 = vor.u32 %v1467_v5, %v1238_v4  ;;  %v1344_v15 = vld [vmem:[%s1779_s29 + $0x1a8] sm:$0xf0]  ;;  %v1206_v17 = vld [vmem:[%s1779_s29 + $0x80] sm:$0xf]  ;;  %v1247_v19 = vor.u32 %v1468_v12, %v1246_v11  ;;  %v1471_v20 = vld [vmem:[%s1779_s29 + $0x104] sm:$0xf] }
  0x74   : > { %v1459_v18 = vld [vmem:[%s1779_s29 + $0x9c] sm:$0xf0]  ;;  %v1272_v21 = vld [vmem:[%s1779_s29 + $0x120] sm:$0xf0]  ;;  %v1347_v22 = vor.u32 %v1488_v14, %v1344_v15  ;;  %v1214_v24 = vld [vmem:[%s1779_s29 + $0x88] sm:$0xf]  ;;  %v831_v60 = vand.u32 %v1787_v23, %v736_v46 }
  0x75   : > { %1428 = vmatmul.msk.bf16.vlgmr.msra.gmra.mxu2 %vm813_vm2, %v1823_v0  ;;  %848 = vmatpush.bf16.msra.mxu0 %v1271_v63  ;;  %v1460_v25 = vld [vmem:[%s1779_s29 + $0xa4] sm:$0xf0]  ;;  %v1207_v26 = vor.u32 %v1459_v18, %v1206_v17  ;;  %v1480_v28 = vld [vmem:[%s1779_s29 + $0x14c] sm:$0xf]  ;;  %v1275_v30 = vor.u32 %v1471_v20, %v1272_v21  ;;  %v1174_v31 = vld [vmem:[%s1779_s29 + $0x40] sm:$0xf] }
  0x76   : > { %871 = vmatpush.bf16.msrb.mxu2 %v1371_v50  ;;  %916 = vmatpush.bf16.msrb.mxu3 %v828_v62  ;;  %v1312_v29 = vld [vmem:[%s1779_s29 + $0x168] sm:$0xf0]  ;;  %v1451_v32 = vld [vmem:[%s1779_s29 + $0x5c] sm:$0xf0]  ;;  %v1215_v34 = vor.u32 %v1460_v25, %v1214_v24  ;;  %v1463_v35 = vld [vmem:[%s1779_s29 + $0xc4] sm:$0xf] }
  0x77   : > { %1429 = vmatmul.msk.bf16.vlgmr.msra.gmra.mxu3 %vm813_vm2, %v1823_v0  ;;  %900 = vmatpush.bf16.msra.mxu1 %v1279_v6  ;;  %v1240_v36 = vld [vmem:[%s1779_s29 + $0xe0] sm:$0xf0]  ;;  %v1315_v37 = vor.u32 %v1480_v28, %v1312_v29  ;;  %v1182_v38 = vld [vmem:[%s1779_s29 + $0x48] sm:$0xf]  ;;  %v1175_v40 = vor.u32 %v1451_v32, %v1174_v31  ;;  %v1472_v41 = vld [vmem:[%s1779_s29 + $0x10c] sm:$0xf] }
  0x78   : > { %v1452_v39 = vld [vmem:[%s1779_s29 + $0x64] sm:$0xf0]  ;;  %v1280_v42 = vld [vmem:[%s1779_s29 + $0x128] sm:$0xf0]  ;;  %v1243_v43 = vor.u32 %v1463_v35, %v1240_v36  ;;  %v1142_v44 = vld [vmem:[%s1779_s29] sm:$0xf] }
  0x79   : > { %849 = vmatpush.bf16.msra.mxu0 %v1239_v13  ;;  %v1443_v45 = vld [vmem:[%s1779_s29 + $0x1c] sm:$0xf0]  ;;  %v1183_v47 = vor.u32 %v1452_v39, %v1182_v38  ;;  %v1455_v48 = vld [vmem:[%s1779_s29 + $0x84] sm:$0xf]  ;;  %v1283_v50 = vor.u32 %v1472_v41, %v1280_v42  ;;  %v1150_v51 = vld [vmem:[%s1779_s29 + $0x8] sm:$0xf] }
  0x7a   : > { %872 = vmatpush.bf16.msrb.mxu2 %v1339_v3  ;;  %917 = vmatpush.bf16.msrb.mxu3 %v1407_v7  ;;  %v1208_v49 = vld [vmem:[%s1779_s29 + $0xa0] sm:$0xf0]  ;;  %v1444_v52 = vld [vmem:[%s1779_s29 + $0x24] sm:$0xf0]  ;;  %v419_v54 = vld [vmem:[%s1779_s29 + $0x250] sm:$0x33]  ;;  %v1143_v55 = vor.u32 %v1443_v45, %v1142_v44  ;;  %v1869_v3 = vpack.c.b16 %v428_v53, %v428_v53 }
  0x7b   : > { %901 = vmatpush.bf16.msra.mxu1 %v1247_v19  ;;  %v1464_v56 = vld [vmem:[%s1779_s29 + $0xcc] sm:$0xf]  ;;  %v657_v58 = vunpack.c.l.b16 %v419_v54  ;;  %v1211_v59 = vor.u32 %v1455_v48, %v1208_v49  ;;  %v658_v61 = vunpack.c.h.b16 %v419_v54  ;;  %v1151_v62 = vor.u32 %v1444_v52, %v1150_v51  ;;  %v1447_v27 = vld [vmem:[%s1779_s29 + $0x44] sm:$0xf]  ;;  %v1497_v6 = vld [vmem:[%s1779_s29 + $0x1d4] sm:$0xf] }
  0x7c   : > { %v1248_v57 = vld [vmem:[%s1779_s29 + $0xe8] sm:$0xf0]  ;;  %v1176_v63 = vld [vmem:[%s1779_s29 + $0x60] sm:$0xf0]  ;;  %v1384_v7 = vld [vmem:[%s1779_s29 + $0x1f0] sm:$0xf0] }
  0x7d   : > { %850 = vmatpush.bf16.msra.mxu0 %v1207_v26  ;;  %v737_v1 = vpack.c.b16 %v657_v58, %v657_v58  ;;  %v1251_v2 = vor.u32 %v1464_v56, %v1248_v57  ;;  %v1504_v4 = vld [vmem:[%s1779_s29 + $0x20c] sm:$0xf]  ;;  %v1179_v11 = vor.u32 %v1447_v27, %v1176_v63  ;;  %v738_v12 = vpack.c.b16 %v658_v61, %v658_v61  ;;  %v1414_v13 = vld [vmem:[%s1779_s29 + $0x210] sm:$0xf]  ;;  %v421_v15 = vld [vmem:[%s2008_s2] sm:$0xff] }
  0x7e   : > { %923 = vmatpush.bf16.msra.mxu3 %v1379_v10  ;;  %873 = vmatpush.bf16.msrb.mxu2 %v1307_v16  ;;  %v1408_v5 = vld [vmem:[%s1779_s29 + $0x228] sm:$0xf0]  ;;  %v1509_v14 = vld [vmem:[%s1779_s29 + $0x22c] sm:$0xf0]  ;;  %v1439_v17 = vld [vmem:[%s1779_s29 + $0x4] sm:$0xf]  ;;  %v1387_v20 = vor.u32 %v1497_v6, %v1384_v7 }
  0x7f   : > { %902 = vmatpush.bf16.msra.mxu1 %v1215_v34  ;;  %v1456_v8 = vld [vmem:[%s1779_s29 + $0x8c] sm:$0xf]  ;;  %v834_v10 = vand.u32 %v1787_v23, %v737_v1  ;;  %v1411_v16 = vor.u32 %v1504_v4, %v1408_v5  ;;  %v1144_v18 = vld [vmem:[%s1779_s29 + $0x20] sm:$0xf0]  ;;  %v1565_v19 = vmov 0   ;;  %v837_v32 = vand.u32 %v1787_v23, %v738_v12 }
  0x80   : > { %v1216_v9 = vld [vmem:[%s1779_s29 + $0xa8] sm:$0xf0]  ;;  %1539 = vset.pattern.permute.xlu0 %v1565_v19  ;;  %v1501_v24 = vld [vmem:[%s1779_s29 + $0x1ec] sm:$0xf0]  ;;  %v1489_v25 = vld [vmem:[%s1779_s29 + $0x194] sm:$0xf]  ;;  %v1147_v31 = vor.u32 %v1439_v17, %v1144_v18 }
  0x81   : > { %851 = vmatpush.bf16.msra.mxu0 %v1175_v40  ;;  %v1219_v21 = vor.u32 %v1456_v8, %v1216_v9  ;;  %v1352_v26 = vld [vmem:[%s1779_s29 + $0x1b0] sm:$0xf0]  ;;  %v1448_v28 = vld [vmem:[%s1779_s29 + $0x4c] sm:$0xf]  ;;  %424 = vperm.xlu0 %1539, %v421_v15   ;;  %v1350_v38 = vld [vmem:[%s1779_s29 + $0x190] sm:$0xf] }
  0x82   : > { %924 = vmatpush.bf16.msra.mxu3 %v1347_v22  ;;  %874 = vmatpush.bf16.msrb.mxu2 %v1275_v30  ;;  %v1382_v22 = vld [vmem:[%s1779_s29 + $0x1d0] sm:$0xf]  ;;  %v1184_v29 = vld [vmem:[%s1779_s29 + $0x68] sm:$0xf0]  ;;  %v1415_v30 = vor.u32 %v1509_v14, %v1414_v13  ;;  %v1505_v34 = vld [vmem:[%s1779_s29 + $0x214] sm:$0xf]  ;;  %v1355_v36 = vor.u32 %v1489_v25, %v1352_v26 }
  0x83   : > { %903 = vmatpush.bf16.msra.mxu1 %v1183_v47  ;;  %v1383_v33 = vor.u32 %v1501_v24, %v1382_v22  ;;  %v1416_v35 = vld [vmem:[%s1779_s29 + $0x230] sm:$0xf0]  ;;  %v1493_v39 = vld [vmem:[%s1779_s29 + $0x1ac] sm:$0xf0]  ;;  %v1440_v42 = vld [vmem:[%s1779_s29 + $0xc] sm:$0xf] }
  0x84   : > { %v1481_v40 = vld [vmem:[%s1779_s29 + $0x154] sm:$0xf]  ;;  %v1390_v44 = vld [vmem:[%s1779_s29 + $0x1d8] sm:$0xf]  ;;  %v1419_v46 = vor.u32 %v1505_v34, %v1416_v35  ;;  %v1351_v47 = vor.u32 %v1493_v39, %v1350_v38  ;;  %v1485_v51 = vld [vmem:[%s1779_s29 + $0x16c] sm:$0xf0] }
  0x85   : > { %852 = vmatpush.bf16.msra.mxu0 %v1143_v55  ;;  %v1320_v41 = vld [vmem:[%s1779_s29 + $0x170] sm:$0xf0]  ;;  %v1502_v45 = vld [vmem:[%s1779_s29 + $0x1f4] sm:$0xf0]  ;;  %v1286_v58 = vld [vmem:[%s1779_s29 + $0x110] sm:$0xf] }
  0x86   : > { %925 = vmatpush.bf16.msra.mxu3 %v1315_v37  ;;  %875 = vmatpush.bf16.msrb.mxu2 %v1243_v43  ;;  %v1187_v37 = vor.u32 %v1448_v28, %v1184_v29  ;;  %v1152_v43 = vld [vmem:[%s1779_s29 + $0x28] sm:$0xf0]  ;;  %v1323_v48 = vor.u32 %v1481_v40, %v1320_v41  ;;  %v1391_v52 = vor.u32 %v1502_v45, %v1390_v44  ;;  %v1473_v53 = vld [vmem:[%s1779_s29 + $0x114] sm:$0xf]  ;;  %v1358_v55 = vld [vmem:[%s1779_s29 + $0x198] sm:$0xf] }
  0x87   : > { %1430 = vmatmul.msk.bf16.vlgmr.msrb.gmra.mxu3 %vm813_vm2, %v1823_v0  ;;  %904 = vmatpush.bf16.msra.mxu1 %v1151_v62  ;;  %v1155_v49 = vor.u32 %v1440_v42, %v1152_v43  ;;  %v1288_v54 = vld [vmem:[%s1779_s29 + $0x130] sm:$0xf0]  ;;  %v1494_v56 = vld [vmem:[%s1779_s29 + $0x1b4] sm:$0xf0]  ;;  %v1498_v61 = vld [vmem:[%s1779_s29 + $0x1dc] sm:$0xf] }
  0x88   : > { %853 = vmatmul.bf16.vlgmr.msra.gmra.mxu0 %v1869_v3  ;;  %v1392_v62 = vld [vmem:[%s1779_s29 + $0x1f8] sm:$0xf0]  ;;  %v1359_v27 = vor.u32 %v1494_v56, %v1358_v55  ;;  %v1465_v63 = vld [vmem:[%s1779_s29 + $0xd4] sm:$0xf]  ;;  %v1486_v4 = vld [vmem:[%s1779_s29 + $0x174] sm:$0xf0] }
  0x89   : > { %942 = vmatpush.bf16.msrb.mxu0 %v831_v60  ;;  %v1477_v60 = vld [vmem:[%s1779_s29 + $0x12c] sm:$0xf0]  ;;  %v1256_v1 = vld [vmem:[%s1779_s29 + $0xf0] sm:$0xf0]  ;;  %v1395_v6 = vor.u32 %v1498_v61, %v1392_v62  ;;  %v1294_v15 = vld [vmem:[%s1779_s29 + $0x118] sm:$0xf] }
  0x8a   : > { %926 = vmatpush.bf16.msra.mxu3 %v1283_v50  ;;  %876 = vmatpush.bf16.msrb.mxu2 %v1211_v59  ;;  %v1318_v50 = vld [vmem:[%s1779_s29 + $0x150] sm:$0xf]  ;;  %v1291_v59 = vor.u32 %v1473_v53, %v1288_v54  ;;  %v1287_v5 = vor.u32 %v1477_v60, %v1286_v58  ;;  %v1259_v8 = vor.u32 %v1465_v63, %v1256_v1  ;;  %v1457_v13 = vld [vmem:[%s1779_s29 + $0x94] sm:$0xf]  ;;  %v420_v17 = vld [vmem:[%s1779_s29 + $0x258] sm:$0x33] }
  0x8b   : > { %968 = vmatpush.bf16.msrb.mxu1 %v834_v10  ;;  %v1319_v57 = vor.u32 %v1485_v51, %v1318_v50  ;;  %v1254_v7 = vld [vmem:[%s1779_s29 + $0xd0] sm:$0xf]  ;;  %v1490_v10 = vld [vmem:[%s1779_s29 + $0x19c] sm:$0xf]  ;;  %v1224_v14 = vld [vmem:[%s1779_s29 + $0xb0] sm:$0xf0]  ;;  %v659_v40 = vunpack.c.l.b16 %v420_v17 }
  0x8c   : > { %905 = vmatmul.bf16.vlgmr.msra.gmra.mxu1 %v1869_v3  ;;  %v1469_v9 = vld [vmem:[%s1779_s29 + $0xec] sm:$0xf0]  ;;  %v1482_v24 = vld [vmem:[%s1779_s29 + $0x15c] sm:$0xf]  ;;  %v1449_v28 = vld [vmem:[%s1779_s29 + $0x54] sm:$0xf] }
  0x8d   : > { %943 = vmatpush.bf16.msrb.mxu0 %v1411_v16  ;;  %v1478_v16 = vld [vmem:[%s1779_s29 + $0x134] sm:$0xf0]  ;;  %v1255_v18 = vor.u32 %v1469_v9, %v1254_v7  ;;  %v1461_v22 = vld [vmem:[%s1779_s29 + $0xac] sm:$0xf0]  ;;  %v1328_v25 = vld [vmem:[%s1779_s29 + $0x178] sm:$0xf0] }
  0x8e   : > { %927 = vmatpush.bf16.msra.mxu3 %v1251_v2  ;;  %877 = vmatpush.bf16.msrb.mxu2 %v1179_v11  ;;  %v1326_v2 = vld [vmem:[%s1779_s29 + $0x158] sm:$0xf]  ;;  %v1360_v11 = vld [vmem:[%s1779_s29 + $0x1b8] sm:$0xf0]  ;;  %v1295_v26 = vor.u32 %v1478_v16, %v1294_v15  ;;  %v1192_v29 = vld [vmem:[%s1779_s29 + $0x70] sm:$0xf0]  ;;  %v1331_v34 = vor.u32 %v1482_v24, %v1328_v25 }
  0x8f   : > { %969 = vmatpush.bf16.msrb.mxu1 %v1415_v30  ;;  %v1327_v12 = vor.u32 %v1486_v4, %v1326_v2  ;;  %v1363_v19 = vor.u32 %v1490_v10, %v1360_v11  ;;  %v660_v30 = vunpack.c.h.b16 %v420_v17  ;;  %v1190_v35 = vld [vmem:[%s1779_s29 + $0x50] sm:$0xf]  ;;  %v1474_v38 = vld [vmem:[%s1779_s29 + $0x11c] sm:$0xf]  ;;  %v1441_v42 = vld [vmem:[%s1779_s29 + $0x14] sm:$0xf] }
  0x90   : > { %v1296_v39 = vld [vmem:[%s1779_s29 + $0x138] sm:$0xf0]  ;;  %v1160_v43 = vld [vmem:[%s1779_s29 + $0x30] sm:$0xf0]  ;;  %v1230_v45 = vld [vmem:[%s1779_s29 + $0x98] sm:$0xf] }
  0x91   : > { %975 = vmatpush.bf16.msra.mxu0 %v1387_v20  ;;  %v1222_v20 = vld [vmem:[%s1779_s29 + $0x90] sm:$0xf]  ;;  %v740_v44 = vpack.c.b16 %v660_v30, %v660_v30  ;;  %v1466_v54 = vld [vmem:[%s1779_s29 + $0xdc] sm:$0xf]  ;;  %v1198_v56 = vld [vmem:[%s1779_s29 + $0x58] sm:$0xf] }
  0x92   : > { %928 = vmatpush.bf16.msra.mxu3 %v1219_v21  ;;  %878 = vmatpush.bf16.msrb.mxu2 %v1147_v31  ;;  %v1227_v21 = vor.u32 %v1457_v13, %v1224_v14  ;;  %v1262_v31 = vld [vmem:[%s1779_s29 + $0xd8] sm:$0xf]  ;;  %v1158_v50 = vld [vmem:[%s1779_s29 + $0x10] sm:$0xf]  ;;  %v1264_v55 = vld [vmem:[%s1779_s29 + $0xf8] sm:$0xf0] }
  0x93   : > { %994 = vmatpush.bf16.msra.mxu1 %v837_v32  ;;  %v1470_v32 = vld [vmem:[%s1779_s29 + $0xf4] sm:$0xf0]  ;;  %v1445_v51 = vld [vmem:[%s1779_s29 + $0x2c] sm:$0xf0]  ;;  %v1424_v60 = vld [vmem:[%s1779_s29 + $0x238] sm:$0xf0]  ;;  %v1267_v62 = vor.u32 %v1466_v54, %v1264_v55 }
  0x94   : > { %v1263_v41 = vor.u32 %v1470_v32, %v1262_v31  ;;  %v1454_v58 = vld [vmem:[%s1779_s29 + $0x74] sm:$0xf0]  ;;  %v1159_v61 = vor.u32 %v1445_v51, %v1158_v50  ;;  %v1458_v63 = vld [vmem:[%s1779_s29 + $0x9c] sm:$0xf] }
  0x95   : > { %976 = vmatpush.bf16.msra.mxu0 %v1355_v36  ;;  %879 = vmatmul.bf16.vlgmr.msrb.gmra.mxu2 %v1869_v3  ;;  %v1195_v36 = vor.u32 %v1449_v28, %v1192_v29  ;;  %v1199_v1 = vor.u32 %v1454_v58, %v1198_v56  ;;  %v1232_v2 = vld [vmem:[%s1779_s29 + $0xb8] sm:$0xf0]  ;;  %v1422_v4 = vld [vmem:[%s1779_s29 + $0x218] sm:$0xf] }
  0x96   : > { %949 = vmatpush.bf16.msra.mxu2 %v1383_v33  ;;  %929 = vmatpush.bf16.msra.mxu3 %v1187_v37  ;;  %v1223_v33 = vor.u32 %v1461_v22, %v1222_v20  ;;  %v1453_v37 = vld [vmem:[%s1779_s29 + $0x6c] sm:$0xf0]  ;;  %v1166_v7 = vld [vmem:[%s1779_s29 + $0x18] sm:$0xf]  ;;  %v1450_v11 = vld [vmem:[%s1779_s29 + $0x5c] sm:$0xf] }
  0x97   : > { %995 = vmatpush.bf16.msra.mxu1 %v1419_v46  ;;  %v1462_v46 = vld [vmem:[%s1779_s29 + $0xb4] sm:$0xf0]  ;;  %v1442_v14 = vld [vmem:[%s1779_s29 + $0x1c] sm:$0xf] }
  0x98   : > { %1431 = vmatmul.msk.bf16.vlgmr.msrb.gmra.mxu0 %vm813_vm2, %v1823_v0  ;;  %v1231_v53 = vor.u32 %v1462_v46, %v1230_v45  ;;  %v1168_v15 = vld [vmem:[%s1779_s29 + $0x38] sm:$0xf0] }
  0x99   : > { %977 = vmatpush.bf16.msra.mxu0 %v1323_v48  ;;  %v1299_v48 = vor.u32 %v1474_v38, %v1296_v39  ;;  %v1171_v16 = vor.u32 %v1442_v14, %v1168_v15 }
  0x9a   : > { %950 = vmatpush.bf16.msra.mxu2 %v1351_v47  ;;  %930 = vmatpush.bf16.msra.mxu3 %v1155_v49  ;;  %v1191_v47 = vor.u32 %v1453_v37, %v1190_v35  ;;  %v1163_v49 = vor.u32 %v1441_v42, %v1160_v43 }
  0x9c   : > { %1432 = vmatmul.msk.bf16.vlgmr.msrb.gmra.mxu1 %vm813_vm2, %v1823_v0 }
  0x9d   : > { %931 = vmatmul.bf16.vlgmr.msra.gmra.mxu3 %v1869_v3  ;;  %978 = vmatpush.bf16.msra.mxu0 %v1291_v59  ;;  %v1506_v59 = vld [vmem:[%s1779_s29 + $0x21c] sm:$0xf] }
  0x9e   : > { %1001 = vmatpush.bf16.msrb.mxu3 %v1391_v52  ;;  %951 = vmatpush.bf16.msra.mxu2 %v1319_v57  ;;  %v739_v52 = vpack.c.b16 %v659_v40, %v659_v40  ;;  %v843_v57 = vand.u32 %v1787_v23, %v740_v44 }
  0x9f   : > { %1027 = vmatpush.bf16.msrb.mxu1 %v1395_v6  ;;  %v1427_v6 = vor.u32 %v1506_v59, %v1424_v60 }
  0xa1   : > { %979 = vmatpush.bf16.msra.mxu0 %v1259_v8  ;;  %v1446_v8 = vld [vmem:[%s1779_s29 + $0x34] sm:$0xf0] }
  0xa2   : > { %1002 = vmatpush.bf16.msrb.mxu3 %v1359_v27  ;;  %952 = vmatpush.bf16.msra.mxu2 %v1287_v5  ;;  %v840_v27 = vand.u32 %v1787_v23, %v739_v52  ;;  %v1510_v5 = vld [vmem:[%s1779_s29 + $0x234] sm:$0xf0]  ;;  %v1235_v23 = vor.u32 %v1458_v63, %v1232_v2  ;;  %v1167_v10 = vor.u32 %v1446_v8, %v1166_v7 }
  0xa3   : > { %1028 = vmatpush.bf16.msrb.mxu1 %v1363_v19  ;;  %v1423_v9 = vor.u32 %v1510_v5, %v1422_v4 }
  0xa5   : > { %980 = vmatpush.bf16.msra.mxu0 %v1227_v21 }
  0xa6   : > { %1003 = vmatpush.bf16.msrb.mxu3 %v1327_v12  ;;  %953 = vmatpush.bf16.msra.mxu2 %v1255_v18  ;;  %v1200_v12 = vld [vmem:[%s1779_s29 + $0x78] sm:$0xf0] }
  0xa7   : > { %1029 = vmatpush.bf16.msrb.mxu1 %v1331_v34  ;;  %v1203_v13 = vor.u32 %v1450_v11, %v1200_v12 }
  0xa9   : > { %981 = vmatpush.bf16.msra.mxu0 %v1195_v36 }
  0xaa   : > { %1004 = vmatpush.bf16.msrb.mxu3 %v1295_v26  ;;  %954 = vmatpush.bf16.msra.mxu2 %v1223_v33 }
  0xab   : > { %1030 = vmatpush.bf16.msrb.mxu1 %v1299_v48 }
  0xac   : > { %1433 = vmatmul.msk.bf16.vlgmr.msra.gmra.mxu1 %vm813_vm2, %v1823_v0 }
  0xad   : > { %982 = vmatpush.bf16.msra.mxu0 %v1163_v49 }
  0xae   : > { %1005 = vmatpush.bf16.msrb.mxu3 %v1263_v41  ;;  %955 = vmatpush.bf16.msra.mxu2 %v1191_v47 }
  0xaf   : > { %1031 = vmatpush.bf16.msrb.mxu1 %v1267_v62 }
  0xb0   : > { %983 = vmatmul.bf16.vlgmr.msra.gmra.mxu0 %v1869_v3 }
  0xb1   : > { %1046 = vmatpush.bf16.msrb.mxu0 %v843_v57 }
  0xb2   : > { %1006 = vmatpush.bf16.msrb.mxu3 %v1231_v53  ;;  %956 = vmatpush.bf16.msra.mxu2 %v1159_v61 }
  0xb3   : > { %1032 = vmatpush.bf16.msrb.mxu1 %v1235_v23 }
  0xb5   : > { %1047 = vmatpush.bf16.msrb.mxu0 %v1427_v6  ;;  %957 = vmatmul.bf16.vlgmr.msra.gmra.mxu2 %v1869_v3 }
  0xb6   : > { %1020 = vmatpush.bf16.msrb.mxu2 %v840_v27  ;;  %1007 = vmatpush.bf16.msrb.mxu3 %v1199_v1 }
  0xb7   : > { %1033 = vmatpush.bf16.msrb.mxu1 %v1203_v13 }
  0xba   : > { %1021 = vmatpush.bf16.msrb.mxu2 %v1423_v9  ;;  %1008 = vmatpush.bf16.msrb.mxu3 %v1167_v10 }
  0xbb   : > { %1034 = vmatpush.bf16.msrb.mxu1 %v1171_v16 }
  0xbd   : > { %1009 = vmatmul.bf16.vlgmr.msrb.gmra.mxu3 %v1869_v3 }
  0xbe   : > { %1035 = vmatmul.bf16.vlgmr.msrb.gmra.mxu1 %v1869_v3 }
  0xc0   : > { %1435 = vmatmul.msk.bf16.vlgmr.msrb.gmra.mxu0 %vm813_vm2, %v1823_v0 }
  0xc5   : > { %1434 = vmatmul.msk.bf16.vlgmr.msrb.gmra.mxu2 %vm813_vm2, %v1823_v0 }
  0xf3   : > { %v425_v21 = vpop.permute.xlu0 %424 }
  0xf8   : > { %v867_v17 = vpop.f32.mrf.mxu2 }
  0xfa   : > { %v893_v18 = vpop.f32.mrf.mxu3 }
 0x100   : > { %v869_v19 = vpop.f32.mrf.mxu2 }
 0x102   : > { %v895_v20 = vpop.f32.mrf.mxu3 }
 0x105   : > { %v854_v22 = vpop.f32.mrf.mxu0 }
 0x106   : > { %v855_v24 = vadd.f32 %v854_v22, %v425_v21 }
 0x108   : > { %v868_v3 = vadd.f32 %v867_v17, %v855_v24 }
 0x109   : > { %v906_v25 = vpop.f32.mrf.mxu1 }
 0x10a   : > { %v907_v26 = vadd.f32 %v906_v25, %v425_v21  ;;  %v919_v28 = vpop.f32.mrf.mxu3  ;;  %v1053_v0 = vmax.f32 %v868_v3, 0.0 }
 0x10c   : > { %v920_v29 = vadd.f32 %v919_v28, %v907_v26  ;;  %1061 = vst [vmem:[%s1986_s11] sm:$0xff] %v1053_v0 }
 0x10d   : > { %v856_v31 = vpop.f32.mrf.mxu0 }
 0x10e   : > { %v1055_v30 = vmax.f32 %v920_v29, 0.0 }
 0x110   : > { %1063 = vst [vmem:[%s1986_s11 + $0x10] sm:$0xff] %v1055_v30 }
 0x111   : > { %v908_v32 = vpop.f32.mrf.mxu1 }
 0x112   : > { %v921_v33 = vpop.f32.mrf.mxu3 }
 0x115   : > { %v945_v36 = vpop.f32.mrf.mxu0 }
 0x118   : > { %v880_v34 = vpop.f32.mrf.mxu2 }
 0x119   : > { %v881_v35 = vadd.f32 %v880_v34, %v425_v21  ;;  %v971_v38 = vpop.f32.mrf.mxu1 }
 0x11b   : > { %v894_v37 = vadd.f32 %v893_v18, %v881_v35 }
 0x11d   : > { %v1054_v39 = vmax.f32 %v894_v37, 0.0  ;;  %v947_v44 = vpop.f32.mrf.mxu0 }
 0x11f   : > { %1062 = vst [vmem:[%s1986_s11 + $0x8] sm:$0xff] %v1054_v39 }
 0x120   : > { %v932_v40 = vpop.f32.mrf.mxu3  ;;  %v882_v42 = vpop.f32.mrf.mxu2 }
 0x121   : > { %v933_v41 = vadd.f32 %v932_v40, %v425_v21  ;;  %v973_v46 = vpop.f32.mrf.mxu1 }
 0x123   : > { %v946_v43 = vadd.f32 %v945_v36, %v933_v41 }
 0x125   : > { %v1056_v45 = vmax.f32 %v946_v43, 0.0 }
 0x127   : > { %1064 = vst [vmem:[%s1986_s11 + $0x18] sm:$0xff] %v1056_v45 }
 0x128   : > { %v934_v47 = vpop.f32.mrf.mxu3 }
 0x129   : > { %v997_v48 = vpop.f32.mrf.mxu1 }
 0x12d   : > { %v984_v49 = vpop.f32.mrf.mxu0 }
 0x12e   : > { %v985_v50 = vadd.f32 %v984_v49, %v425_v21 }
 0x130   : > { %v998_v51 = vadd.f32 %v997_v48, %v985_v50 }
 0x131   : > { %v999_v53 = vpop.f32.mrf.mxu1 }
 0x132   : > { %v1058_v52 = vmax.f32 %v998_v51, 0.0 }
 0x134   : > { %1066 = vst [vmem:[%s1986_s11 + $0x28] sm:$0xff] %v1058_v52 }
 0x135   : > { %v986_v54 = vpop.f32.mrf.mxu0 }
 0x138   : > { %v958_v55 = vpop.f32.mrf.mxu2 }
 0x139   : > { %v959_v56 = vadd.f32 %v958_v55, %v425_v21 }
 0x13b   : > { %v972_v57 = vadd.f32 %v971_v38, %v959_v56  ;;  %v1036_v60 = vpop.f32.mrf.mxu1 }
 0x13c   : > { %v1037_v27 = vadd.f32 %v1036_v60, %v425_v21 }
 0x13d   : > { %v1057_v58 = vmax.f32 %v972_v57, 0.0  ;;  %v1049_v61 = vpop.f32.mrf.mxu0 }
 0x13e   : > { %v1050_v63 = vadd.f32 %v1049_v61, %v1037_v27 }
 0x13f   : > { %1065 = vst [vmem:[%s1986_s11 + $0x20] sm:$0xff] %v1057_v58 }
 0x140   : > { %v1010_v59 = vpop.f32.mrf.mxu3  ;;  %v960_v62 = vpop.f32.mrf.mxu2  ;;  %v1060_v1 = vmax.f32 %v1050_v63, 0.0 }
 0x141   : > { %v1011_v2 = vadd.f32 %v1010_v59, %v425_v21 }
 0x142   : > { %1068 = vst [vmem:[%s1986_s11 + $0x38] sm:$0xff] %v1060_v1 }
 0x143   : > { %v1038_v5 = vpop.f32.mrf.mxu1 }
 0x145   : > { %v1051_v6 = vpop.f32.mrf.mxu0 }
 0x148   : > { %v1012_v4 = vpop.f32.mrf.mxu3  ;;  %v1023_v7 = vpop.f32.mrf.mxu2 }
 0x149   : > { %v1024_v8 = vadd.f32 %v1023_v7, %v1011_v2 }
 0x14b   : > { %v1059_v23 = vmax.f32 %v1024_v8, 0.0 }
 0x14d   : > { %1067 = vst [vmem:[%s1986_s11 + $0x30] sm:$0xff] %v1059_v23 }
 0x150   : > { %v1025_v9 = vpop.f32.mrf.mxu2 }
 0x151 PF: > { %p10_p9 = scmp.ge.s32.totalorder %s1603_s16, 4   ;;  %s2010_s12 = smov %s1558_s13 }
 0x152   : > { %s2011_s13 = smov %s1612_s19  ;;  %s2012_s14 = smov %s1603_s16 }
 0x153   :  { %12 = sbr.rel (!%p10_p9) target bundleno = 2 (0x2), region = 90 }

// kernel: generator_forward.20
= control target key start
LH: loop header
LB: loop body
LE: loop exit
PB: predicated region body
PF: predicated region fallthrough
CT: control target
= control target key end

     0   :  { %v154_v12 = vmov 256.0   ;;  %s253_s0 = inlined_call_operand.vmem [shape: f32[32,256], index: 0, kind: input, shape index: {}]   ;;  %s254_s1 = inlined_call_operand.vmem [shape: f32[32,256], index: 1, kind: output, shape index: {}]  }
   0x1   :  { %v12_v0 = vld [vmem:[%s253_s0 + $0x20] sm:$0xff]  ;;  %v13_v1 = vld [vmem:[%s253_s0 + $0x28] sm:$0xff]  ;;  %v14_v6 = vld [vmem:[%s253_s0 + $0x30] sm:$0xff]  ;;  %144 = vrcp.f32 %v154_v12 }
   0x2   :  { %v8_v2 = vld [vmem:[%s253_s0] sm:$0xff]  ;;  %v22_v3 = vadd.f32 %v13_v1, %v12_v0  ;;  %v9_v4 = vld [vmem:[%s253_s0 + $0x8] sm:$0xff]  ;;  %v15_v7 = vld [vmem:[%s253_s0 + $0x38] sm:$0xff] }
   0x3   :  { %v16_v5 = vadd.f32 %v9_v4, %v8_v2  ;;  %v10_v8 = vld [vmem:[%s253_s0 + $0x10] sm:$0xff]  ;;  %v11_v9 = vld [vmem:[%s253_s0 + $0x18] sm:$0xff]  ;;  %v25_v10 = vadd.f32 %v15_v7, %v14_v6 }
   0x4   :  { %23 = vadd.xlane.f32.xlu1 %v22_v3  ;;  %v19_v11 = vadd.f32 %v11_v9, %v10_v8 }
   0x5   :  { %17 = vadd.xlane.f32.xlu0 %v16_v5 }
   0x7   :  { %v145_v13 = vpop.eup %144 }
   0x8   :  { %v29_v14 = vmul.f32 256.0, %v145_v13  ;;  %vm33_vm0 = vweird.f32 %v145_v13 }
   0xa   :  { %v30_v15 = vsub.f32 1.0, %v29_v14 }
   0xc   :  { %26 = vadd.xlane.f32.xlu1 %v25_v10  ;;  %v31_v16 = vmul.f32 %v145_v13, %v30_v15 }
   0xd   :  { %20 = vadd.xlane.f32.xlu0 %v19_v11 }
   0xe   :  { %v32_v17 = vadd.f32 %v145_v13, %v31_v16 }
  0x10   :  { %v34_v18 = vsel %vm33_vm0, %v145_v13, %v32_v17 }
  0x77   :  { %v24_v19 = vpop.xlane.xlu1 %23 }
  0x78   :  { %v37_v20 = vmul.f32 %v34_v18, %v24_v19  ;;  %v18_v21 = vpop.xlane.xlu0 %17 }
  0x79   :  { %v35_v22 = vmul.f32 %v34_v18, %v18_v21 }
  0x7a   :  { %v189_v23 = vsub.f32 %v12_v0, %v37_v20  ;;  %v191_v24 = vsub.f32 %v13_v1, %v37_v20 }
  0x7b   :  { %v193_v25 = vsub.f32 %v8_v2, %v35_v22  ;;  %v195_v26 = vsub.f32 %v9_v4, %v35_v22 }
  0x7c   :  { %v51_v27 = vmul.f32 %v189_v23, %v189_v23  ;;  %v52_v28 = vmul.f32 %v191_v24, %v191_v24 }
  0x7d   :  { %v47_v29 = vmul.f32 %v193_v25, %v193_v25  ;;  %v48_v30 = vmul.f32 %v195_v26, %v195_v26 }
  0x7e   :  { %v61_v31 = vadd.f32 %v52_v28, %v51_v27 }
  0x7f   :  { %v27_v32 = vpop.xlane.xlu1 %26  ;;  %v55_v33 = vadd.f32 %v48_v30, %v47_v29 }
  0x80   :  { %v38_v34 = vmul.f32 %v34_v18, %v27_v32  ;;  %v21_v35 = vpop.xlane.xlu0 %20  ;;  %62 = vadd.xlane.f32.xlu0 %v61_v31 }
  0x81   :  { %v36_v36 = vmul.f32 %v34_v18, %v21_v35  ;;  %56 = vadd.xlane.f32.xlu2 %v55_v33 }
  0x82   :  { %v205_v37 = vsub.f32 %v14_v6, %v38_v34  ;;  %v207_v38 = vsub.f32 %v15_v7, %v38_v34 }
  0x83   :  { %v209_v39 = vsub.f32 %v10_v8, %v36_v36  ;;  %v211_v40 = vsub.f32 %v11_v9, %v36_v36 }
  0x84   :  { %v53_v41 = vmul.f32 %v205_v37, %v205_v37  ;;  %v54_v42 = vmul.f32 %v207_v38, %v207_v38 }
  0x85   :  { %v49_v43 = vmul.f32 %v209_v39, %v209_v39  ;;  %v50_v44 = vmul.f32 %v211_v40, %v211_v40 }
  0x86   :  { %v64_v45 = vadd.f32 %v54_v42, %v53_v41 }
  0x87   :  { %v58_v46 = vadd.f32 %v50_v44, %v49_v43 }
  0x88   :  { %65 = vadd.xlane.f32.xlu1 %v64_v45 }
  0x89   :  { %59 = vadd.xlane.f32.xlu2 %v58_v46 }
  0xf3   :  { %v63_v47 = vpop.xlane.xlu0 %62 }
  0xf4   :  { %v57_v48 = vpop.xlane.xlu2 %56  ;;  %v69_v49 = vmul.f32 %v63_v47, %v34_v18 }
  0xf5   :  { %v67_v50 = vmul.f32 %v57_v48, %v34_v18 }
  0xf6   :  { %v73_v51 = vadd.f32 1e-05, %v69_v49 }
  0xf7   :  { %v71_v52 = vadd.f32 1e-05, %v67_v50 }
  0xf8   :  { %146 = vrsqrt.f32 %v73_v51  ;;  %vm101_vm3 = vweird.f32 %v73_v51 }
  0xf9   :  { %148 = vrsqrt.f32 %v71_v52  ;;  %vm81_vm4 = vweird.f32 %v71_v52 }
  0xfb   :  { %v66_v53 = vpop.xlane.xlu1 %65 }
  0xfc   :  { %v70_v54 = vmul.f32 %v66_v53, %v34_v18  ;;  %v60_v55 = vpop.xlane.xlu2 %59 }
  0xfd   :  { %v68_v56 = vmul.f32 %v60_v55, %v34_v18 }
  0xfe   :  { %v147_v57 = vpop.eup %146  ;;  %v74_v58 = vadd.f32 1e-05, %v70_v54 }
  0xff   :  { %v149_v59 = vpop.eup %148  ;;  %v96_v60 = vmul.f32 %v147_v57, %v73_v51  ;;  %v72_v61 = vadd.f32 1e-05, %v68_v56  ;;  %vm102_vm1 = vweird.f32 %v147_v57 }
 0x100   :  { %v76_v62 = vmul.f32 %v149_v59, %v71_v52  ;;  %150 = vrsqrt.f32 %v74_v58  ;;  %vm82_vm2 = vweird.f32 %v149_v59  ;;  %vm103_vm5 = vmor %vm101_vm3, %vm102_vm1  ;;  %vm111_vm9 = vweird.f32 %v74_v58 }
 0x101   :  { %v97_v63 = vmul.f32 %v147_v57, %v96_v60  ;;  %152 = vrsqrt.f32 %v72_v61  ;;  %vm83_vm6 = vmor %vm81_vm4, %vm82_vm2  ;;  %vm91_vm11 = vweird.f32 %v72_v61 }
 0x102   :  { %v77_v0 = vmul.f32 %v149_v59, %v76_v62 }
 0x103   :  { %v98_v1 = vmul.f32 0.5, %v97_v63 }
 0x104   :  { %v78_v2 = vmul.f32 0.5, %v77_v0 }
 0x105   :  { %v99_v3 = vsub.f32 1.5, %v98_v1 }
 0x106   :  { %v151_v4 = vpop.eup %150  ;;  %v79_v5 = vsub.f32 1.5, %v78_v2 }
 0x107   :  { %v153_v6 = vpop.eup %152  ;;  %v100_v7 = vmul.f32 %v147_v57, %v99_v3  ;;  %v106_v8 = vmul.f32 %v151_v4, %v74_v58  ;;  %vm112_vm7 = vweird.f32 %v151_v4 }
 0x108   :  { %v80_v9 = vmul.f32 %v149_v59, %v79_v5  ;;  %v86_v10 = vmul.f32 %v153_v6, %v72_v61  ;;  %vm92_vm8 = vweird.f32 %v153_v6  ;;  %vm113_vm10 = vmor %vm111_vm9, %vm112_vm7 }
 0x109   :  { %v104_v11 = vsel %vm103_vm5, %v147_v57, %v100_v7  ;;  %v107_v12 = vmul.f32 %v151_v4, %v106_v8  ;;  %vm93_vm12 = vmor %vm91_vm11, %vm92_vm8 }
 0x10a   :  { %v84_v13 = vsel %vm83_vm6, %v149_v59, %v80_v9  ;;  %v119_v14 = vmul.f32 %v104_v11, %v189_v23  ;;  %v120_v15 = vmul.f32 %v104_v11, %v191_v24  ;;  %v87_v16 = vmul.f32 %v153_v6, %v86_v10 }
 0x10b   :  { %v115_v17 = vmul.f32 %v84_v13, %v193_v25  ;;  %v116_v18 = vmul.f32 %v84_v13, %v195_v26  ;;  %v108_v19 = vmul.f32 0.5, %v107_v12 }
 0x10c   :  { %v127_v20 = vmax.f32 %v119_v14, 0.0  ;;  %v88_v21 = vmul.f32 0.5, %v87_v16  ;;  %v128_v28 = vmax.f32 %v120_v15, 0.0 }
 0x10d   :  { %v123_v22 = vmax.f32 %v115_v17, 0.0  ;;  %v124_v27 = vmax.f32 %v116_v18, 0.0  ;;  %v109_v29 = vsub.f32 1.5, %v108_v19 }
 0x10e   :  { %135 = vst [vmem:[%s254_s1 + $0x20] sm:$0xff] %v127_v20  ;;  %v89_v23 = vsub.f32 1.5, %v88_v21 }
 0x10f   :  { %131 = vst [vmem:[%s254_s1] sm:$0xff] %v123_v22  ;;  %v110_v24 = vmul.f32 %v151_v4, %v109_v29 }
 0x110   :  { %132 = vst [vmem:[%s254_s1 + $0x8] sm:$0xff] %v124_v27  ;;  %v90_v25 = vmul.f32 %v153_v6, %v89_v23 }
 0x111   :  { %136 = vst [vmem:[%s254_s1 + $0x28] sm:$0xff] %v128_v28  ;;  %v114_v26 = vsel %vm113_vm10, %v151_v4, %v110_v24 }
 0x112   :  { %v121_v30 = vmul.f32 %v114_v26, %v205_v37  ;;  %v122_v31 = vmul.f32 %v114_v26, %v207_v38  ;;  %v94_v32 = vsel %vm93_vm12, %v153_v6, %v90_v25 }
 0x113   :  { %v117_v33 = vmul.f32 %v94_v32, %v209_v39  ;;  %v118_v34 = vmul.f32 %v94_v32, %v211_v40 }
 0x114   :  { %v129_v35 = vmax.f32 %v121_v30, 0.0  ;;  %v130_v36 = vmax.f32 %v122_v31, 0.0 }
 0x115   :  { %v125_v41 = vmax.f32 %v117_v33, 0.0  ;;  %v126_v42 = vmax.f32 %v118_v34, 0.0 }
 0x116   :  { %137 = vst [vmem:[%s254_s1 + $0x30] sm:$0xff] %v129_v35 }
 0x117   :  { %138 = vst [vmem:[%s254_s1 + $0x38] sm:$0xff] %v130_v36 }
 0x118   :  { %133 = vst [vmem:[%s254_s1 + $0x10] sm:$0xff] %v125_v41 }
 0x119   :  { %134 = vst [vmem:[%s254_s1 + $0x18] sm:$0xff] %v126_v42 }

// kernel: generator_forward.19
= control target key start
LH: loop header
LB: loop body
LE: loop exit
PB: predicated region body
PF: predicated region fallthrough
CT: control target
= control target key end

     0   :  { %v318_v2 = vmov 0   ;;  %vm146_vm0 = vcmask 1043456   ;;  %vm142_vm1 = vcmask 588800   ;;  %s478_s1 = inlined_call_operand.vmem [shape: bf16[72,512], index: 1, kind: input, shape index: {}]   ;;  %s479_s2 = inlined_call_operand.vmem [shape: f32[16,1], index: 2, kind: input, shape index: {}]   ;;  %s480_s0 = inlined_call_operand.vmem [shape: bf16[16,72], index: 0, kind: input, shape index: {}]   ;;  %s481_s3 = inlined_call_operand.vmem [shape: f32[16,512], index: 3, kind: output, shape index: {}]  }
   0x1   :  { %v33_v0 = vld [vmem:[%s478_s1 + $0x80] sm:$0xff]  ;;  %v34_v1 = vld [vmem:[%s478_s1 + $0x88] sm:$0xff]  ;;  %317 = vset.pattern.permute.xlu0 %v318_v2  ;;  %v314_v8 = vld [vmem:[%s478_s1 + $0x6c] sm:$0xf0] }
   0x2   :  { %v102_v3 = vunpack.c.l.b16 %v33_v0  ;;  %v103_v4 = vunpack.c.h.b16 %v33_v0  ;;  %v104_v5 = vunpack.c.l.b16 %v34_v1  ;;  %v105_v6 = vunpack.c.h.b16 %v34_v1  ;;  %v281_v7 = vld [vmem:[%s478_s1 + $0x60] sm:$0xf]  ;;  %v312_v13 = vld [vmem:[%s478_s1 + $0x64] sm:$0xf]  ;;  %v283_v14 = vld [vmem:[%s478_s1 + $0x70] sm:$0xf0] }
   0x3   :  { %v289_v15 = vld [vmem:[%s478_s1 + $0x68] sm:$0xf]  ;;  %v315_v16 = vld [vmem:[%s478_s1 + $0x74] sm:$0xf0]  ;;  %v313_v17 = vld [vmem:[%s478_s1 + $0x6c] sm:$0xf]  ;;  %v282_v23 = vor.u32 %v314_v8, %v281_v7  ;;  %v286_v24 = vor.u32 %v312_v13, %v283_v14 }
   0x4   :  { %v122_v9 = vpack.c.b16 %v102_v3, %v102_v3  ;;  %v123_v10 = vpack.c.b16 %v103_v4, %v103_v4  ;;  %v124_v11 = vpack.c.b16 %v104_v5, %v104_v5  ;;  %v125_v12 = vpack.c.b16 %v105_v6, %v105_v6  ;;  %v291_v18 = vld [vmem:[%s478_s1 + $0x78] sm:$0xf0]  ;;  %v265_v25 = vld [vmem:[%s478_s1 + $0x40] sm:$0xf]  ;;  %v310_v26 = vld [vmem:[%s478_s1 + $0x4c] sm:$0xf0] }
   0x5   :  { %v290_v27 = vor.u32 %v315_v16, %v289_v15  ;;  %v294_v28 = vor.u32 %v313_v17, %v291_v18  ;;  %v308_v29 = vld [vmem:[%s478_s1 + $0x44] sm:$0xf]  ;;  %v267_v30 = vld [vmem:[%s478_s1 + $0x50] sm:$0xf0]  ;;  %v273_v31 = vld [vmem:[%s478_s1 + $0x48] sm:$0xf]  ;;  %v266_v35 = vor.u32 %v310_v26, %v265_v25 }
   0x6   :  { %v148_v19 = vsel %vm146_vm0, %v122_v9, 0  ;;  %v151_v20 = vsel %vm146_vm0, %v123_v10, 0  ;;  %v154_v21 = vsel %vm146_vm0, %v124_v11, 0  ;;  %v157_v22 = vsel %vm146_vm0, %v125_v12, 0  ;;  %v311_v32 = vld [vmem:[%s478_s1 + $0x54] sm:$0xf0] }
   0x7   :  { %162 = vmatpush.bf16.msra.mxu0 %v148_v19  ;;  %176 = vmatpush.bf16.msra.mxu1 %v151_v20  ;;  %v309_v33 = vld [vmem:[%s478_s1 + $0x4c] sm:$0xf]  ;;  %v275_v34 = vld [vmem:[%s478_s1 + $0x58] sm:$0xf0]  ;;  %v270_v36 = vor.u32 %v308_v29, %v267_v30  ;;  %v249_v37 = vld [vmem:[%s478_s1 + $0x20] sm:$0xf]  ;;  %v274_v40 = vor.u32 %v311_v32, %v273_v31 }
   0x8   :  { %190 = vmatpush.bf16.msra.mxu2 %v154_v21  ;;  %204 = vmatpush.bf16.msra.mxu3 %v157_v22  ;;  %v306_v38 = vld [vmem:[%s478_s1 + $0x2c] sm:$0xf0]  ;;  %v304_v39 = vld [vmem:[%s478_s1 + $0x24] sm:$0xf]  ;;  %v278_v41 = vor.u32 %v309_v33, %v275_v34  ;;  %v251_v42 = vld [vmem:[%s478_s1 + $0x30] sm:$0xf0] }
   0x9   :  { %v257_v43 = vld [vmem:[%s478_s1 + $0x28] sm:$0xf]  ;;  %v307_v44 = vld [vmem:[%s478_s1 + $0x34] sm:$0xf0]  ;;  %v305_v45 = vld [vmem:[%s478_s1 + $0x2c] sm:$0xf]  ;;  %v250_v48 = vor.u32 %v306_v38, %v249_v37  ;;  %v254_v49 = vor.u32 %v304_v39, %v251_v42 }
   0xa   :  { %v259_v46 = vld [vmem:[%s478_s1 + $0x38] sm:$0xf0]  ;;  %v35_v47 = vld [vmem:[%s479_s2] sm:$0xff]  ;;  %v302_v51 = vld [vmem:[%s478_s1 + $0xc] sm:$0xf0]  ;;  %v258_v52 = vor.u32 %v307_v44, %v257_v43 }
   0xb   :  { %163 = vmatpush.bf16.msra.mxu0 %v282_v23  ;;  %177 = vmatpush.bf16.msra.mxu1 %v286_v24  ;;  %v233_v50 = vld [vmem:[%s478_s1] sm:$0xf]  ;;  %v262_v53 = vor.u32 %v305_v45, %v259_v46  ;;  %v300_v54 = vld [vmem:[%s478_s1 + $0x4] sm:$0xf]  ;;  %v235_v55 = vld [vmem:[%s478_s1 + $0x10] sm:$0xf0] }
   0xc   :  { %191 = vmatpush.bf16.msra.mxu2 %v290_v27  ;;  %205 = vmatpush.bf16.msra.mxu3 %v294_v28  ;;  %v241_v56 = vld [vmem:[%s478_s1 + $0x8] sm:$0xf]  ;;  %v303_v57 = vld [vmem:[%s478_s1 + $0x14] sm:$0xf0]  ;;  %v301_v58 = vld [vmem:[%s478_s1 + $0xc] sm:$0xf]  ;;  %v234_v60 = vor.u32 %v302_v51, %v233_v50  ;;  %v238_v61 = vor.u32 %v300_v54, %v235_v55 }
   0xd   :  { %39 = vperm.xlu0 %317, %v35_v47   ;;  %v243_v59 = vld [vmem:[%s478_s1 + $0x18] sm:$0xf0]  ;;  %v36_v62 = vld [vmem:[%s479_s2 + $0x8] sm:$0xff]  ;;  %v242_v63 = vor.u32 %v303_v57, %v241_v56  ;;  %v299_v1 = vld [vmem:[%s480_s0] sm:$0xff] }
   0xe   :  { %v246_v0 = vor.u32 %v301_v58, %v243_v59 }
   0xf   :  { %164 = vmatpush.bf16.msra.mxu0 %v266_v35  ;;  %178 = vmatpush.bf16.msra.mxu1 %v270_v36 }
  0x10   :  { %192 = vmatpush.bf16.msra.mxu2 %v274_v40  ;;  %206 = vmatpush.bf16.msra.mxu3 %v278_v41 }
  0x13   :  { %165 = vmatpush.bf16.msra.mxu0 %v250_v48  ;;  %179 = vmatpush.bf16.msra.mxu1 %v254_v49 }
  0x14   :  { %193 = vmatpush.bf16.msra.mxu2 %v258_v52  ;;  %207 = vmatpush.bf16.msra.mxu3 %v262_v53 }
  0x15   :  { %44 = vperm.xlu0 %317, %v36_v62  }
  0x17   :  { %166 = vmatpush.bf16.msra.mxu0 %v234_v60  ;;  %180 = vmatpush.bf16.msra.mxu1 %v238_v61 }
  0x18   :  { %194 = vmatpush.bf16.msra.mxu2 %v242_v63  ;;  %208 = vmatpush.bf16.msra.mxu3 %v246_v0 }
  0x1a   :  { %295 = vmatmul.msk.bf16.vlgmr.msra.gmra.mxu0 %vm142_vm1, %v299_v1  ;;  %296 = vmatmul.msk.bf16.vlgmr.msra.gmra.mxu1 %vm142_vm1, %v299_v1 }
  0x1b   :  { %297 = vmatmul.msk.bf16.vlgmr.msra.gmra.mxu2 %vm142_vm1, %v299_v1  ;;  %298 = vmatmul.msk.bf16.vlgmr.msra.gmra.mxu3 %vm142_vm1, %v299_v1 }
  0x7f   :  { %v40_v2 = vpop.permute.xlu0 %39 }
  0x87   :  { %v45_v7 = vpop.permute.xlu0 %44 }
  0x97   :  { %v168_v3 = vpop.f32.mrf.mxu0  ;;  %v182_v4 = vpop.f32.mrf.mxu1 }
  0x98   :  { %v169_v5 = vadd.f32 %v168_v3, %v40_v2  ;;  %v183_v6 = vadd.f32 %v182_v4, %v40_v2 }
  0x9a   :  { %215 = vst [vmem:[%s481_s3] sm:$0xff] %v169_v5 }
  0x9b   :  { %216 = vst [vmem:[%s481_s3 + $0x8] sm:$0xff] %v183_v6 }
  0x9e   :  { %v196_v8 = vpop.f32.mrf.mxu2  ;;  %v210_v9 = vpop.f32.mrf.mxu3 }
  0x9f   :  { %v197_v10 = vadd.f32 %v196_v8, %v40_v2  ;;  %v211_v11 = vadd.f32 %v210_v9, %v40_v2  ;;  %v170_v12 = vpop.f32.mrf.mxu0  ;;  %v184_v13 = vpop.f32.mrf.mxu1 }
  0xa0   :  { %v171_v14 = vadd.f32 %v170_v12, %v45_v7  ;;  %v185_v15 = vadd.f32 %v184_v13, %v45_v7 }
  0xa1   :  { %217 = vst [vmem:[%s481_s3 + $0x10] sm:$0xff] %v197_v10 }
  0xa2   :  { %218 = vst [vmem:[%s481_s3 + $0x18] sm:$0xff] %v211_v11 }
  0xa3   :  { %219 = vst [vmem:[%s481_s3 + $0x20] sm:$0xff] %v171_v14 }
  0xa4   :  { %220 = vst [vmem:[%s481_s3 + $0x28] sm:$0xff] %v185_v15 }
  0xa6   :  { %v198_v16 = vpop.f32.mrf.mxu2  ;;  %v212_v17 = vpop.f32.mrf.mxu3 }
  0xa7   :  { %v199_v18 = vadd.f32 %v198_v16, %v45_v7  ;;  %v213_v19 = vadd.f32 %v212_v17, %v45_v7 }
  0xa9   :  { %221 = vst [vmem:[%s481_s3 + $0x30] sm:$0xff] %v199_v18 }
  0xaa   :  { %222 = vst [vmem:[%s481_s3 + $0x38] sm:$0xff] %v213_v19 }

// kernel: generator_forward.21
= control target key start
LH: loop header
LB: loop body
LE: loop exit
PB: predicated region body
PF: predicated region fallthrough
CT: control target
= control target key end

     0   :  { %v264_v6 = vmov 0   ;;  %vm133_vm0 = vcmask 130048   ;;  %s362_s1 = inlined_call_operand.vmem [shape: bf16[144,128], index: 1, kind: input, shape index: {}]   ;;  %s363_s0 = inlined_call_operand.vmem [shape: bf16[32,144], index: 0, kind: input, shape index: {}]   ;;  %s364_s2 = inlined_call_operand.vmem [shape: f32[32,1], index: 2, kind: input, shape index: {}]   ;;  %s365_s3 = inlined_call_operand.vmem [shape: f32[32,128], index: 3, kind: output, shape index: {}]  }
   0x1   :  { %v251_v0 = vld [vmem:[%s362_s1 + $0x38] sm:$0xff]  ;;  %v252_v1 = vld [vmem:[%s362_s1 + $0x40] sm:$0xff]  ;;  %v250_v3 = vld [vmem:[%s362_s1 + $0x30] sm:$0xff]  ;;  %263 = vset.pattern.permute.xlu1 %v264_v6  ;;  %262 = vset.pattern.permute.xlu0 %v264_v6 }
   0x2   :  { %v240_v2 = vld [vmem:[%s363_s0 + $0x4] sm:$0xf]  ;;  %140 = vmatpush.bf16.msra.mxu0 %v251_v0  ;;  %253 = vmatpush.bf16.msra.mxu2 %v251_v0  ;;  %v190_v4 = vld [vmem:[%s363_s0 + $0x8] sm:$0xf0]  ;;  %v39_v7 = vld [vmem:[%s364_s2 + $0x10] sm:$0xff] }
   0x3   :  { %166 = vmatpush.bf16.msra.mxu1 %v252_v1  ;;  %v193_v5 = vor.u32 %v240_v2, %v190_v4  ;;  %v249_v8 = vld [vmem:[%s362_s1 + $0x28] sm:$0xff]  ;;  %v37_v9 = vld [vmem:[%s364_s2] sm:$0xff]  ;;  %53 = vperm.xlu1 %263, %v39_v7   ;;  %v40_v11 = vld [vmem:[%s364_s2 + $0x18] sm:$0xff] }
   0x4   :  { %43 = vperm.xlu0 %262, %v37_v9   ;;  %v248_v10 = vld [vmem:[%s362_s1 + $0x20] sm:$0xff]  ;;  %v38_v12 = vld [vmem:[%s364_s2 + $0x8] sm:$0xff]  ;;  %v247_v13 = vld [vmem:[%s362_s1 + $0x18] sm:$0xff] }
   0x5   :  { %v242_v14 = vld [vmem:[%s363_s0 + $0x14] sm:$0xf]  ;;  %v198_v15 = vld [vmem:[%s363_s0 + $0x18] sm:$0xf0]  ;;  %v245_v18 = vld [vmem:[%s362_s1 + $0x8] sm:$0xff] }
   0x6   :  { %141 = vmatpush.bf16.msra.mxu0 %v250_v3  ;;  %254 = vmatpush.bf16.msra.mxu2 %v250_v3  ;;  %v246_v16 = vld [vmem:[%s362_s1 + $0x10] sm:$0xff]  ;;  %v201_v17 = vor.u32 %v242_v14, %v198_v15  ;;  %v244_v19 = vld [vmem:[%s362_s1] sm:$0xff]  ;;  %v241_v21 = vld [vmem:[%s363_s0 + $0x4] sm:$0xf0] }
   0x7   :  { %238 = vmatmul.msk.bf16.vlgmr.msra.gmra.mxu1 %vm133_vm0, %v193_v5  ;;  %v188_v20 = vld [vmem:[%s363_s0] sm:$0xf]  ;;  %v196_v22 = vld [vmem:[%s363_s0 + $0x10] sm:$0xf]  ;;  %v243_v23 = vld [vmem:[%s363_s0 + $0x14] sm:$0xf0] }
   0x8   :  { %v189_v24 = vor.u32 %v241_v21, %v188_v20  ;;  %v197_v25 = vor.u32 %v243_v23, %v196_v22 }
   0xa   :  { %142 = vmatpush.bf16.msra.mxu0 %v249_v8  ;;  %255 = vmatpush.bf16.msra.mxu2 %v249_v8 }
   0xb   :  { %58 = vperm.xlu1 %263, %v40_v11  }
   0xc   :  { %48 = vperm.xlu0 %262, %v38_v12  }
   0xe   :  { %143 = vmatpush.bf16.msra.mxu0 %v248_v10  ;;  %256 = vmatpush.bf16.msra.mxu2 %v248_v10 }
  0x12   :  { %144 = vmatpush.bf16.msra.mxu0 %v247_v13  ;;  %257 = vmatpush.bf16.msra.mxu2 %v247_v13 }
  0x16   :  { %145 = vmatpush.bf16.msra.mxu0 %v246_v16  ;;  %258 = vmatpush.bf16.msra.mxu2 %v246_v16 }
  0x17   :  { %239 = vmatmul.msk.bf16.gmra.mxu1 %vm133_vm0, %v201_v17 }
  0x1a   :  { %146 = vmatpush.bf16.msra.mxu0 %v245_v18  ;;  %259 = vmatpush.bf16.msra.mxu2 %v245_v18 }
  0x1e   :  { %147 = vmatpush.bf16.msra.mxu0 %v244_v19  ;;  %260 = vmatpush.bf16.msra.mxu2 %v244_v19 }
  0x21   :  { %148 = vmatmul.bf16.vlgmr.msra.gmra.mxu0 %v189_v24  ;;  %153 = vmatmul.bf16.vlgmr.msra.gmra.mxu2 %v197_v25 }
  0x75   :  { %v54_v32 = vpop.permute.xlu1 %53 }
  0x76   :  { %v44_v28 = vpop.permute.xlu0 %43 }
  0x7d   :  { %v59_v41 = vpop.permute.xlu1 %58 }
  0x7e   :  { %v49_v36 = vpop.permute.xlu0 %48 }
  0x84   :  { %v168_v26 = vpop.f32.mrf.mxu1 }
  0x8c   :  { %v170_v27 = vpop.f32.mrf.mxu1 }
  0x94   :  { %v173_v33 = vpop.f32.mrf.mxu1 }
  0x9c   :  { %v175_v44 = vpop.f32.mrf.mxu1 }
  0x9e   :  { %v149_v29 = vpop.f32.mrf.mxu0 }
  0x9f   :  { %v150_v30 = vadd.f32 %v149_v29, %v44_v28 }
  0xa1   :  { %v169_v31 = vadd.f32 %v168_v26, %v150_v30 }
  0xa3   :  { %178 = vst [vmem:[%s365_s3] sm:$0xff] %v169_v31 }
  0xa4   :  { %v154_v34 = vpop.f32.mrf.mxu2 }
  0xa5   :  { %v155_v35 = vadd.f32 %v154_v34, %v54_v32 }
  0xa6   :  { %v151_v37 = vpop.f32.mrf.mxu0 }
  0xa7   :  { %v174_v38 = vadd.f32 %v173_v33, %v155_v35  ;;  %v152_v39 = vadd.f32 %v151_v37, %v49_v36 }
  0xa9   :  { %180 = vst [vmem:[%s365_s3 + $0x10] sm:$0xff] %v174_v38  ;;  %v171_v40 = vadd.f32 %v170_v27, %v152_v39 }
  0xab   :  { %179 = vst [vmem:[%s365_s3 + $0x8] sm:$0xff] %v171_v40 }
  0xac   :  { %v156_v42 = vpop.f32.mrf.mxu2 }
  0xad   :  { %v157_v43 = vadd.f32 %v156_v42, %v59_v41 }
  0xaf   :  { %v176_v45 = vadd.f32 %v175_v44, %v157_v43 }
  0xb1   :  { %181 = vst [vmem:[%s365_s3 + $0x18] sm:$0xff] %v176_v45 }

// kernel: generator_forward.22
= control target key start
LH: loop header
LB: loop body
LE: loop exit
PB: predicated region body
PF: predicated region fallthrough
CT: control target
= control target key end

     0   :  { %vm16_vm0 = vcmask 523264   ;;  %v239_v16 = vmov 64.0   ;;  %s408_s0 = inlined_call_operand.vmem [shape: f32[64,64], index: 0, kind: input, shape index: {}]   ;;  %s409_s1 = inlined_call_operand.vmem [shape: f32[64,64], index: 1, kind: output, shape index: {}]  }
   0x1   :  { %v12_v0 = vld [vmem:[%s408_s0 + $0x20] sm:$0xff]  ;;  %v10_v1 = vld [vmem:[%s408_s0 + $0x10] sm:$0xff]  ;;  %v13_v6 = vld [vmem:[%s408_s0 + $0x28] sm:$0xff]  ;;  %221 = vrcp.f32 %v239_v16 }
   0x2   :  { %v8_v2 = vld [vmem:[%s408_s0] sm:$0xff]  ;;  %v29_v3 = vsel %vm16_vm0, %v12_v0, 0.0  ;;  %v23_v4 = vsel %vm16_vm0, %v10_v1, 0.0  ;;  %v11_v7 = vld [vmem:[%s408_s0 + $0x18] sm:$0xff]  ;;  %v9_v8 = vld [vmem:[%s408_s0 + $0x8] sm:$0xff]  ;;  %v32_v9 = vsel %vm16_vm0, %v13_v6, 0.0 }
   0x3   :  { %v17_v5 = vsel %vm16_vm0, %v8_v2, 0.0  ;;  %30 = vadd.xlane.f32.xlu2 %v29_v3  ;;  %24 = vadd.xlane.f32.xlu1 %v23_v4  ;;  %v26_v10 = vsel %vm16_vm0, %v11_v7, 0.0  ;;  %v20_v11 = vsel %vm16_vm0, %v9_v8, 0.0  ;;  %v15_v12 = vld [vmem:[%s408_s0 + $0x38] sm:$0xff]  ;;  %v14_v13 = vld [vmem:[%s408_s0 + $0x30] sm:$0xff] }
   0x4   :  { %18 = vadd.xlane.f32.xlu0 %v17_v5  ;;  %v38_v14 = vsel %vm16_vm0, %v15_v12, 0.0  ;;  %v35_v15 = vsel %vm16_vm0, %v14_v13, 0.0 }
   0x7   :  { %v222_v17 = vpop.eup %221 }
   0x8   :  { %v42_v18 = vmul.f32 64.0, %v222_v17  ;;  %vm46_vm1 = vweird.f32 %v222_v17 }
   0xa   :  { %v43_v19 = vsub.f32 1.0, %v42_v18 }
   0xb   :  { %33 = vadd.xlane.f32.xlu2 %v32_v9  ;;  %27 = vadd.xlane.f32.xlu1 %v26_v10 }
   0xc   :  { %21 = vadd.xlane.f32.xlu0 %v20_v11  ;;  %v44_v20 = vmul.f32 %v222_v17, %v43_v19 }
   0xe   :  { %v45_v21 = vadd.f32 %v222_v17, %v44_v20 }
  0x10   :  { %v282_v22 = vsel %vm46_vm1, %v222_v17, %v45_v21 }
  0x13   :  { %39 = vadd.xlane.f32.xlu1 %v38_v14 }
  0x14   :  { %36 = vadd.xlane.f32.xlu0 %v35_v15 }
  0x76   :  { %v31_v23 = vpop.xlane.xlu2 %30  ;;  %v25_v24 = vpop.xlane.xlu1 %24 }
  0x77   :  { %v50_v25 = vmul.f32 %v282_v22, %v25_v24  ;;  %v19_v26 = vpop.xlane.xlu0 %18  ;;  %v52_v39 = vmul.f32 %v282_v22, %v31_v23 }
  0x78   :  { %v48_v27 = vmul.f32 %v282_v22, %v19_v26 }
  0x79   :  { %v286_v28 = vsub.f32 %v10_v1, %v50_v25  ;;  %v310_v46 = vsub.f32 %v12_v0, %v52_v39 }
  0x7a   :  { %v288_v29 = vsub.f32 %v8_v2, %v48_v27 }
  0x7b   :  { %v66_v30 = vmul.f32 %v286_v28, %v286_v28  ;;  %v68_v55 = vmul.f32 %v310_v46, %v310_v46 }
  0x7c   :  { %v64_v31 = vmul.f32 %v288_v29, %v288_v29 }
  0x7d   :  { %v78_v32 = vsel %vm16_vm0, %v66_v30, 0.0  ;;  %v84_v58 = vsel %vm16_vm0, %v68_v55, 0.0 }
  0x7e   :  { %v34_v33 = vpop.xlane.xlu2 %33  ;;  %79 = vadd.xlane.f32.xlu1 %v78_v32  ;;  %v28_v34 = vpop.xlane.xlu1 %27  ;;  %v72_v35 = vsel %vm16_vm0, %v64_v31, 0.0 }
  0x7f   :  { %v53_v36 = vmul.f32 %v282_v22, %v34_v33  ;;  %v51_v37 = vmul.f32 %v282_v22, %v28_v34  ;;  %73 = vadd.xlane.f32.xlu2 %v72_v35  ;;  %v22_v38 = vpop.xlane.xlu0 %21 }
  0x80   :  { %v49_v40 = vmul.f32 %v282_v22, %v22_v38 }
  0x81   :  { %v300_v41 = vsub.f32 %v13_v6, %v53_v36  ;;  %v302_v42 = vsub.f32 %v11_v7, %v51_v37 }
  0x82   :  { %v304_v43 = vsub.f32 %v9_v8, %v49_v40 }
  0x83   :  { %v69_v44 = vmul.f32 %v300_v41, %v300_v41  ;;  %v67_v45 = vmul.f32 %v302_v42, %v302_v42 }
  0x84   :  { %v65_v47 = vmul.f32 %v304_v43, %v304_v43 }
  0x85   :  { %v87_v48 = vsel %vm16_vm0, %v69_v44, 0.0  ;;  %v81_v49 = vsel %vm16_vm0, %v67_v45, 0.0 }
  0x86   :  { %88 = vadd.xlane.f32.xlu1 %v87_v48  ;;  %v75_v50 = vsel %vm16_vm0, %v65_v47, 0.0  ;;  %v40_v51 = vpop.xlane.xlu1 %39 }
  0x87   :  { %82 = vadd.xlane.f32.xlu2 %v81_v49  ;;  %76 = vadd.xlane.f32.xlu0 %v75_v50  ;;  %v37_v52 = vpop.xlane.xlu0 %36  ;;  %v55_v54 = vmul.f32 %v282_v22, %v40_v51 }
  0x88   :  { %v54_v53 = vmul.f32 %v282_v22, %v37_v52 }
  0x89   :  { %v323_v57 = vsub.f32 %v15_v12, %v55_v54 }
  0x8a   :  { %v321_v56 = vsub.f32 %v14_v13, %v54_v53 }
  0x8b   :  { %v71_v61 = vmul.f32 %v323_v57, %v323_v57 }
  0x8c   :  { %v70_v59 = vmul.f32 %v321_v56, %v321_v56 }
  0x8d   :  { %v93_v62 = vsel %vm16_vm0, %v71_v61, 0.0 }
  0x8e   :  { %v90_v60 = vsel %vm16_vm0, %v70_v59, 0.0 }
  0x8f   :  { %85 = vadd.xlane.f32.xlu0 %v84_v58  ;;  %91 = vadd.xlane.f32.xlu2 %v90_v60 }
  0x97   :  { %94 = vadd.xlane.f32.xlu0 %v93_v62 }
  0xf1   :  { %v80_v63 = vpop.xlane.xlu1 %79 }
  0xf2   :  { %v98_v0 = vmul.f32 %v80_v63, %v282_v22  ;;  %v74_v1 = vpop.xlane.xlu2 %73 }
  0xf3   :  { %v96_v2 = vmul.f32 %v74_v1, %v282_v22 }
  0xf4   :  { %v106_v3 = vadd.f32 1e-05, %v98_v0 }
  0xf5   :  { %v104_v4 = vadd.f32 1e-05, %v96_v2 }
  0xf6   :  { %223 = vrsqrt.f32 %v106_v3  ;;  %vm138_vm2 = vweird.f32 %v106_v3 }
  0xf7   :  { %225 = vrsqrt.f32 %v104_v4  ;;  %vm118_vm6 = vweird.f32 %v104_v4 }
  0xf9   :  { %v89_v5 = vpop.xlane.xlu1 %88 }
  0xfa   :  { %v101_v6 = vmul.f32 %v89_v5, %v282_v22  ;;  %v83_v7 = vpop.xlane.xlu2 %82  ;;  %v77_v8 = vpop.xlane.xlu0 %76 }
  0xfb   :  { %v99_v9 = vmul.f32 %v83_v7, %v282_v22  ;;  %v97_v10 = vmul.f32 %v77_v8, %v282_v22 }
  0xfc   :  { %v224_v11 = vpop.eup %223  ;;  %v109_v12 = vadd.f32 1e-05, %v101_v6 }
  0xfd   :  { %v226_v13 = vpop.eup %225  ;;  %v133_v14 = vmul.f32 %v224_v11, %v106_v3  ;;  %v337_v15 = vadd.f32 1e-05, %v99_v9  ;;  %v339_v16 = vadd.f32 1e-05, %v97_v10  ;;  %vm139_vm3 = vweird.f32 %v224_v11 }
  0xfe   :  { %v113_v17 = vmul.f32 %v226_v13, %v104_v4  ;;  %227 = vrsqrt.f32 %v109_v12  ;;  %vm119_vm4 = vweird.f32 %v226_v13  ;;  %vm140_vm5 = vmor %vm138_vm2, %vm139_vm3  ;;  %vm168_vm8 = vweird.f32 %v109_v12 }
  0xff   :  { %v134_v18 = vmul.f32 %v224_v11, %v133_v14  ;;  %229 = vrsqrt.f32 %v337_v15  ;;  %vm120_vm7 = vmor %vm118_vm6, %vm119_vm4  ;;  %vm148_vm11 = vweird.f32 %v337_v15  ;;  %vm128_vm15 = vweird.f32 %v339_v16 }
 0x100   :  { %v114_v19 = vmul.f32 %v226_v13, %v113_v17  ;;  %231 = vrsqrt.f32 %v339_v16 }
 0x101   :  { %v135_v20 = vmul.f32 0.5, %v134_v18 }
 0x102   :  { %v115_v21 = vmul.f32 0.5, %v114_v19  ;;  %v92_v23 = vpop.xlane.xlu2 %91  ;;  %v86_v24 = vpop.xlane.xlu0 %85 }
 0x103   :  { %v136_v25 = vsub.f32 1.5, %v135_v20  ;;  %v102_v26 = vmul.f32 %v92_v23, %v282_v22  ;;  %v100_v27 = vmul.f32 %v86_v24, %v282_v22 }
 0x104   :  { %v228_v30 = vpop.eup %227  ;;  %v116_v31 = vsub.f32 1.5, %v115_v21 }
 0x105   :  { %v230_v32 = vpop.eup %229  ;;  %v137_v33 = vmul.f32 %v224_v11, %v136_v25  ;;  %v163_v34 = vmul.f32 %v228_v30, %v109_v12  ;;  %v345_v35 = vadd.f32 1e-05, %v102_v26  ;;  %v349_v39 = vadd.f32 1e-05, %v100_v27 }
 0x106   :  { %v232_v36 = vpop.eup %231  ;;  %v117_v37 = vmul.f32 %v226_v13, %v116_v31  ;;  %v143_v38 = vmul.f32 %v230_v32, %v337_v15  ;;  %vm169_vm9 = vweird.f32 %v228_v30  ;;  %vm149_vm12 = vweird.f32 %v230_v32 }
 0x107   :  { %v141_v40 = vsel %vm140_vm5, %v224_v11, %v137_v33  ;;  %v164_v44 = vmul.f32 %v228_v30, %v163_v34  ;;  %v123_v45 = vmul.f32 %v232_v36, %v339_v16  ;;  %233 = vrsqrt.f32 %v345_v35  ;;  %vm362_vm10 = vmor %vm168_vm8, %vm169_vm9 }
 0x108   :  { %v194_v47 = vmul.f32 %v141_v40, %v286_v28  ;;  %v121_v48 = vsel %vm120_vm7, %v226_v13, %v117_v37  ;;  %v144_v49 = vmul.f32 %v230_v32, %v143_v38  ;;  %235 = vrsqrt.f32 %v349_v39  ;;  %vm150_vm14 = vmor %vm148_vm11, %vm149_vm12 }
 0x109   :  { %v192_v50 = vmul.f32 %v121_v48, %v288_v29  ;;  %v165_v51 = vmul.f32 0.5, %v164_v44  ;;  %v124_v52 = vmul.f32 %v232_v36, %v123_v45  ;;  %vm129_vm13 = vweird.f32 %v232_v36 }
 0x10a   :  { %v202_v53 = vmax.f32 %v194_v47, 0.0  ;;  %v145_v54 = vmul.f32 0.5, %v144_v49  ;;  %v95_v55 = vpop.xlane.xlu0 %94  ;;  %vm130_vm1 = vmor %vm128_vm15, %vm129_vm13  ;;  %vm178_vm2 = vweird.f32 %v345_v35  ;;  %vm158_vm6 = vweird.f32 %v349_v39 }
 0x10b   :  { %v200_v58 = vmax.f32 %v192_v50, 0.0  ;;  %v166_v59 = vsub.f32 1.5, %v165_v51  ;;  %v125_v60 = vmul.f32 0.5, %v124_v52  ;;  %v103_v61 = vmul.f32 %v95_v55, %v282_v22 }
 0x10c   :  { %210 = vst.msk [vmem:[%s409_s1 + $0x10] sm:$0xff] %vm16_vm0, %v202_v53  ;;  %v146_v29 = vsub.f32 1.5, %v145_v54 }
 0x10d   :  { %208 = vst.msk [vmem:[%s409_s1] sm:$0xff] %vm16_vm0, %v200_v58  ;;  %v167_v22 = vmul.f32 %v228_v30, %v166_v59  ;;  %v126_v62 = vsub.f32 1.5, %v125_v60  ;;  %v111_v63 = vadd.f32 1e-05, %v103_v61  ;;  %v234_v0 = vpop.eup %233 }
 0x10e   :  { %v147_v1 = vmul.f32 %v230_v32, %v146_v29  ;;  %v173_v4 = vmul.f32 %v234_v0, %v345_v35  ;;  %v236_v5 = vpop.eup %235  ;;  %vm179_vm3 = vweird.f32 %v234_v0 }
 0x10f   :  { %v171_v2 = vsel %vm362_vm10, %v228_v30, %v167_v22  ;;  %v127_v3 = vmul.f32 %v232_v36, %v126_v62  ;;  %237 = vrsqrt.f32 %v111_v63  ;;  %v153_v11 = vmul.f32 %v236_v5, %v349_v39  ;;  %vm180_vm5 = vmor %vm178_vm2, %vm179_vm3 }
 0x110   :  { %v197_v6 = vmul.f32 %v171_v2, %v300_v41  ;;  %v151_v7 = vsel %vm150_vm14, %v230_v32, %v147_v1  ;;  %v174_v10 = vmul.f32 %v234_v0, %v173_v4  ;;  %vm159_vm4 = vweird.f32 %v236_v5 }
 0x111   :  { %v195_v8 = vmul.f32 %v151_v7, %v302_v42  ;;  %v131_v9 = vsel %vm130_vm1, %v232_v36, %v127_v3  ;;  %v154_v16 = vmul.f32 %v236_v5, %v153_v11  ;;  %vm160_vm7 = vmor %vm158_vm6, %vm159_vm4  ;;  %vm188_vm9 = vweird.f32 %v111_v63 }
 0x112   :  { %v205_v12 = vmax.f32 %v197_v6, 0.0  ;;  %v193_v13 = vmul.f32 %v131_v9, %v304_v43  ;;  %v175_v15 = vmul.f32 0.5, %v174_v10 }
 0x113   :  { %v203_v14 = vmax.f32 %v195_v8, 0.0  ;;  %v155_v17 = vmul.f32 0.5, %v154_v16 }
 0x114   :  { %213 = vst.msk [vmem:[%s409_s1 + $0x28] sm:$0xff] %vm16_vm0, %v205_v12  ;;  %v201_v41 = vmax.f32 %v193_v13, 0.0  ;;  %v176_v42 = vsub.f32 1.5, %v175_v15 }
 0x115   :  { %211 = vst.msk [vmem:[%s409_s1 + $0x18] sm:$0xff] %vm16_vm0, %v203_v14  ;;  %v238_v43 = vpop.eup %237  ;;  %v156_v19 = vsub.f32 1.5, %v155_v17 }
 0x116   :  { %209 = vst.msk [vmem:[%s409_s1 + $0x8] sm:$0xff] %vm16_vm0, %v201_v41  ;;  %v177_v18 = vmul.f32 %v234_v0, %v176_v42  ;;  %v183_v20 = vmul.f32 %v238_v43, %v111_v63  ;;  %vm189_vm8 = vweird.f32 %v238_v43 }
 0x117   :  { %v157_v23 = vmul.f32 %v236_v5, %v156_v19  ;;  %vm190_vm10 = vmor %vm188_vm9, %vm189_vm8 }
 0x118   :  { %v181_v21 = vsel %vm180_vm5, %v234_v0, %v177_v18  ;;  %v184_v24 = vmul.f32 %v238_v43, %v183_v20 }
 0x119   :  { %v198_v25 = vmul.f32 %v181_v21, %v321_v56  ;;  %v161_v26 = vsel %vm160_vm7, %v236_v5, %v157_v23 }
 0x11a   :  { %v185_v27 = vmul.f32 0.5, %v184_v24  ;;  %v196_v31 = vmul.f32 %v161_v26, %v310_v46 }
 0x11b   :  { %v206_v30 = vmax.f32 %v198_v25, 0.0 }
 0x11c   :  { %v186_v32 = vsub.f32 1.5, %v185_v27  ;;  %v204_v33 = vmax.f32 %v196_v31, 0.0 }
 0x11d   :  { %214 = vst.msk [vmem:[%s409_s1 + $0x30] sm:$0xff] %vm16_vm0, %v206_v30 }
 0x11e   :  { %v187_v34 = vmul.f32 %v238_v43, %v186_v32  ;;  %212 = vst.msk [vmem:[%s409_s1 + $0x20] sm:$0xff] %vm16_vm0, %v204_v33 }
 0x120   :  { %v191_v56 = vsel %vm190_vm10, %v238_v43, %v187_v34 }
 0x121   :  { %v199_v35 = vmul.f32 %v191_v56, %v323_v57 }
 0x123   :  { %v207_v46 = vmax.f32 %v199_v35, 0.0 }
 0x125   :  { %215 = vst.msk [vmem:[%s409_s1 + $0x38] sm:$0xff] %vm16_vm0, %v207_v46 }

// kernel: generator_forward.23
= control target key start
LH: loop header
LB: loop body
LE: loop exit
PB: predicated region body
PF: predicated region fallthrough
CT: control target
= control target key end

     0   :  { %v426_v5 = vmov 0   ;;  %vm221_vm0 = vcmask 261120   ;;  %s563_s1 = inlined_call_operand.vmem [shape: bf16[288,128], index: 1, kind: input, shape index: {}]   ;;  %s564_s0 = inlined_call_operand.vmem [shape: bf16[32,288], index: 0, kind: input, shape index: {}]   ;;  %s565_s2 = inlined_call_operand.vmem [shape: f32[32,1], index: 2, kind: input, shape index: {}]   ;;  %s566_s3 = inlined_call_operand.vmem [shape: f32[32,128], index: 3, kind: output, shape index: {}]  }
   0x1   :  { %v404_v0 = vld [vmem:[%s563_s1 + $0x38] sm:$0xff]  ;;  %v403_v2 = vld [vmem:[%s563_s1 + $0x30] sm:$0xff]  ;;  %v414_v3 = vld [vmem:[%s563_s1 + $0x88] sm:$0xff]  ;;  %424 = vset.pattern.permute.xlu0 %v426_v5  ;;  %425 = vset.pattern.permute.xlu1 %v426_v5 }
   0x2   :  { %v412_v1 = vld [vmem:[%s563_s1 + $0x78] sm:$0xff]  ;;  %228 = vmatpush.bf16.msra.mxu0 %v404_v0  ;;  %415 = vmatpush.bf16.msra.mxu3 %v404_v0  ;;  %v411_v4 = vld [vmem:[%s563_s1 + $0x70] sm:$0xff]  ;;  %v413_v6 = vld [vmem:[%s563_s1 + $0x80] sm:$0xff] }
   0x3   :  { %247 = vmatpush.bf16.msra.mxu1 %v412_v1  ;;  %272 = vmatpush.bf16.msra.mxu2 %v414_v3  ;;  %v303_v7 = vld [vmem:[%s564_s0 + $0x8] sm:$0xf]  ;;  %v393_v8 = vld [vmem:[%s564_s0 + $0x10] sm:$0xf0]  ;;  %v59_v12 = vld [vmem:[%s565_s2] sm:$0xff] }
   0x4   :  { %v402_v9 = vld [vmem:[%s563_s1 + $0x28] sm:$0xff]  ;;  %v304_v11 = vor.u32 %v393_v8, %v303_v7  ;;  %v401_v13 = vld [vmem:[%s563_s1 + $0x20] sm:$0xff]  ;;  %65 = vperm.xlu0 %424, %v59_v12   ;;  %v400_v15 = vld [vmem:[%s563_s1 + $0x18] sm:$0xff] }
   0x5   :  { %v410_v10 = vld [vmem:[%s563_s1 + $0x68] sm:$0xff]  ;;  %v409_v14 = vld [vmem:[%s563_s1 + $0x60] sm:$0xff]  ;;  %v408_v16 = vld [vmem:[%s563_s1 + $0x58] sm:$0xff] }
   0x6   :  { %229 = vmatpush.bf16.msra.mxu0 %v403_v2  ;;  %416 = vmatpush.bf16.msra.mxu3 %v403_v2  ;;  %v399_v17 = vld [vmem:[%s563_s1 + $0x10] sm:$0xff]  ;;  %v60_v19 = vld [vmem:[%s565_s2 + $0x8] sm:$0xff]  ;;  %v315_v21 = vld [vmem:[%s564_s0 + $0x20] sm:$0xf] }
   0x7   :  { %248 = vmatpush.bf16.msra.mxu1 %v411_v4  ;;  %273 = vmatpush.bf16.msra.mxu2 %v413_v6  ;;  %v61_v18 = vld [vmem:[%s565_s2 + $0x10] sm:$0xff]  ;;  %v396_v22 = vld [vmem:[%s564_s0 + $0x28] sm:$0xf0]  ;;  %v397_v26 = vld [vmem:[%s563_s1] sm:$0xff] }
   0x8   :  { %v407_v20 = vld [vmem:[%s563_s1 + $0x50] sm:$0xff]  ;;  %75 = vperm.xlu1 %425, %v61_v18   ;;  %v398_v23 = vld [vmem:[%s563_s1 + $0x8] sm:$0xff]  ;;  %v316_v25 = vor.u32 %v396_v22, %v315_v21  ;;  %v295_v27 = vld [vmem:[%s564_s0] sm:$0xf] }
   0x9   :  { %v406_v24 = vld [vmem:[%s563_s1 + $0x48] sm:$0xff]  ;;  %v62_v28 = vld [vmem:[%s565_s2 + $0x18] sm:$0xff]  ;;  %v395_v31 = vld [vmem:[%s564_s0 + $0x20] sm:$0xf0] }
   0xa   :  { %230 = vmatpush.bf16.msra.mxu0 %v402_v9  ;;  %417 = vmatpush.bf16.msra.mxu3 %v402_v9  ;;  %v392_v29 = vld [vmem:[%s564_s0 + $0x8] sm:$0xf0]  ;;  %v307_v30 = vld [vmem:[%s564_s0 + $0x18] sm:$0xf]  ;;  %v405_v32 = vld [vmem:[%s563_s1 + $0x40] sm:$0xff] }
   0xb   :  { %249 = vmatpush.bf16.msra.mxu1 %v410_v10  ;;  %389 = vmatmul.msk.bf16.vlgmr.msra.gmra.mxu2 %vm221_vm0, %v304_v11  ;;  %v391_v33 = vld [vmem:[%s564_s0 + $0x4] sm:$0xf]  ;;  %v297_v34 = vld [vmem:[%s564_s0 + $0xc] sm:$0xf0]  ;;  %v296_v35 = vor.u32 %v392_v29, %v295_v27  ;;  %v308_v36 = vor.u32 %v395_v31, %v307_v30  ;;  %v394_v38 = vld [vmem:[%s564_s0 + $0x1c] sm:$0xf] }
   0xc   :  { %70 = vperm.xlu0 %424, %v60_v19   ;;  %v300_v37 = vor.u32 %v391_v33, %v297_v34  ;;  %v309_v39 = vld [vmem:[%s564_s0 + $0x24] sm:$0xf0] }
   0xd   :  { %v312_v40 = vor.u32 %v394_v38, %v309_v39 }
   0xe   :  { %231 = vmatpush.bf16.msra.mxu0 %v401_v13  ;;  %418 = vmatpush.bf16.msra.mxu3 %v401_v13 }
   0xf   :  { %250 = vmatpush.bf16.msra.mxu1 %v409_v14 }
  0x10   :  { %80 = vperm.xlu1 %425, %v62_v28  }
  0x12   :  { %232 = vmatpush.bf16.msra.mxu0 %v400_v15  ;;  %419 = vmatpush.bf16.msra.mxu3 %v400_v15 }
  0x13   :  { %251 = vmatpush.bf16.msra.mxu1 %v408_v16 }
  0x16   :  { %233 = vmatpush.bf16.msra.mxu0 %v399_v17  ;;  %420 = vmatpush.bf16.msra.mxu3 %v399_v17 }
  0x17   :  { %252 = vmatpush.bf16.msra.mxu1 %v407_v20 }
  0x1a   :  { %234 = vmatpush.bf16.msra.mxu0 %v398_v23  ;;  %421 = vmatpush.bf16.msra.mxu3 %v398_v23 }
  0x1b   :  { %253 = vmatpush.bf16.msra.mxu1 %v406_v24  ;;  %390 = vmatmul.msk.bf16.gmra.mxu2 %vm221_vm0, %v316_v25 }
  0x1e   :  { %235 = vmatpush.bf16.msra.mxu0 %v397_v26  ;;  %422 = vmatpush.bf16.msra.mxu3 %v397_v26 }
  0x1f   :  { %254 = vmatpush.bf16.msra.mxu1 %v405_v32 }
  0x21   :  { %236 = vmatmul.bf16.vlgmr.msra.gmra.mxu0 %v296_v35  ;;  %241 = vmatmul.bf16.vlgmr.msra.gmra.mxu3 %v308_v36 }
  0x22   :  { %255 = vmatmul.bf16.vlgmr.msra.gmra.mxu1 %v300_v37 }
  0x32   :  { %260 = vmatmul.bf16.gmra.mxu1 %v312_v40 }
  0x76   :  { %v66_v41 = vpop.permute.xlu0 %65 }
  0x7a   :  { %v76_v53 = vpop.permute.xlu1 %75 }
  0x7e   :  { %v71_v48 = vpop.permute.xlu0 %70 }
  0x82   :  { %v81_v62 = vpop.permute.xlu1 %80 }
  0x8e   :  { %v275_v42 = vpop.f32.mrf.mxu2 }
  0x96   :  { %v277_v49 = vpop.f32.mrf.mxu2 }
  0x9e   :  { %v237_v43 = vpop.f32.mrf.mxu0  ;;  %v280_v58 = vpop.f32.mrf.mxu2 }
  0x9f   :  { %v238_v44 = vadd.f32 %v237_v43, %v66_v41  ;;  %v256_v45 = vpop.f32.mrf.mxu1 }
  0xa1   :  { %v257_v46 = vadd.f32 %v256_v45, %v238_v44 }
  0xa3   :  { %v276_v47 = vadd.f32 %v275_v42, %v257_v46 }
  0xa4   :  { %v242_v54 = vpop.f32.mrf.mxu3 }
  0xa5   :  { %285 = vst [vmem:[%s566_s3] sm:$0xff] %v276_v47  ;;  %v243_v57 = vadd.f32 %v242_v54, %v76_v53 }
  0xa6   :  { %v239_v50 = vpop.f32.mrf.mxu0  ;;  %v282_v3 = vpop.f32.mrf.mxu2 }
  0xa7   :  { %v240_v51 = vadd.f32 %v239_v50, %v71_v48  ;;  %v258_v52 = vpop.f32.mrf.mxu1 }
  0xa9   :  { %v259_v55 = vadd.f32 %v258_v52, %v240_v51 }
  0xab   :  { %v278_v56 = vadd.f32 %v277_v49, %v259_v55 }
  0xac   :  { %v244_v63 = vpop.f32.mrf.mxu3 }
  0xad   :  { %286 = vst [vmem:[%s566_s3 + $0x8] sm:$0xff] %v278_v56  ;;  %v245_v0 = vadd.f32 %v244_v63, %v81_v62 }
  0xaf   :  { %v261_v59 = vpop.f32.mrf.mxu1 }
  0xb0   :  { %v262_v60 = vadd.f32 %v261_v59, %v243_v57 }
  0xb2   :  { %v281_v61 = vadd.f32 %v280_v58, %v262_v60 }
  0xb4   :  { %287 = vst [vmem:[%s566_s3 + $0x10] sm:$0xff] %v281_v61 }
  0xb7   :  { %v263_v1 = vpop.f32.mrf.mxu1 }
  0xb8   :  { %v264_v2 = vadd.f32 %v263_v1, %v245_v0 }
  0xba   :  { %v283_v4 = vadd.f32 %v282_v3, %v264_v2 }
  0xbc   :  { %288 = vst [vmem:[%s566_s3 + $0x18] sm:$0xff] %v283_v4 }

// kernel: generator_forward.26
= control target key start
LH: loop header
LB: loop body
LE: loop exit
PB: predicated region body
PF: predicated region fallthrough
CT: control target
= control target key end

     0   :  { %vm19_vm0 = vcmask 523264   ;;  %v250_v16 = vmov 64.0   ;;  %s448_s0 = inlined_call_operand.vmem [shape: f32[64,64], index: 0, kind: input, shape index: {}]   ;;  %s449_s1 = inlined_call_operand.vmem [shape: f32[64,64], index: 1, kind: input, shape index: {}, may-alias: {1,2}]   ;;  %s450_s2 = inlined_call_operand.vmem [shape: f32[64,64], index: 2, kind: output, shape index: {}, may-alias: {1,2}]  }
   0x1   :  { %v15_v0 = vld [vmem:[%s448_s0 + $0x20] sm:$0xff]  ;;  %v13_v1 = vld [vmem:[%s448_s0 + $0x10] sm:$0xff]  ;;  %v16_v6 = vld [vmem:[%s448_s0 + $0x28] sm:$0xff]  ;;  %232 = vrcp.f32 %v250_v16 }
   0x2   :  { %v11_v2 = vld [vmem:[%s448_s0] sm:$0xff]  ;;  %v32_v3 = vsel %vm19_vm0, %v15_v0, 0.0  ;;  %v26_v4 = vsel %vm19_vm0, %v13_v1, 0.0  ;;  %v14_v7 = vld [vmem:[%s448_s0 + $0x18] sm:$0xff]  ;;  %v12_v8 = vld [vmem:[%s448_s0 + $0x8] sm:$0xff]  ;;  %v35_v9 = vsel %vm19_vm0, %v16_v6, 0.0 }
   0x3   :  { %v20_v5 = vsel %vm19_vm0, %v11_v2, 0.0  ;;  %33 = vadd.xlane.f32.xlu2 %v32_v3  ;;  %27 = vadd.xlane.f32.xlu1 %v26_v4  ;;  %v29_v10 = vsel %vm19_vm0, %v14_v7, 0.0  ;;  %v23_v11 = vsel %vm19_vm0, %v12_v8, 0.0  ;;  %v18_v12 = vld [vmem:[%s448_s0 + $0x38] sm:$0xff]  ;;  %v17_v13 = vld [vmem:[%s448_s0 + $0x30] sm:$0xff] }
   0x4   :  { %21 = vadd.xlane.f32.xlu0 %v20_v5  ;;  %v41_v14 = vsel %vm19_vm0, %v18_v12, 0.0  ;;  %v38_v15 = vsel %vm19_vm0, %v17_v13, 0.0 }
   0x7   :  { %v233_v17 = vpop.eup %232 }
   0x8   :  { %v45_v18 = vmul.f32 64.0, %v233_v17  ;;  %vm49_vm1 = vweird.f32 %v233_v17 }
   0xa   :  { %v46_v19 = vsub.f32 1.0, %v45_v18 }
   0xb   :  { %36 = vadd.xlane.f32.xlu2 %v35_v9  ;;  %30 = vadd.xlane.f32.xlu1 %v29_v10 }
   0xc   :  { %24 = vadd.xlane.f32.xlu0 %v23_v11  ;;  %v47_v20 = vmul.f32 %v233_v17, %v46_v19 }
   0xe   :  { %v48_v21 = vadd.f32 %v233_v17, %v47_v20 }
  0x10   :  { %v298_v22 = vsel %vm49_vm1, %v233_v17, %v48_v21 }
  0x13   :  { %42 = vadd.xlane.f32.xlu1 %v41_v14 }
  0x14   :  { %39 = vadd.xlane.f32.xlu0 %v38_v15 }
  0x76   :  { %v34_v23 = vpop.xlane.xlu2 %33  ;;  %v28_v24 = vpop.xlane.xlu1 %27 }
  0x77   :  { %v53_v25 = vmul.f32 %v298_v22, %v28_v24  ;;  %v22_v26 = vpop.xlane.xlu0 %21  ;;  %v55_v39 = vmul.f32 %v298_v22, %v34_v23 }
  0x78   :  { %v51_v27 = vmul.f32 %v298_v22, %v22_v26 }
  0x79   :  { %v302_v28 = vsub.f32 %v13_v1, %v53_v25  ;;  %v326_v46 = vsub.f32 %v15_v0, %v55_v39 }
  0x7a   :  { %v304_v29 = vsub.f32 %v11_v2, %v51_v27 }
  0x7b   :  { %v69_v30 = vmul.f32 %v302_v28, %v302_v28  ;;  %v71_v55 = vmul.f32 %v326_v46, %v326_v46 }
  0x7c   :  { %v67_v31 = vmul.f32 %v304_v29, %v304_v29 }
  0x7d   :  { %v81_v32 = vsel %vm19_vm0, %v69_v30, 0.0  ;;  %v87_v58 = vsel %vm19_vm0, %v71_v55, 0.0 }
  0x7e   :  { %v37_v33 = vpop.xlane.xlu2 %36  ;;  %82 = vadd.xlane.f32.xlu1 %v81_v32  ;;  %v31_v34 = vpop.xlane.xlu1 %30  ;;  %v75_v35 = vsel %vm19_vm0, %v67_v31, 0.0 }
  0x7f   :  { %v56_v36 = vmul.f32 %v298_v22, %v37_v33  ;;  %v54_v37 = vmul.f32 %v298_v22, %v31_v34  ;;  %76 = vadd.xlane.f32.xlu2 %v75_v35  ;;  %v25_v38 = vpop.xlane.xlu0 %24 }
  0x80   :  { %v52_v40 = vmul.f32 %v298_v22, %v25_v38 }
  0x81   :  { %v316_v41 = vsub.f32 %v16_v6, %v56_v36  ;;  %v318_v42 = vsub.f32 %v14_v7, %v54_v37 }
  0x82   :  { %v320_v43 = vsub.f32 %v12_v8, %v52_v40  ;;  %v205_v40 = vld [vmem:[%s449_s1 + $0x10] sm:$0xff] }
  0x83   :  { %v72_v44 = vmul.f32 %v316_v41, %v316_v41  ;;  %v70_v45 = vmul.f32 %v318_v42, %v318_v42 }
  0x84   :  { %v68_v47 = vmul.f32 %v320_v43, %v320_v43 }
  0x85   :  { %v90_v48 = vsel %vm19_vm0, %v72_v44, 0.0  ;;  %v84_v49 = vsel %vm19_vm0, %v70_v45, 0.0 }
  0x86   :  { %91 = vadd.xlane.f32.xlu1 %v90_v48  ;;  %v78_v50 = vsel %vm19_vm0, %v68_v47, 0.0  ;;  %v43_v51 = vpop.xlane.xlu1 %42 }
  0x87   :  { %85 = vadd.xlane.f32.xlu2 %v84_v49  ;;  %79 = vadd.xlane.f32.xlu0 %v78_v50  ;;  %v40_v52 = vpop.xlane.xlu0 %39  ;;  %v58_v54 = vmul.f32 %v298_v22, %v43_v51  ;;  %v203_v49 = vld [vmem:[%s449_s1] sm:$0xff] }
  0x88   :  { %v57_v53 = vmul.f32 %v298_v22, %v40_v52 }
  0x89   :  { %v339_v57 = vsub.f32 %v18_v12, %v58_v54 }
  0x8a   :  { %v337_v56 = vsub.f32 %v17_v13, %v57_v53 }
  0x8b   :  { %v74_v61 = vmul.f32 %v339_v57, %v339_v57 }
  0x8c   :  { %v73_v59 = vmul.f32 %v337_v56, %v337_v56 }
  0x8d   :  { %v96_v62 = vsel %vm19_vm0, %v74_v61, 0.0 }
  0x8e   :  { %v93_v60 = vsel %vm19_vm0, %v73_v59, 0.0 }
  0x8f   :  { %88 = vadd.xlane.f32.xlu0 %v87_v58  ;;  %94 = vadd.xlane.f32.xlu2 %v93_v60 }
  0x97   :  { %97 = vadd.xlane.f32.xlu0 %v96_v62 }
  0xf1   :  { %v83_v63 = vpop.xlane.xlu1 %82 }
  0xf2   :  { %v101_v0 = vmul.f32 %v83_v63, %v298_v22  ;;  %v77_v1 = vpop.xlane.xlu2 %76 }
  0xf3   :  { %v99_v2 = vmul.f32 %v77_v1, %v298_v22 }
  0xf4   :  { %v109_v3 = vadd.f32 1e-05, %v101_v0 }
  0xf5   :  { %v107_v4 = vadd.f32 1e-05, %v99_v2 }
  0xf6   :  { %234 = vrsqrt.f32 %v109_v3  ;;  %vm141_vm2 = vweird.f32 %v109_v3 }
  0xf7   :  { %236 = vrsqrt.f32 %v107_v4  ;;  %vm121_vm6 = vweird.f32 %v107_v4 }
  0xf9   :  { %v92_v5 = vpop.xlane.xlu1 %91 }
  0xfa   :  { %v104_v6 = vmul.f32 %v92_v5, %v298_v22  ;;  %v86_v7 = vpop.xlane.xlu2 %85  ;;  %v80_v8 = vpop.xlane.xlu0 %79 }
  0xfb   :  { %v102_v9 = vmul.f32 %v86_v7, %v298_v22  ;;  %v100_v10 = vmul.f32 %v80_v8, %v298_v22 }
  0xfc   :  { %v235_v11 = vpop.eup %234  ;;  %v112_v12 = vadd.f32 1e-05, %v104_v6 }
  0xfd   :  { %v237_v13 = vpop.eup %236  ;;  %v136_v14 = vmul.f32 %v235_v11, %v109_v3  ;;  %v353_v15 = vadd.f32 1e-05, %v102_v9  ;;  %v355_v16 = vadd.f32 1e-05, %v100_v10  ;;  %vm142_vm3 = vweird.f32 %v235_v11 }
  0xfe   :  { %v116_v17 = vmul.f32 %v237_v13, %v107_v4  ;;  %238 = vrsqrt.f32 %v112_v12  ;;  %vm122_vm4 = vweird.f32 %v237_v13  ;;  %vm143_vm5 = vmor %vm141_vm2, %vm142_vm3  ;;  %vm171_vm8 = vweird.f32 %v112_v12 }
  0xff   :  { %v137_v18 = vmul.f32 %v235_v11, %v136_v14  ;;  %240 = vrsqrt.f32 %v353_v15  ;;  %vm123_vm7 = vmor %vm121_vm6, %vm122_vm4  ;;  %vm151_vm11 = vweird.f32 %v353_v15  ;;  %vm131_vm15 = vweird.f32 %v355_v16 }
 0x100   :  { %v117_v19 = vmul.f32 %v237_v13, %v116_v17  ;;  %242 = vrsqrt.f32 %v355_v16 }
 0x101   :  { %v138_v20 = vmul.f32 0.5, %v137_v18 }
 0x102   :  { %v118_v21 = vmul.f32 0.5, %v117_v19  ;;  %v95_v23 = vpop.xlane.xlu2 %94  ;;  %v89_v24 = vpop.xlane.xlu0 %88 }
 0x103   :  { %v139_v25 = vsub.f32 1.5, %v138_v20  ;;  %v105_v26 = vmul.f32 %v95_v23, %v298_v22  ;;  %v103_v27 = vmul.f32 %v89_v24, %v298_v22 }
 0x104   :  { %v239_v30 = vpop.eup %238  ;;  %v119_v31 = vsub.f32 1.5, %v118_v21 }
 0x105   :  { %v241_v32 = vpop.eup %240  ;;  %v140_v33 = vmul.f32 %v235_v11, %v139_v25  ;;  %v166_v34 = vmul.f32 %v239_v30, %v112_v12  ;;  %v361_v35 = vadd.f32 1e-05, %v105_v26  ;;  %v365_v39 = vadd.f32 1e-05, %v103_v27 }
 0x106   :  { %v243_v36 = vpop.eup %242  ;;  %v120_v37 = vmul.f32 %v237_v13, %v119_v31  ;;  %v146_v38 = vmul.f32 %v241_v32, %v353_v15  ;;  %vm172_vm9 = vweird.f32 %v239_v30  ;;  %vm152_vm12 = vweird.f32 %v241_v32 }
 0x107   :  { %v144_v44 = vsel %vm143_vm5, %v235_v11, %v140_v33  ;;  %v167_v45 = vmul.f32 %v239_v30, %v166_v34  ;;  %v126_v47 = vmul.f32 %v243_v36, %v355_v16  ;;  %244 = vrsqrt.f32 %v361_v35  ;;  %vm384_vm10 = vmor %vm171_vm8, %vm172_vm9 }
 0x108   :  { %v197_v48 = vmul.f32 %v144_v44, %v302_v28  ;;  %v124_v50 = vsel %vm123_vm7, %v237_v13, %v120_v37  ;;  %v147_v51 = vmul.f32 %v241_v32, %v146_v38  ;;  %246 = vrsqrt.f32 %v365_v39  ;;  %vm153_vm14 = vmor %vm151_vm11, %vm152_vm12 }
 0x109   :  { %v195_v52 = vmul.f32 %v124_v50, %v304_v29  ;;  %v168_v53 = vmul.f32 0.5, %v167_v45  ;;  %v127_v54 = vmul.f32 %v243_v36, %v126_v47  ;;  %vm132_vm13 = vweird.f32 %v243_v36 }
 0x10a   :  { %v213_v55 = vadd.f32 %v205_v40, %v197_v48  ;;  %v148_v58 = vmul.f32 0.5, %v147_v51  ;;  %v98_v59 = vpop.xlane.xlu0 %97  ;;  %vm133_vm1 = vmor %vm131_vm15, %vm132_vm13  ;;  %vm181_vm2 = vweird.f32 %v361_v35  ;;  %vm161_vm6 = vweird.f32 %v365_v39 }
 0x10b   :  { %v211_v60 = vadd.f32 %v203_v49, %v195_v52  ;;  %v169_v28 = vsub.f32 1.5, %v168_v53  ;;  %v128_v61 = vmul.f32 0.5, %v127_v54  ;;  %v106_v62 = vmul.f32 %v98_v59, %v298_v22 }
 0x10c   :  { %221 = vst.msk [vmem:[%s450_s2 + $0x10] sm:$0xff] %vm19_vm0, %v213_v55  ;;  %v149_v63 = vsub.f32 1.5, %v148_v58 }
 0x10d   :  { %219 = vst.msk [vmem:[%s450_s2] sm:$0xff] %vm19_vm0, %v211_v60  ;;  %v170_v22 = vmul.f32 %v239_v30, %v169_v28  ;;  %v129_v0 = vsub.f32 1.5, %v128_v61  ;;  %v114_v1 = vadd.f32 1e-05, %v106_v62  ;;  %v245_v2 = vpop.eup %244 }
 0x10e   :  { %v150_v3 = vmul.f32 %v241_v32, %v149_v63  ;;  %v176_v7 = vmul.f32 %v245_v2, %v361_v35  ;;  %v247_v8 = vpop.eup %246  ;;  %vm182_vm3 = vweird.f32 %v245_v2 }
 0x10f   :  { %v174_v5 = vsel %vm384_vm10, %v239_v30, %v170_v22  ;;  %v130_v6 = vmul.f32 %v243_v36, %v129_v0  ;;  %248 = vrsqrt.f32 %v114_v1  ;;  %v156_v16 = vmul.f32 %v247_v8, %v365_v39  ;;  %vm183_vm5 = vmor %vm181_vm2, %vm182_vm3 }
 0x110   :  { %v200_v9 = vmul.f32 %v174_v5, %v316_v41  ;;  %v154_v11 = vsel %vm153_vm14, %v241_v32, %v150_v3  ;;  %v177_v15 = vmul.f32 %v245_v2, %v176_v7  ;;  %vm162_vm4 = vweird.f32 %v247_v8 }
 0x111   :  { %v198_v12 = vmul.f32 %v154_v11, %v318_v42  ;;  %v134_v14 = vsel %vm133_vm1, %v243_v36, %v130_v6  ;;  %v157_v20 = vmul.f32 %v247_v8, %v156_v16  ;;  %vm163_vm7 = vmor %vm161_vm6, %vm162_vm4  ;;  %vm191_vm9 = vweird.f32 %v114_v1 }
 0x112   :  { %v196_v41 = vmul.f32 %v134_v14, %v320_v43  ;;  %v178_v19 = vmul.f32 0.5, %v177_v15 }
 0x113   :  { %v158_v23 = vmul.f32 0.5, %v157_v20 }
 0x114   :  { %v208_v4 = vld [vmem:[%s449_s1 + $0x28] sm:$0xff]  ;;  %v206_v10 = vld [vmem:[%s449_s1 + $0x18] sm:$0xff]  ;;  %v179_v21 = vsub.f32 1.5, %v178_v19 }
 0x115   :  { %v204_v13 = vld [vmem:[%s449_s1 + $0x8] sm:$0xff]  ;;  %v216_v17 = vadd.f32 %v208_v4, %v200_v9  ;;  %v214_v18 = vadd.f32 %v206_v10, %v198_v12  ;;  %v249_v43 = vpop.eup %248  ;;  %v159_v25 = vsub.f32 1.5, %v158_v23 }
 0x116   :  { %v212_v42 = vadd.f32 %v204_v13, %v196_v41  ;;  %v180_v24 = vmul.f32 %v245_v2, %v179_v21  ;;  %v186_v26 = vmul.f32 %v249_v43, %v114_v1  ;;  %vm192_vm8 = vweird.f32 %v249_v43 }
 0x117   :  { %224 = vst.msk [vmem:[%s450_s2 + $0x28] sm:$0xff] %vm19_vm0, %v216_v17  ;;  %v160_v31 = vmul.f32 %v247_v8, %v159_v25  ;;  %vm193_vm10 = vmor %vm191_vm9, %vm192_vm8 }
 0x118   :  { %222 = vst.msk [vmem:[%s450_s2 + $0x18] sm:$0xff] %vm19_vm0, %v214_v18  ;;  %v184_v30 = vsel %vm183_vm5, %v245_v2, %v180_v24  ;;  %v187_v32 = vmul.f32 %v249_v43, %v186_v26 }
 0x119   :  { %220 = vst.msk [vmem:[%s450_s2 + $0x8] sm:$0xff] %vm19_vm0, %v212_v42  ;;  %v201_v33 = vmul.f32 %v184_v30, %v337_v56  ;;  %v164_v35 = vsel %vm163_vm7, %v247_v8, %v160_v31 }
 0x11a   :  { %v188_v36 = vmul.f32 0.5, %v187_v32  ;;  %v199_v38 = vmul.f32 %v164_v35, %v326_v46 }
 0x11c   :  { %v189_v40 = vsub.f32 1.5, %v188_v36 }
 0x11e   :  { %v190_v44 = vmul.f32 %v249_v43, %v189_v40 }
 0x120   :  { %v209_v27 = vld [vmem:[%s449_s1 + $0x30] sm:$0xff]  ;;  %v207_v34 = vld [vmem:[%s449_s1 + $0x20] sm:$0xff]  ;;  %v194_v56 = vsel %vm193_vm10, %v249_v43, %v190_v44 }
 0x121   :  { %v217_v37 = vadd.f32 %v209_v27, %v201_v33  ;;  %v215_v39 = vadd.f32 %v207_v34, %v199_v38  ;;  %v202_v45 = vmul.f32 %v194_v56, %v339_v57 }
 0x123   :  { %225 = vst.msk [vmem:[%s450_s2 + $0x30] sm:$0xff] %vm19_vm0, %v217_v37 }
 0x124   :  { %223 = vst.msk [vmem:[%s450_s2 + $0x20] sm:$0xff] %vm19_vm0, %v215_v39 }
 0x12b   :  { %v210_v46 = vld [vmem:[%s449_s1 + $0x38] sm:$0xff] }
 0x12c   :  { %v218_v47 = vadd.f32 %v210_v46, %v202_v45 }
 0x12e   :  { %226 = vst.msk [vmem:[%s450_s2 + $0x38] sm:$0xff] %vm19_vm0, %v218_v47 }

// kernel: generator_forward.31
= control target key start
LH: loop header
LB: loop body
LE: loop exit
PB: predicated region body
PF: predicated region fallthrough
CT: control target
= control target key end

     0   :  { %v287_v1 = vmov 0   ;;  %s392_s1 = inlined_call_operand.vmem [shape: bf16[128,128], index: 1, kind: input, shape index: {}]   ;;  %s393_s2 = inlined_call_operand.vmem [shape: f32[64,1], index: 2, kind: input, shape index: {}]   ;;  %s394_s0 = inlined_call_operand.vmem [shape: bf16[64,128], index: 0, kind: input, shape index: {}]   ;;  %s395_s3 = inlined_call_operand.vmem [shape: f32[64,128], index: 3, kind: output, shape index: {}]  }
   0x1   :  { %v258_v0 = vld [vmem:[%s392_s1 + $0x38] sm:$0xff]  ;;  %285 = vset.pattern.permute.xlu1 %v287_v1  ;;  %284 = vset.pattern.permute.xlu0 %v287_v1  ;;  %v257_v2 = vld [vmem:[%s392_s1 + $0x30] sm:$0xff]  ;;  %v38_v4 = vld [vmem:[%s393_s2] sm:$0xff] }
   0x2   :  { %286 = vset.pattern.permute.xlu2 %v287_v1  ;;  %158 = vmatpush.bf16.msra.mxu0 %v258_v0  ;;  %v40_v3 = vld [vmem:[%s393_s2 + $0x10] sm:$0xff]  ;;  %v256_v5 = vld [vmem:[%s392_s1 + $0x28] sm:$0xff]  ;;  %v42_v6 = vld [vmem:[%s393_s2 + $0x20] sm:$0xff] }
   0x3   :  { %259 = vmatpush.bf16.msra.mxu1 %v258_v0  ;;  %260 = vmatpush.bf16.msra.mxu2 %v258_v0  ;;  %v41_v7 = vld [vmem:[%s393_s2 + $0x18] sm:$0xff]  ;;  %v39_v8 = vld [vmem:[%s393_s2 + $0x8] sm:$0xff]  ;;  %v255_v9 = vld [vmem:[%s392_s1 + $0x20] sm:$0xff] }
   0x4   :  { %261 = vmatpush.bf16.msra.mxu3 %v258_v0  ;;  %58 = vperm.xlu1 %285, %v40_v3   ;;  %v43_v10 = vld [vmem:[%s393_s2 + $0x28] sm:$0xff]  ;;  %v254_v11 = vld [vmem:[%s392_s1 + $0x18] sm:$0xff]  ;;  %v44_v13 = vld [vmem:[%s393_s2 + $0x30] sm:$0xff] }
   0x5   :  { %48 = vperm.xlu0 %284, %v38_v4   ;;  %68 = vperm.xlu2 %286, %v42_v6   ;;  %v45_v12 = vld [vmem:[%s393_s2 + $0x38] sm:$0xff]  ;;  %v253_v14 = vld [vmem:[%s392_s1 + $0x10] sm:$0xff]  ;;  %v252_v15 = vld [vmem:[%s392_s1 + $0x8] sm:$0xff] }
   0x6   :  { %159 = vmatpush.bf16.msra.mxu0 %v257_v2  ;;  %v251_v16 = vld [vmem:[%s392_s1] sm:$0xff]  ;;  %v248_v18 = vld [vmem:[%s394_s0 + $0x8] sm:$0xff]  ;;  %v249_v19 = vld [vmem:[%s394_s0 + $0x10] sm:$0xff] }
   0x7   :  { %262 = vmatpush.bf16.msra.mxu1 %v257_v2  ;;  %263 = vmatpush.bf16.msra.mxu2 %v257_v2  ;;  %v247_v17 = vld [vmem:[%s394_s0] sm:$0xff]  ;;  %v250_v20 = vld [vmem:[%s394_s0 + $0x18] sm:$0xff] }
   0x8   :  { %264 = vmatpush.bf16.msra.mxu3 %v257_v2 }
   0xa   :  { %160 = vmatpush.bf16.msra.mxu0 %v256_v5 }
   0xb   :  { %265 = vmatpush.bf16.msra.mxu1 %v256_v5  ;;  %266 = vmatpush.bf16.msra.mxu2 %v256_v5 }
   0xc   :  { %267 = vmatpush.bf16.msra.mxu3 %v256_v5  ;;  %63 = vperm.xlu1 %285, %v41_v7  }
   0xd   :  { %53 = vperm.xlu0 %284, %v39_v8   ;;  %73 = vperm.xlu2 %286, %v43_v10  }
   0xe   :  { %161 = vmatpush.bf16.msra.mxu0 %v255_v9 }
   0xf   :  { %268 = vmatpush.bf16.msra.mxu1 %v255_v9  ;;  %269 = vmatpush.bf16.msra.mxu2 %v255_v9 }
  0x10   :  { %270 = vmatpush.bf16.msra.mxu3 %v255_v9 }
  0x12   :  { %162 = vmatpush.bf16.msra.mxu0 %v254_v11 }
  0x13   :  { %271 = vmatpush.bf16.msra.mxu1 %v254_v11  ;;  %272 = vmatpush.bf16.msra.mxu2 %v254_v11 }
  0x14   :  { %273 = vmatpush.bf16.msra.mxu3 %v254_v11  ;;  %83 = vperm.xlu1 %285, %v45_v12  }
  0x15   :  { %78 = vperm.xlu0 %284, %v44_v13  }
  0x16   :  { %163 = vmatpush.bf16.msra.mxu0 %v253_v14 }
  0x17   :  { %274 = vmatpush.bf16.msra.mxu1 %v253_v14  ;;  %275 = vmatpush.bf16.msra.mxu2 %v253_v14 }
  0x18   :  { %276 = vmatpush.bf16.msra.mxu3 %v253_v14 }
  0x1a   :  { %164 = vmatpush.bf16.msra.mxu0 %v252_v15 }
  0x1b   :  { %277 = vmatpush.bf16.msra.mxu1 %v252_v15  ;;  %278 = vmatpush.bf16.msra.mxu2 %v252_v15 }
  0x1c   :  { %279 = vmatpush.bf16.msra.mxu3 %v252_v15 }
  0x1e   :  { %165 = vmatpush.bf16.msra.mxu0 %v251_v16 }
  0x1f   :  { %280 = vmatpush.bf16.msra.mxu1 %v251_v16  ;;  %281 = vmatpush.bf16.msra.mxu2 %v251_v16 }
  0x20   :  { %282 = vmatpush.bf16.msra.mxu3 %v251_v16 }
  0x21   :  { %166 = vmatmul.bf16.vlgmr.msra.gmra.mxu0 %v247_v17 }
  0x22   :  { %171 = vmatmul.bf16.vlgmr.msra.gmra.mxu1 %v248_v18  ;;  %176 = vmatmul.bf16.vlgmr.msra.gmra.mxu2 %v249_v19 }
  0x23   :  { %181 = vmatmul.bf16.vlgmr.msra.gmra.mxu3 %v250_v20 }
  0x5f   :  { %v69_v29 = vpop.permute.xlu2 %68 }
  0x67   :  { %v74_v40 = vpop.permute.xlu2 %73 }
  0x76   :  { %v59_v22 = vpop.permute.xlu1 %58 }
  0x77   :  { %v49_v21 = vpop.permute.xlu0 %48 }
  0x7e   :  { %v64_v28 = vpop.permute.xlu1 %63 }
  0x7f   :  { %v54_v23 = vpop.permute.xlu0 %53 }
  0x86   :  { %v84_v39 = vpop.permute.xlu1 %83 }
  0x87   :  { %v79_v30 = vpop.permute.xlu0 %78 }
  0x9e   :  { %v167_v24 = vpop.f32.mrf.mxu0 }
  0x9f   :  { %v172_v25 = vpop.f32.mrf.mxu1  ;;  %v168_v26 = vadd.f32 %v167_v24, %v49_v21 }
  0xa0   :  { %v173_v27 = vadd.f32 %v172_v25, %v59_v22 }
  0xa1   :  { %187 = vst [vmem:[%s395_s3] sm:$0xff] %v168_v26 }
  0xa2   :  { %189 = vst [vmem:[%s395_s3 + $0x10] sm:$0xff] %v173_v27 }
  0xa5   :  { %v177_v31 = vpop.f32.mrf.mxu2 }
  0xa6   :  { %v182_v32 = vpop.f32.mrf.mxu3  ;;  %v178_v33 = vadd.f32 %v177_v31, %v69_v29  ;;  %v169_v35 = vpop.f32.mrf.mxu0 }
  0xa7   :  { %v183_v34 = vadd.f32 %v182_v32, %v79_v30  ;;  %v174_v36 = vpop.f32.mrf.mxu1  ;;  %v170_v37 = vadd.f32 %v169_v35, %v54_v23 }
  0xa8   :  { %v175_v38 = vadd.f32 %v174_v36, %v64_v28  ;;  %191 = vst [vmem:[%s395_s3 + $0x20] sm:$0xff] %v178_v33 }
  0xa9   :  { %193 = vst [vmem:[%s395_s3 + $0x30] sm:$0xff] %v183_v34 }
  0xaa   :  { %188 = vst [vmem:[%s395_s3 + $0x8] sm:$0xff] %v170_v37 }
  0xab   :  { %190 = vst [vmem:[%s395_s3 + $0x18] sm:$0xff] %v175_v38 }
  0xad   :  { %v179_v41 = vpop.f32.mrf.mxu2 }
  0xae   :  { %v184_v42 = vpop.f32.mrf.mxu3  ;;  %v180_v43 = vadd.f32 %v179_v41, %v74_v40 }
  0xaf   :  { %v185_v44 = vadd.f32 %v184_v42, %v84_v39 }
  0xb0   :  { %192 = vst [vmem:[%s395_s3 + $0x28] sm:$0xff] %v180_v43 }
  0xb1   :  { %194 = vst [vmem:[%s395_s3 + $0x38] sm:$0xff] %v185_v44 }

// kernel: generator_forward.33
= control target key start
LH: loop header
LB: loop body
LE: loop exit
PB: predicated region body
PF: predicated region fallthrough
CT: control target
= control target key end

     0   :  { %v353_v3 = vmov 0   ;;  %vm149_vm0 = vcmask 523264   ;;  %s544_s1 = inlined_call_operand.vmem [shape: bf16[64,512], index: 1, kind: input, shape index: {}]   ;;  %s545_s2 = inlined_call_operand.vmem [shape: f32[32,1], index: 2, kind: input, shape index: {}]   ;;  %s546_s0 = inlined_call_operand.vmem [shape: bf16[32,64], index: 0, kind: input, shape index: {}]   ;;  %s547_s3 = inlined_call_operand.vmem [shape: f32[32,512], index: 3, kind: output, shape index: {}]  }
   0x1   :  { %v310_v0 = vld [vmem:[%s544_s1 + $0x60] sm:$0xf]  ;;  %v348_v1 = vld [vmem:[%s544_s1 + $0x6c] sm:$0xf0]  ;;  %v346_v2 = vld [vmem:[%s544_s1 + $0x64] sm:$0xf]  ;;  %351 = vset.pattern.permute.xlu0 %v353_v3  ;;  %352 = vset.pattern.permute.xlu1 %v353_v3 }
   0x2   :  { %v311_v4 = vor.u32 %v348_v1, %v310_v0  ;;  %v312_v5 = vld [vmem:[%s544_s1 + $0x70] sm:$0xf0]  ;;  %v318_v6 = vld [vmem:[%s544_s1 + $0x68] sm:$0xf]  ;;  %v349_v7 = vld [vmem:[%s544_s1 + $0x74] sm:$0xf0] }
   0x3   :  { %v315_v8 = vor.u32 %v346_v2, %v312_v5  ;;  %v319_v9 = vor.u32 %v349_v7, %v318_v6  ;;  %v347_v10 = vld [vmem:[%s544_s1 + $0x6c] sm:$0xf]  ;;  %v320_v11 = vld [vmem:[%s544_s1 + $0x78] sm:$0xf0]  ;;  %v294_v12 = vld [vmem:[%s544_s1 + $0x40] sm:$0xf] }
   0x4   :  { %160 = vmatpush.bf16.msra.mxu0 %v311_v4  ;;  %v323_v13 = vor.u32 %v347_v10, %v320_v11  ;;  %v344_v14 = vld [vmem:[%s544_s1 + $0x4c] sm:$0xf0]  ;;  %v342_v15 = vld [vmem:[%s544_s1 + $0x44] sm:$0xf]  ;;  %v296_v16 = vld [vmem:[%s544_s1 + $0x50] sm:$0xf0] }
   0x5   :  { %179 = vmatpush.bf16.msra.mxu1 %v315_v8  ;;  %198 = vmatpush.bf16.msra.mxu2 %v319_v9  ;;  %v295_v17 = vor.u32 %v344_v14, %v294_v12  ;;  %v299_v18 = vor.u32 %v342_v15, %v296_v16  ;;  %v302_v19 = vld [vmem:[%s544_s1 + $0x48] sm:$0xf]  ;;  %v345_v20 = vld [vmem:[%s544_s1 + $0x54] sm:$0xf0]  ;;  %v343_v21 = vld [vmem:[%s544_s1 + $0x4c] sm:$0xf] }
   0x6   :  { %217 = vmatpush.bf16.msra.mxu3 %v323_v13  ;;  %v303_v22 = vor.u32 %v345_v20, %v302_v19  ;;  %v304_v23 = vld [vmem:[%s544_s1 + $0x58] sm:$0xf0]  ;;  %v278_v24 = vld [vmem:[%s544_s1 + $0x20] sm:$0xf]  ;;  %v340_v25 = vld [vmem:[%s544_s1 + $0x2c] sm:$0xf0] }
   0x7   :  { %v307_v26 = vor.u32 %v343_v21, %v304_v23  ;;  %v338_v27 = vld [vmem:[%s544_s1 + $0x24] sm:$0xf]  ;;  %v280_v28 = vld [vmem:[%s544_s1 + $0x30] sm:$0xf0]  ;;  %v286_v29 = vld [vmem:[%s544_s1 + $0x28] sm:$0xf]  ;;  %v279_v30 = vor.u32 %v340_v25, %v278_v24 }
   0x8   :  { %161 = vmatpush.bf16.msra.mxu0 %v295_v17  ;;  %v341_v31 = vld [vmem:[%s544_s1 + $0x34] sm:$0xf0]  ;;  %v339_v32 = vld [vmem:[%s544_s1 + $0x2c] sm:$0xf]  ;;  %v288_v33 = vld [vmem:[%s544_s1 + $0x38] sm:$0xf0]  ;;  %v283_v34 = vor.u32 %v338_v27, %v280_v28 }
   0x9   :  { %180 = vmatpush.bf16.msra.mxu1 %v299_v18  ;;  %199 = vmatpush.bf16.msra.mxu2 %v303_v22  ;;  %v287_v35 = vor.u32 %v341_v31, %v286_v29  ;;  %v262_v36 = vld [vmem:[%s544_s1] sm:$0xf]  ;;  %v336_v37 = vld [vmem:[%s544_s1 + $0xc] sm:$0xf0]  ;;  %v334_v38 = vld [vmem:[%s544_s1 + $0x4] sm:$0xf]  ;;  %v291_v39 = vor.u32 %v339_v32, %v288_v33 }
   0xa   :  { %218 = vmatpush.bf16.msra.mxu3 %v307_v26  ;;  %v264_v40 = vld [vmem:[%s544_s1 + $0x10] sm:$0xf0]  ;;  %v270_v41 = vld [vmem:[%s544_s1 + $0x8] sm:$0xf]  ;;  %v337_v42 = vld [vmem:[%s544_s1 + $0x14] sm:$0xf0]  ;;  %v263_v45 = vor.u32 %v336_v37, %v262_v36 }
   0xb   :  { %v335_v43 = vld [vmem:[%s544_s1 + $0xc] sm:$0xf]  ;;  %v272_v44 = vld [vmem:[%s544_s1 + $0x18] sm:$0xf0]  ;;  %v35_v46 = vld [vmem:[%s545_s2] sm:$0xff]  ;;  %v267_v47 = vor.u32 %v334_v38, %v264_v40  ;;  %v271_v48 = vor.u32 %v337_v42, %v270_v41 }
   0xc   :  { %162 = vmatpush.bf16.msra.mxu0 %v279_v30  ;;  %v37_v49 = vld [vmem:[%s545_s2 + $0x10] sm:$0xff]  ;;  %v275_v50 = vor.u32 %v335_v43, %v272_v44  ;;  %41 = vperm.xlu0 %351, %v35_v46   ;;  %v332_v51 = vld [vmem:[%s546_s0] sm:$0xff]  ;;  %v36_v52 = vld [vmem:[%s545_s2 + $0x8] sm:$0xff] }
   0xd   :  { %181 = vmatpush.bf16.msra.mxu1 %v283_v34  ;;  %200 = vmatpush.bf16.msra.mxu2 %v287_v35  ;;  %v38_v53 = vld [vmem:[%s545_s2 + $0x18] sm:$0xff]  ;;  %v333_v54 = vld [vmem:[%s546_s0 + $0x8] sm:$0xff] }
   0xe   :  { %219 = vmatpush.bf16.msra.mxu3 %v291_v39  ;;  %51 = vperm.xlu1 %352, %v37_v49  }
  0x10   :  { %163 = vmatpush.bf16.msra.mxu0 %v263_v45 }
  0x11   :  { %182 = vmatpush.bf16.msra.mxu1 %v267_v47  ;;  %201 = vmatpush.bf16.msra.mxu2 %v271_v48 }
  0x12   :  { %220 = vmatpush.bf16.msra.mxu3 %v275_v50 }
  0x13   :  { %324 = vmatmul.msk.bf16.vlgmr.msra.gmra.mxu0 %vm149_vm0, %v332_v51 }
  0x14   :  { %326 = vmatmul.msk.bf16.vlgmr.msra.gmra.mxu1 %vm149_vm0, %v332_v51  ;;  %328 = vmatmul.msk.bf16.vlgmr.msra.gmra.mxu2 %vm149_vm0, %v332_v51 }
  0x15   :  { %330 = vmatmul.msk.bf16.vlgmr.msra.gmra.mxu3 %vm149_vm0, %v332_v51  ;;  %46 = vperm.xlu0 %351, %v36_v52  }
  0x16   :  { %56 = vperm.xlu1 %352, %v38_v53  }
  0x23   :  { %325 = vmatmul.msk.bf16.gmra.mxu0 %vm149_vm0, %v333_v54 }
  0x24   :  { %327 = vmatmul.msk.bf16.gmra.mxu1 %vm149_vm0, %v333_v54  ;;  %329 = vmatmul.msk.bf16.gmra.mxu2 %vm149_vm0, %v333_v54 }
  0x25   :  { %331 = vmatmul.msk.bf16.gmra.mxu3 %vm149_vm0, %v333_v54 }
  0x7e   :  { %v42_v55 = vpop.permute.xlu0 %41 }
  0x80   :  { %v52_v5 = vpop.permute.xlu1 %51 }
  0x87   :  { %v47_v60 = vpop.permute.xlu0 %46 }
  0x88   :  { %v57_v14 = vpop.permute.xlu1 %56 }
  0x90   :  { %v165_v56 = vpop.f32.mrf.mxu0 }
  0x91   :  { %v166_v57 = vadd.f32 %v165_v56, %v42_v55  ;;  %v184_v58 = vpop.f32.mrf.mxu1 }
  0x92   :  { %v185_v59 = vadd.f32 %v184_v58, %v42_v55 }
  0x93   :  { %232 = vst [vmem:[%s547_s3] sm:$0xff] %v166_v57 }
  0x94   :  { %233 = vst [vmem:[%s547_s3 + $0x8] sm:$0xff] %v185_v59 }
  0x97   :  { %v203_v61 = vpop.f32.mrf.mxu2 }
  0x98   :  { %v204_v62 = vadd.f32 %v203_v61, %v42_v55  ;;  %v222_v63 = vpop.f32.mrf.mxu3  ;;  %v167_v0 = vpop.f32.mrf.mxu0 }
  0x99   :  { %v223_v1 = vadd.f32 %v222_v63, %v42_v55  ;;  %v168_v2 = vadd.f32 %v167_v0, %v47_v60  ;;  %v186_v3 = vpop.f32.mrf.mxu1 }
  0x9a   :  { %234 = vst [vmem:[%s547_s3 + $0x10] sm:$0xff] %v204_v62  ;;  %v187_v4 = vadd.f32 %v186_v3, %v47_v60 }
  0x9b   :  { %235 = vst [vmem:[%s547_s3 + $0x18] sm:$0xff] %v223_v1 }
  0x9c   :  { %236 = vst [vmem:[%s547_s3 + $0x20] sm:$0xff] %v168_v2 }
  0x9d   :  { %237 = vst [vmem:[%s547_s3 + $0x28] sm:$0xff] %v187_v4 }
  0x9f   :  { %v205_v6 = vpop.f32.mrf.mxu2 }
  0xa0   :  { %v206_v7 = vadd.f32 %v205_v6, %v47_v60  ;;  %v224_v8 = vpop.f32.mrf.mxu3  ;;  %v170_v9 = vpop.f32.mrf.mxu0 }
  0xa1   :  { %v225_v10 = vadd.f32 %v224_v8, %v47_v60  ;;  %v171_v11 = vadd.f32 %v170_v9, %v52_v5  ;;  %v189_v12 = vpop.f32.mrf.mxu1 }
  0xa2   :  { %238 = vst [vmem:[%s547_s3 + $0x30] sm:$0xff] %v206_v7  ;;  %v190_v13 = vadd.f32 %v189_v12, %v52_v5 }
  0xa3   :  { %239 = vst [vmem:[%s547_s3 + $0x38] sm:$0xff] %v225_v10 }
  0xa4   :  { %240 = vst [vmem:[%s547_s3 + $0x40] sm:$0xff] %v171_v11 }
  0xa5   :  { %241 = vst [vmem:[%s547_s3 + $0x48] sm:$0xff] %v190_v13 }
  0xa7   :  { %v208_v15 = vpop.f32.mrf.mxu2 }
  0xa8   :  { %v209_v16 = vadd.f32 %v208_v15, %v52_v5  ;;  %v227_v17 = vpop.f32.mrf.mxu3  ;;  %v172_v18 = vpop.f32.mrf.mxu0 }
  0xa9   :  { %v228_v19 = vadd.f32 %v227_v17, %v52_v5  ;;  %v173_v20 = vadd.f32 %v172_v18, %v57_v14  ;;  %v191_v21 = vpop.f32.mrf.mxu1 }
  0xaa   :  { %242 = vst [vmem:[%s547_s3 + $0x50] sm:$0xff] %v209_v16  ;;  %v192_v22 = vadd.f32 %v191_v21, %v57_v14 }
  0xab   :  { %243 = vst [vmem:[%s547_s3 + $0x58] sm:$0xff] %v228_v19 }
  0xac   :  { %244 = vst [vmem:[%s547_s3 + $0x60] sm:$0xff] %v173_v20 }
  0xad   :  { %245 = vst [vmem:[%s547_s3 + $0x68] sm:$0xff] %v192_v22 }
  0xaf   :  { %v210_v23 = vpop.f32.mrf.mxu2 }
  0xb0   :  { %v211_v24 = vadd.f32 %v210_v23, %v57_v14  ;;  %v229_v25 = vpop.f32.mrf.mxu3 }
  0xb1   :  { %v230_v26 = vadd.f32 %v229_v25, %v57_v14 }
  0xb2   :  { %246 = vst [vmem:[%s547_s3 + $0x70] sm:$0xff] %v211_v24 }
  0xb3   :  { %247 = vst [vmem:[%s547_s3 + $0x78] sm:$0xff] %v230_v26 }

// kernel: generator_forward.34
= control target key start
LH: loop header
LB: loop body
LE: loop exit
PB: predicated region body
PF: predicated region fallthrough
CT: control target
= control target key end

     0   :  { %v184_v30 = vmov 1024.0   ;;  %s366_s0 = inlined_call_operand.vmem [shape: f32[16,1024], index: 0, kind: input, shape index: {}]   ;;  %s367_s1 = inlined_call_operand.vmem [shape: f32[16,1024], index: 1, kind: output, shape index: {}]  }
   0x1   :  { %v8_v0 = vld [vmem:[%s366_s0] sm:$0xff]  ;;  %v9_v1 = vld [vmem:[%s366_s0 + $0x8] sm:$0xff]  ;;  %v10_v2 = vld [vmem:[%s366_s0 + $0x10] sm:$0xff]  ;;  %178 = vrcp.f32 %v184_v30 }
   0x2   :  { %v24_v3 = vadd.f32 %v9_v1, %v8_v0  ;;  %v11_v4 = vld [vmem:[%s366_s0 + $0x18] sm:$0xff]  ;;  %v16_v5 = vld [vmem:[%s366_s0 + $0x40] sm:$0xff]  ;;  %v17_v7 = vld [vmem:[%s366_s0 + $0x48] sm:$0xff] }
   0x3   :  { %v18_v8 = vld [vmem:[%s366_s0 + $0x50] sm:$0xff]  ;;  %v12_v9 = vld [vmem:[%s366_s0 + $0x20] sm:$0xff]  ;;  %v33_v10 = vadd.f32 %v17_v7, %v16_v5  ;;  %v19_v12 = vld [vmem:[%s366_s0 + $0x58] sm:$0xff] }
   0x4   :  { %v25_v6 = vadd.f32 %v24_v3, %v10_v2  ;;  %v13_v13 = vld [vmem:[%s366_s0 + $0x28] sm:$0xff]  ;;  %v20_v16 = vld [vmem:[%s366_s0 + $0x60] sm:$0xff]  ;;  %v14_v17 = vld [vmem:[%s366_s0 + $0x30] sm:$0xff] }
   0x5   :  { %v34_v14 = vadd.f32 %v33_v10, %v18_v8  ;;  %v21_v20 = vld [vmem:[%s366_s0 + $0x68] sm:$0xff]  ;;  %v15_v21 = vld [vmem:[%s366_s0 + $0x38] sm:$0xff]  ;;  %v22_v24 = vld [vmem:[%s366_s0 + $0x70] sm:$0xff] }
   0x6   :  { %v26_v11 = vadd.f32 %v25_v6, %v11_v4  ;;  %v23_v28 = vld [vmem:[%s366_s0 + $0x78] sm:$0xff] }
   0x7   :  { %v35_v18 = vadd.f32 %v34_v14, %v19_v12  ;;  %v179_v31 = vpop.eup %178 }
   0x8   :  { %v27_v15 = vadd.f32 %v26_v11, %v12_v9  ;;  %v43_v32 = vmul.f32 1024.0, %v179_v31  ;;  %vm47_vm0 = vweird.f32 %v179_v31 }
   0x9   :  { %v36_v22 = vadd.f32 %v35_v18, %v20_v16 }
   0xa   :  { %v28_v19 = vadd.f32 %v27_v15, %v13_v13  ;;  %v44_v33 = vsub.f32 1.0, %v43_v32 }
   0xb   :  { %v37_v25 = vadd.f32 %v36_v22, %v21_v20 }
   0xc   :  { %v29_v23 = vadd.f32 %v28_v19, %v14_v17  ;;  %v45_v34 = vmul.f32 %v179_v31, %v44_v33 }
   0xd   :  { %v38_v27 = vadd.f32 %v37_v25, %v22_v24 }
   0xe   :  { %v30_v26 = vadd.f32 %v29_v23, %v15_v21  ;;  %v46_v35 = vadd.f32 %v179_v31, %v45_v34 }
   0xf   :  { %v39_v29 = vadd.f32 %v38_v27, %v23_v28 }
  0x10   :  { %31 = vadd.xlane.f32.xlu0 %v30_v26  ;;  %v48_v36 = vsel %vm47_vm0, %v179_v31, %v46_v35 }
  0x18   :  { %40 = vadd.xlane.f32.xlu0 %v39_v29 }
  0x83   :  { %v32_v37 = vpop.xlane.xlu0 %31 }
  0x84   :  { %v49_v38 = vmul.f32 %v48_v36, %v32_v37 }
  0x86   :  { %v243_v39 = vsub.f32 %v8_v0, %v49_v38  ;;  %v245_v40 = vsub.f32 %v9_v1, %v49_v38  ;;  %v247_v41 = vsub.f32 %v10_v2, %v49_v38  ;;  %v249_v42 = vsub.f32 %v11_v4, %v49_v38 }
  0x87   :  { %v255_v45 = vsub.f32 %v12_v9, %v49_v38  ;;  %v259_v49 = vsub.f32 %v13_v13, %v49_v38  ;;  %v263_v53 = vsub.f32 %v14_v17, %v49_v38  ;;  %v58_v59 = vsub.f32 %v15_v21, %v49_v38 }
  0x88   :  { %v67_v43 = vmul.f32 %v243_v39, %v243_v39  ;;  %v68_v44 = vmul.f32 %v245_v40, %v245_v40  ;;  %v69_v46 = vmul.f32 %v247_v41, %v247_v41  ;;  %v70_v51 = vmul.f32 %v249_v42, %v249_v42 }
  0x89   :  { %v71_v54 = vmul.f32 %v255_v45, %v255_v45  ;;  %v72_v60 = vmul.f32 %v259_v49, %v259_v49  ;;  %v73_v1 = vmul.f32 %v263_v53, %v263_v53  ;;  %v74_v6 = vmul.f32 %v58_v59, %v58_v59 }
  0x8a   :  { %v83_v47 = vadd.f32 %v68_v44, %v67_v43 }
  0x8b   :  { %v41_v48 = vpop.xlane.xlu0 %40 }
  0x8c   :  { %v50_v50 = vmul.f32 %v48_v36, %v41_v48  ;;  %v84_v52 = vadd.f32 %v83_v47, %v69_v46 }
  0x8e   :  { %v85_v55 = vadd.f32 %v84_v52, %v70_v51  ;;  %v267_v56 = vsub.f32 %v16_v5, %v50_v50  ;;  %v269_v57 = vsub.f32 %v17_v7, %v50_v50  ;;  %v271_v58 = vsub.f32 %v18_v8, %v50_v50 }
  0x8f   :  { %v275_v62 = vsub.f32 %v19_v12, %v50_v50  ;;  %v283_v3 = vsub.f32 %v20_v16, %v50_v50  ;;  %v287_v8 = vsub.f32 %v21_v20, %v50_v50  ;;  %v291_v12 = vsub.f32 %v22_v24, %v50_v50 }
  0x90   :  { %v86_v61 = vadd.f32 %v85_v55, %v71_v54  ;;  %v75_v63 = vmul.f32 %v267_v56, %v267_v56  ;;  %v76_v0 = vmul.f32 %v269_v57, %v269_v57  ;;  %v77_v4 = vmul.f32 %v271_v58, %v271_v58 }
  0x91   :  { %v78_v9 = vmul.f32 %v275_v62, %v275_v62  ;;  %v79_v13 = vmul.f32 %v283_v3, %v283_v3  ;;  %v295_v15 = vsub.f32 %v23_v28, %v50_v50  ;;  %v80_v16 = vmul.f32 %v287_v8, %v287_v8 }
  0x92   :  { %v87_v2 = vadd.f32 %v86_v61, %v72_v60  ;;  %v92_v5 = vadd.f32 %v76_v0, %v75_v63  ;;  %v81_v18 = vmul.f32 %v291_v12, %v291_v12 }
  0x93   :  { %v82_v20 = vmul.f32 %v295_v15, %v295_v15 }
  0x94   :  { %v88_v7 = vadd.f32 %v87_v2, %v73_v1  ;;  %v93_v10 = vadd.f32 %v92_v5, %v77_v4 }
  0x96   :  { %v89_v11 = vadd.f32 %v88_v7, %v74_v6  ;;  %v94_v14 = vadd.f32 %v93_v10, %v78_v9 }
  0x98   :  { %90 = vadd.xlane.f32.xlu1 %v89_v11  ;;  %v95_v17 = vadd.f32 %v94_v14, %v79_v13 }
  0x9a   :  { %v96_v19 = vadd.f32 %v95_v17, %v80_v16 }
  0x9c   :  { %v97_v21 = vadd.f32 %v96_v19, %v81_v18 }
  0x9e   :  { %v98_v22 = vadd.f32 %v97_v21, %v82_v20 }
  0xa0   :  { %99 = vadd.xlane.f32.xlu1 %v98_v22 }
 0x10b   :  { %v91_v23 = vpop.xlane.xlu1 %90 }
 0x10c   :  { %v101_v24 = vmul.f32 %v91_v23, %v48_v36 }
 0x10e   :  { %v103_v25 = vadd.f32 1e-05, %v101_v24 }
 0x110   :  { %180 = vrsqrt.f32 %v103_v25  ;;  %vm111_vm2 = vweird.f32 %v103_v25 }
 0x113   :  { %v100_v26 = vpop.xlane.xlu1 %99 }
 0x114   :  { %v102_v27 = vmul.f32 %v100_v26, %v48_v36 }
 0x116   :  { %v181_v28 = vpop.eup %180  ;;  %v104_v29 = vadd.f32 1e-05, %v102_v27 }
 0x117   :  { %v106_v30 = vmul.f32 %v181_v28, %v103_v25  ;;  %vm112_vm1 = vweird.f32 %v181_v28 }
 0x118   :  { %182 = vrsqrt.f32 %v104_v29  ;;  %vm113_vm3 = vmor %vm111_vm2, %vm112_vm1  ;;  %vm121_vm5 = vweird.f32 %v104_v29 }
 0x119   :  { %v107_v31 = vmul.f32 %v181_v28, %v106_v30 }
 0x11b   :  { %v108_v32 = vmul.f32 0.5, %v107_v31 }
 0x11d   :  { %v109_v33 = vsub.f32 1.5, %v108_v32 }
 0x11e   :  { %v183_v34 = vpop.eup %182 }
 0x11f   :  { %v110_v35 = vmul.f32 %v181_v28, %v109_v33  ;;  %v116_v37 = vmul.f32 %v183_v34, %v104_v29  ;;  %vm122_vm4 = vweird.f32 %v183_v34 }
 0x120   :  { %vm123_vm6 = vmor %vm121_vm5, %vm122_vm4 }
 0x121   :  { %v114_v38 = vsel %vm113_vm3, %v181_v28, %v110_v35  ;;  %v117_v43 = vmul.f32 %v183_v34, %v116_v37 }
 0x122   :  { %v125_v44 = vmul.f32 %v114_v38, %v243_v39  ;;  %v126_v46 = vmul.f32 %v114_v38, %v245_v40  ;;  %v127_v36 = vmul.f32 %v114_v38, %v247_v41  ;;  %v128_v47 = vmul.f32 %v114_v38, %v249_v42 }
 0x123   :  { %v129_v48 = vmul.f32 %v114_v38, %v255_v45  ;;  %v130_v50 = vmul.f32 %v114_v38, %v259_v49  ;;  %v131_v51 = vmul.f32 %v114_v38, %v263_v53  ;;  %v132_v60 = vmul.f32 %v114_v38, %v58_v59 }
 0x124   :  { %v141_v52 = vmax.f32 %v125_v44, 0.0  ;;  %v142_v54 = vmax.f32 %v126_v46, 0.0  ;;  %v143_v55 = vmax.f32 %v127_v36, 0.0  ;;  %v144_v61 = vmax.f32 %v128_v47, 0.0 }
 0x125   :  { %v145_v63 = vmax.f32 %v129_v48, 0.0  ;;  %v118_v39 = vmul.f32 0.5, %v117_v43  ;;  %v146_v40 = vmax.f32 %v130_v50, 0.0  ;;  %v147_v41 = vmax.f32 %v131_v51, 0.0 }
 0x126   :  { %157 = vst [vmem:[%s367_s1] sm:$0xff] %v141_v52  ;;  %v148_v45 = vmax.f32 %v132_v60, 0.0 }
 0x127   :  { %158 = vst [vmem:[%s367_s1 + $0x8] sm:$0xff] %v142_v54  ;;  %v119_v42 = vsub.f32 1.5, %v118_v39 }
 0x128   :  { %159 = vst [vmem:[%s367_s1 + $0x10] sm:$0xff] %v143_v55 }
 0x129   :  { %160 = vst [vmem:[%s367_s1 + $0x18] sm:$0xff] %v144_v61  ;;  %v120_v49 = vmul.f32 %v183_v34, %v119_v42 }
 0x12a   :  { %161 = vst [vmem:[%s367_s1 + $0x20] sm:$0xff] %v145_v63 }
 0x12b   :  { %162 = vst [vmem:[%s367_s1 + $0x28] sm:$0xff] %v146_v40  ;;  %v124_v53 = vsel %vm123_vm6, %v183_v34, %v120_v49 }
 0x12c   :  { %163 = vst [vmem:[%s367_s1 + $0x30] sm:$0xff] %v147_v41  ;;  %v133_v59 = vmul.f32 %v124_v53, %v267_v56  ;;  %v134_v0 = vmul.f32 %v124_v53, %v269_v57  ;;  %v135_v1 = vmul.f32 %v124_v53, %v271_v58  ;;  %v136_v2 = vmul.f32 %v124_v53, %v275_v62 }
 0x12d   :  { %164 = vst [vmem:[%s367_s1 + $0x38] sm:$0xff] %v148_v45  ;;  %v137_v4 = vmul.f32 %v124_v53, %v283_v3  ;;  %v138_v5 = vmul.f32 %v124_v53, %v287_v8  ;;  %v139_v6 = vmul.f32 %v124_v53, %v291_v12  ;;  %v140_v11 = vmul.f32 %v124_v53, %v295_v15 }
 0x12e   :  { %v149_v7 = vmax.f32 %v133_v59, 0.0  ;;  %v150_v9 = vmax.f32 %v134_v0, 0.0  ;;  %v151_v10 = vmax.f32 %v135_v1, 0.0  ;;  %v152_v13 = vmax.f32 %v136_v2, 0.0 }
 0x12f   :  { %v153_v14 = vmax.f32 %v137_v4, 0.0  ;;  %v154_v56 = vmax.f32 %v138_v5, 0.0  ;;  %v155_v57 = vmax.f32 %v139_v6, 0.0  ;;  %v156_v58 = vmax.f32 %v140_v11, 0.0 }
 0x130   :  { %165 = vst [vmem:[%s367_s1 + $0x40] sm:$0xff] %v149_v7 }
 0x131   :  { %166 = vst [vmem:[%s367_s1 + $0x48] sm:$0xff] %v150_v9 }
 0x132   :  { %167 = vst [vmem:[%s367_s1 + $0x50] sm:$0xff] %v151_v10 }
 0x133   :  { %168 = vst [vmem:[%s367_s1 + $0x58] sm:$0xff] %v152_v13 }
 0x134   :  { %169 = vst [vmem:[%s367_s1 + $0x60] sm:$0xff] %v153_v14 }
 0x135   :  { %170 = vst [vmem:[%s367_s1 + $0x68] sm:$0xff] %v154_v56 }
 0x136   :  { %171 = vst [vmem:[%s367_s1 + $0x70] sm:$0xff] %v155_v57 }
 0x137   :  { %172 = vst [vmem:[%s367_s1 + $0x78] sm:$0xff] %v156_v58 }

// kernel: generator_forward.35
= control target key start
LH: loop header
LB: loop body
LE: loop exit
PB: predicated region body
PF: predicated region fallthrough
CT: control target
= control target key end

     0   :  { %s3387_s12 = smov 0   ;;  %s3389_s13 = smov 0   ;;  %s4343_s0 = inlined_call_operand.vmem [shape: bf16[3,392], index: 0, kind: input, shape index: {}]   ;;  %s4344_s1 = inlined_call_operand.vmem [shape: bf16[392,2048], index: 1, kind: input, shape index: {}]   ;;  %s4345_s2 = inlined_call_operand.vmem [shape: f32[3,1], index: 2, kind: input, shape index: {}]   ;;  %s4346_s3 = inlined_call_operand.vmem [shape: f32[3,2048], index: 3, kind: output, shape index: {}]  }
   0x1   :  { %s3391_s14 = smov 0  }
   0x2 LB: > { %s2314_s15 = sadd.s32 4294967295, %s3364_s14   ;;  %s3404_s16 = sadd.s32 1, %s3364_s14   ;;  %s3364_s14 = sphi %s3391_s14, %s4349_s14   ;;  %s3360_s13 = sphi %s3389_s13, %s4348_s13   ;;  %s3356_s12 = sphi %s3387_s12, %s4347_s12  }
   0x3   : > { %s38_s17 = ssub.s32 %s3364_s14, %s3404_s16  ;;  %s41_s18 = sadd.s32 1, %s3360_s13 }
   0x4   : > { %p39_p0 = scmp.eq.s32.totalorder %s38_s17, 0  ;;  %p48_p1 = scmp.ne.s32.totalorder %s3360_s13, %s3356_s12 }
   0x5   : > { %p49_p2 = scmp.eq.s32.totalorder %s3364_s14, 0  ;;  %p2317_p4 = scmp.ge.s32.totalorder %s3364_s14, 2 }
   0x6   : > { %s3413_s19 = scalar_select %p39_p0, %s3360_s13, %s41_s18  }
   0x7   : > { %p50_p3 = por %p49_p2, %p48_p1  ;;  %127 = sbr.rel (%p2317_p4) target bundleno = 212 (0xd4), region = 24 }
   0xc   : > { %130 = sbr.rel (!%p50_p3) target bundleno = 212 (0xd4), region = 28  ;;  %s132_s20 = sand.u32 (%p50_p3), 1, %s3360_s13  }
   0xd   : > { %s3101_s21 = sshll.u32 (%p50_p3), %s3364_s14, 5  ;;  %s3294_s22 = smul.u32 (%p50_p3), 1568, %s132_s20 }
   0xe   : > { %s3421_s25 = scalar_lea.vmem (%p50_p3), %s4344_s1, %s3101_s21 }
   0xf   : > { %v150_v0 = vld [vmem:[%s3421_s25] sm:$0xff] (%p50_p3)  ;;  %v152_v1 = vld [vmem:[%s3421_s25 + $0x8] sm:$0xff] (%p50_p3)  ;;  %v154_v2 = vld [vmem:[%s3421_s25 + $0x10] sm:$0xff] (%p50_p3)  ;;  %s3426_s26 = scalar_lea.vmem (%p50_p3), [#allocation2], %s3294_s22 }
  0x10   : > { %151 = vst [vmem:[%s3426_s26] sm:$0xff] (%p50_p3), %v150_v0  ;;  %v156_v3 = vld [vmem:[%s3421_s25 + $0x18] sm:$0xff] (%p50_p3)  ;;  %v158_v4 = vld [vmem:[%s3421_s25 + $0x40] sm:$0xff] (%p50_p3)  ;;  %v160_v5 = vld [vmem:[%s3421_s25 + $0x48] sm:$0xff] (%p50_p3) }
  0x11   : > { %153 = vst [vmem:[%s3426_s26 + $0x8] sm:$0xff] %v152_v1  ;;  %v162_v6 = vld [vmem:[%s3421_s25 + $0x50] sm:$0xff]  ;;  %v164_v7 = vld [vmem:[%s3421_s25 + $0x58] sm:$0xff]  ;;  %v166_v8 = vld [vmem:[%s3421_s25 + $0x80] sm:$0xff] }
  0x12   : > { %155 = vst [vmem:[%s3426_s26 + $0x10] sm:$0xff] %v154_v2  ;;  %v168_v9 = vld [vmem:[%s3421_s25 + $0x88] sm:$0xff]  ;;  %v170_v10 = vld [vmem:[%s3421_s25 + $0x90] sm:$0xff]  ;;  %v172_v11 = vld [vmem:[%s3421_s25 + $0x98] sm:$0xff] }
  0x13   : > { %157 = vst [vmem:[%s3426_s26 + $0x18] sm:$0xff] %v156_v3  ;;  %v174_v12 = vld [vmem:[%s3421_s25 + $0xc0] sm:$0xff]  ;;  %v176_v13 = vld [vmem:[%s3421_s25 + $0xc8] sm:$0xff]  ;;  %v178_v14 = vld [vmem:[%s3421_s25 + $0xd0] sm:$0xff] }
  0x14   : > { %159 = vst [vmem:[%s3426_s26 + $0x20] sm:$0xff] %v158_v4  ;;  %v180_v15 = vld [vmem:[%s3421_s25 + $0xd8] sm:$0xff]  ;;  %v182_v16 = vld [vmem:[%s3421_s25 + $0x100] sm:$0xff]  ;;  %v184_v17 = vld [vmem:[%s3421_s25 + $0x108] sm:$0xff] }
  0x15   : > { %161 = vst [vmem:[%s3426_s26 + $0x28] sm:$0xff] %v160_v5  ;;  %v186_v18 = vld [vmem:[%s3421_s25 + $0x110] sm:$0xff]  ;;  %v188_v19 = vld [vmem:[%s3421_s25 + $0x118] sm:$0xff]  ;;  %v190_v20 = vld [vmem:[%s3421_s25 + $0x140] sm:$0xff] }
  0x16   : > { %163 = vst [vmem:[%s3426_s26 + $0x30] sm:$0xff] %v162_v6  ;;  %v192_v21 = vld [vmem:[%s3421_s25 + $0x148] sm:$0xff]  ;;  %v194_v22 = vld [vmem:[%s3421_s25 + $0x150] sm:$0xff]  ;;  %v196_v23 = vld [vmem:[%s3421_s25 + $0x158] sm:$0xff] }
  0x17   : > { %165 = vst [vmem:[%s3426_s26 + $0x38] sm:$0xff] %v164_v7  ;;  %v198_v24 = vld [vmem:[%s3421_s25 + $0x180] sm:$0xff]  ;;  %v200_v25 = vld [vmem:[%s3421_s25 + $0x188] sm:$0xff]  ;;  %v202_v26 = vld [vmem:[%s3421_s25 + $0x190] sm:$0xff] }
  0x18   : > { %167 = vst [vmem:[%s3426_s26 + $0x40] sm:$0xff] %v166_v8  ;;  %v204_v27 = vld [vmem:[%s3421_s25 + $0x198] sm:$0xff]  ;;  %v206_v28 = vld [vmem:[%s3421_s25 + $0x1c0] sm:$0xff]  ;;  %v208_v29 = vld [vmem:[%s3421_s25 + $0x1c8] sm:$0xff] }
  0x19   : > { %169 = vst [vmem:[%s3426_s26 + $0x48] sm:$0xff] %v168_v9  ;;  %v210_v30 = vld [vmem:[%s3421_s25 + $0x1d0] sm:$0xff]  ;;  %v212_v31 = vld [vmem:[%s3421_s25 + $0x1d8] sm:$0xff]  ;;  %v214_v32 = vld [vmem:[%s3421_s25 + $0x200] sm:$0xff] }
  0x1a   : > { %171 = vst [vmem:[%s3426_s26 + $0x50] sm:$0xff] %v170_v10  ;;  %v216_v33 = vld [vmem:[%s3421_s25 + $0x208] sm:$0xff]  ;;  %v218_v34 = vld [vmem:[%s3421_s25 + $0x210] sm:$0xff]  ;;  %v220_v35 = vld [vmem:[%s3421_s25 + $0x218] sm:$0xff] }
  0x1b   : > { %173 = vst [vmem:[%s3426_s26 + $0x58] sm:$0xff] %v172_v11  ;;  %v222_v36 = vld [vmem:[%s3421_s25 + $0x240] sm:$0xff]  ;;  %v224_v37 = vld [vmem:[%s3421_s25 + $0x248] sm:$0xff]  ;;  %v226_v38 = vld [vmem:[%s3421_s25 + $0x250] sm:$0xff] }
  0x1c   : > { %175 = vst [vmem:[%s3426_s26 + $0x60] sm:$0xff] %v174_v12  ;;  %v228_v39 = vld [vmem:[%s3421_s25 + $0x258] sm:$0xff]  ;;  %v230_v40 = vld [vmem:[%s3421_s25 + $0x280] sm:$0xff]  ;;  %v232_v41 = vld [vmem:[%s3421_s25 + $0x288] sm:$0xff] }
  0x1d   : > { %177 = vst [vmem:[%s3426_s26 + $0x68] sm:$0xff] %v176_v13  ;;  %v234_v42 = vld [vmem:[%s3421_s25 + $0x290] sm:$0xff]  ;;  %v236_v43 = vld [vmem:[%s3421_s25 + $0x298] sm:$0xff]  ;;  %v238_v44 = vld [vmem:[%s3421_s25 + $0x2c0] sm:$0xff] }
  0x1e   : > { %179 = vst [vmem:[%s3426_s26 + $0x70] sm:$0xff] %v178_v14  ;;  %v240_v45 = vld [vmem:[%s3421_s25 + $0x2c8] sm:$0xff]  ;;  %v242_v46 = vld [vmem:[%s3421_s25 + $0x2d0] sm:$0xff]  ;;  %v244_v47 = vld [vmem:[%s3421_s25 + $0x2d8] sm:$0xff] }
  0x1f   : > { %181 = vst [vmem:[%s3426_s26 + $0x78] sm:$0xff] %v180_v15  ;;  %v246_v48 = vld [vmem:[%s3421_s25 + $0x300] sm:$0xff]  ;;  %v248_v49 = vld [vmem:[%s3421_s25 + $0x308] sm:$0xff]  ;;  %v250_v50 = vld [vmem:[%s3421_s25 + $0x310] sm:$0xff] }
  0x20   : > { %183 = vst [vmem:[%s3426_s26 + $0x80] sm:$0xff] %v182_v16  ;;  %v252_v51 = vld [vmem:[%s3421_s25 + $0x318] sm:$0xff]  ;;  %v254_v52 = vld [vmem:[%s3421_s25 + $0x340] sm:$0xff]  ;;  %v256_v53 = vld [vmem:[%s3421_s25 + $0x348] sm:$0xff] }
  0x21   : > { %185 = vst [vmem:[%s3426_s26 + $0x88] sm:$0xff] %v184_v17  ;;  %v258_v54 = vld [vmem:[%s3421_s25 + $0x350] sm:$0xff]  ;;  %v260_v55 = vld [vmem:[%s3421_s25 + $0x358] sm:$0xff]  ;;  %v262_v56 = vld [vmem:[%s3421_s25 + $0x380] sm:$0xff] }
  0x22   : > { %187 = vst [vmem:[%s3426_s26 + $0x90] sm:$0xff] %v186_v18  ;;  %v264_v57 = vld [vmem:[%s3421_s25 + $0x388] sm:$0xff]  ;;  %v266_v58 = vld [vmem:[%s3421_s25 + $0x390] sm:$0xff]  ;;  %v268_v59 = vld [vmem:[%s3421_s25 + $0x398] sm:$0xff] }
  0x23   : > { %189 = vst [vmem:[%s3426_s26 + $0x98] sm:$0xff] %v188_v19  ;;  %v270_v60 = vld [vmem:[%s3421_s25 + $0x3c0] sm:$0xff]  ;;  %v272_v61 = vld [vmem:[%s3421_s25 + $0x3c8] sm:$0xff]  ;;  %v274_v62 = vld [vmem:[%s3421_s25 + $0x3d0] sm:$0xff] }
  0x24   : > { %191 = vst [vmem:[%s3426_s26 + $0xa0] sm:$0xff] %v190_v20  ;;  %v276_v63 = vld [vmem:[%s3421_s25 + $0x3d8] sm:$0xff]  ;;  %v278_v0 = vld [vmem:[%s3421_s25 + $0x400] sm:$0xff]  ;;  %v280_v1 = vld [vmem:[%s3421_s25 + $0x408] sm:$0xff] }
  0x25   : > { %193 = vst [vmem:[%s3426_s26 + $0xa8] sm:$0xff] %v192_v21  ;;  %v282_v2 = vld [vmem:[%s3421_s25 + $0x410] sm:$0xff]  ;;  %v284_v3 = vld [vmem:[%s3421_s25 + $0x418] sm:$0xff]  ;;  %v286_v4 = vld [vmem:[%s3421_s25 + $0x440] sm:$0xff] }
  0x26   : > { %195 = vst [vmem:[%s3426_s26 + $0xb0] sm:$0xff] %v194_v22  ;;  %v288_v5 = vld [vmem:[%s3421_s25 + $0x448] sm:$0xff]  ;;  %v290_v6 = vld [vmem:[%s3421_s25 + $0x450] sm:$0xff]  ;;  %v292_v7 = vld [vmem:[%s3421_s25 + $0x458] sm:$0xff] }
  0x27   : > { %197 = vst [vmem:[%s3426_s26 + $0xb8] sm:$0xff] %v196_v23  ;;  %v294_v8 = vld [vmem:[%s3421_s25 + $0x480] sm:$0xff]  ;;  %v296_v9 = vld [vmem:[%s3421_s25 + $0x488] sm:$0xff]  ;;  %v298_v10 = vld [vmem:[%s3421_s25 + $0x490] sm:$0xff] }
  0x28   : > { %199 = vst [vmem:[%s3426_s26 + $0xc0] sm:$0xff] %v198_v24  ;;  %v300_v11 = vld [vmem:[%s3421_s25 + $0x498] sm:$0xff]  ;;  %v302_v12 = vld [vmem:[%s3421_s25 + $0x4c0] sm:$0xff]  ;;  %v304_v13 = vld [vmem:[%s3421_s25 + $0x4c8] sm:$0xff] }
  0x29   : > { %201 = vst [vmem:[%s3426_s26 + $0xc8] sm:$0xff] %v200_v25  ;;  %v306_v14 = vld [vmem:[%s3421_s25 + $0x4d0] sm:$0xff]  ;;  %v308_v15 = vld [vmem:[%s3421_s25 + $0x4d8] sm:$0xff]  ;;  %v310_v16 = vld [vmem:[%s3421_s25 + $0x500] sm:$0xff] }
  0x2a   : > { %203 = vst [vmem:[%s3426_s26 + $0xd0] sm:$0xff] %v202_v26  ;;  %v312_v17 = vld [vmem:[%s3421_s25 + $0x508] sm:$0xff]  ;;  %v314_v18 = vld [vmem:[%s3421_s25 + $0x510] sm:$0xff]  ;;  %v316_v19 = vld [vmem:[%s3421_s25 + $0x518] sm:$0xff] }
  0x2b   : > { %205 = vst [vmem:[%s3426_s26 + $0xd8] sm:$0xff] %v204_v27  ;;  %v318_v20 = vld [vmem:[%s3421_s25 + $0x540] sm:$0xff]  ;;  %v320_v21 = vld [vmem:[%s3421_s25 + $0x548] sm:$0xff]  ;;  %v322_v22 = vld [vmem:[%s3421_s25 + $0x550] sm:$0xff] }
  0x2c   : > { %207 = vst [vmem:[%s3426_s26 + $0xe0] sm:$0xff] %v206_v28  ;;  %v324_v23 = vld [vmem:[%s3421_s25 + $0x558] sm:$0xff]  ;;  %v326_v24 = vld [vmem:[%s3421_s25 + $0x580] sm:$0xff]  ;;  %v328_v25 = vld [vmem:[%s3421_s25 + $0x588] sm:$0xff] }
  0x2d   : > { %209 = vst [vmem:[%s3426_s26 + $0xe8] sm:$0xff] %v208_v29  ;;  %v330_v26 = vld [vmem:[%s3421_s25 + $0x590] sm:$0xff]  ;;  %v332_v27 = vld [vmem:[%s3421_s25 + $0x598] sm:$0xff]  ;;  %v334_v28 = vld [vmem:[%s3421_s25 + $0x5c0] sm:$0xff] }
  0x2e   : > { %211 = vst [vmem:[%s3426_s26 + $0xf0] sm:$0xff] %v210_v30  ;;  %v336_v29 = vld [vmem:[%s3421_s25 + $0x5c8] sm:$0xff]  ;;  %v338_v30 = vld [vmem:[%s3421_s25 + $0x5d0] sm:$0xff] }
  0x2f   : > { %213 = vst [vmem:[%s3426_s26 + $0xf8] sm:$0xff] %v212_v31  ;;  %v340_v31 = vld [vmem:[%s3421_s25 + $0x5d8] sm:$0xff] }
  0x30   : > { %215 = vst [vmem:[%s3426_s26 + $0x100] sm:$0xff] %v214_v32  ;;  %v342_v32 = vld [vmem:[%s3421_s25 + $0x600] sm:$0xff] }
  0x31   : > { %217 = vst [vmem:[%s3426_s26 + $0x108] sm:$0xff] %v216_v33  ;;  %v344_v33 = vld [vmem:[%s3421_s25 + $0x608] sm:$0xff] }
  0x32   : > { %219 = vst [vmem:[%s3426_s26 + $0x110] sm:$0xff] %v218_v34  ;;  %v346_v34 = vld [vmem:[%s3421_s25 + $0x610] sm:$0xff] }
  0x33   : > { %221 = vst [vmem:[%s3426_s26 + $0x118] sm:$0xff] %v220_v35  ;;  %v348_v35 = vld [vmem:[%s3421_s25 + $0x618] sm:$0xff] }
  0x34   : > { %223 = vst [vmem:[%s3426_s26 + $0x120] sm:$0xff] %v222_v36  ;;  %v350_v36 = vld [vmem:[%s3421_s25 + $0x640] sm:$0xff] }
  0x35   : > { %225 = vst [vmem:[%s3426_s26 + $0x128] sm:$0xff] %v224_v37  ;;  %v352_v37 = vld [vmem:[%s3421_s25 + $0x648] sm:$0xff] }
  0x36   : > { %227 = vst [vmem:[%s3426_s26 + $0x130] sm:$0xff] %v226_v38  ;;  %v354_v38 = vld [vmem:[%s3421_s25 + $0x650] sm:$0xff] }
  0x37   : > { %229 = vst [vmem:[%s3426_s26 + $0x138] sm:$0xff] %v228_v39  ;;  %v356_v39 = vld [vmem:[%s3421_s25 + $0x658] sm:$0xff] }
  0x38   : > { %231 = vst [vmem:[%s3426_s26 + $0x140] sm:$0xff] %v230_v40  ;;  %v358_v40 = vld [vmem:[%s3421_s25 + $0x680] sm:$0xff] }
  0x39   : > { %233 = vst [vmem:[%s3426_s26 + $0x148] sm:$0xff] %v232_v41  ;;  %v360_v41 = vld [vmem:[%s3421_s25 + $0x688] sm:$0xff] }
  0x3a   : > { %235 = vst [vmem:[%s3426_s26 + $0x150] sm:$0xff] %v234_v42  ;;  %v362_v42 = vld [vmem:[%s3421_s25 + $0x690] sm:$0xff] }
  0x3b   : > { %237 = vst [vmem:[%s3426_s26 + $0x158] sm:$0xff] %v236_v43  ;;  %v364_v43 = vld [vmem:[%s3421_s25 + $0x698] sm:$0xff] }
  0x3c   : > { %239 = vst [vmem:[%s3426_s26 + $0x160] sm:$0xff] %v238_v44  ;;  %v366_v44 = vld [vmem:[%s3421_s25 + $0x6c0] sm:$0xff] }
  0x3d   : > { %241 = vst [vmem:[%s3426_s26 + $0x168] sm:$0xff] %v240_v45  ;;  %v368_v45 = vld [vmem:[%s3421_s25 + $0x6c8] sm:$0xff] }
  0x3e   : > { %243 = vst [vmem:[%s3426_s26 + $0x170] sm:$0xff] %v242_v46  ;;  %v370_v46 = vld [vmem:[%s3421_s25 + $0x6d0] sm:$0xff] }
  0x3f   : > { %245 = vst [vmem:[%s3426_s26 + $0x178] sm:$0xff] %v244_v47  ;;  %v372_v47 = vld [vmem:[%s3421_s25 + $0x6d8] sm:$0xff] }
  0x40   : > { %247 = vst [vmem:[%s3426_s26 + $0x180] sm:$0xff] %v246_v48  ;;  %v374_v48 = vld [vmem:[%s3421_s25 + $0x700] sm:$0xff] }
  0x41   : > { %249 = vst [vmem:[%s3426_s26 + $0x188] sm:$0xff] %v248_v49  ;;  %v376_v49 = vld [vmem:[%s3421_s25 + $0x708] sm:$0xff] }
  0x42   : > { %251 = vst [vmem:[%s3426_s26 + $0x190] sm:$0xff] %v250_v50  ;;  %v378_v50 = vld [vmem:[%s3421_s25 + $0x710] sm:$0xff] }
  0x43   : > { %253 = vst [vmem:[%s3426_s26 + $0x198] sm:$0xff] %v252_v51  ;;  %v380_v51 = vld [vmem:[%s3421_s25 + $0x718] sm:$0xff] }
  0x44   : > { %255 = vst [vmem:[%s3426_s26 + $0x1a0] sm:$0xff] %v254_v52  ;;  %v382_v52 = vld [vmem:[%s3421_s25 + $0x740] sm:$0xff] }
  0x45   : > { %257 = vst [vmem:[%s3426_s26 + $0x1a8] sm:$0xff] %v256_v53  ;;  %v384_v53 = vld [vmem:[%s3421_s25 + $0x748] sm:$0xff] }
  0x46   : > { %259 = vst [vmem:[%s3426_s26 + $0x1b0] sm:$0xff] %v258_v54  ;;  %v386_v54 = vld [vmem:[%s3421_s25 + $0x750] sm:$0xff] }
  0x47   : > { %261 = vst [vmem:[%s3426_s26 + $0x1b8] sm:$0xff] %v260_v55  ;;  %v388_v55 = vld [vmem:[%s3421_s25 + $0x758] sm:$0xff] }
  0x48   : > { %263 = vst [vmem:[%s3426_s26 + $0x1c0] sm:$0xff] %v262_v56  ;;  %v390_v56 = vld [vmem:[%s3421_s25 + $0x780] sm:$0xff] }
  0x49   : > { %265 = vst [vmem:[%s3426_s26 + $0x1c8] sm:$0xff] %v264_v57  ;;  %v392_v57 = vld [vmem:[%s3421_s25 + $0x788] sm:$0xff] }
  0x4a   : > { %267 = vst [vmem:[%s3426_s26 + $0x1d0] sm:$0xff] %v266_v58  ;;  %v394_v58 = vld [vmem:[%s3421_s25 + $0x790] sm:$0xff] }
  0x4b   : > { %269 = vst [vmem:[%s3426_s26 + $0x1d8] sm:$0xff] %v268_v59  ;;  %v396_v59 = vld [vmem:[%s3421_s25 + $0x798] sm:$0xff] }
  0x4c   : > { %271 = vst [vmem:[%s3426_s26 + $0x1e0] sm:$0xff] %v270_v60  ;;  %v398_v60 = vld [vmem:[%s3421_s25 + $0x7c0] sm:$0xff] }
  0x4d   : > { %273 = vst [vmem:[%s3426_s26 + $0x1e8] sm:$0xff] %v272_v61  ;;  %v400_v61 = vld [vmem:[%s3421_s25 + $0x7c8] sm:$0xff] }
  0x4e   : > { %275 = vst [vmem:[%s3426_s26 + $0x1f0] sm:$0xff] %v274_v62  ;;  %v402_v62 = vld [vmem:[%s3421_s25 + $0x7d0] sm:$0xff] }
  0x4f   : > { %277 = vst [vmem:[%s3426_s26 + $0x1f8] sm:$0xff] %v276_v63  ;;  %v404_v63 = vld [vmem:[%s3421_s25 + $0x7d8] sm:$0xff] }
  0x50   : > { %279 = vst [vmem:[%s3426_s26 + $0x200] sm:$0xff] %v278_v0  ;;  %v406_v0 = vld [vmem:[%s3421_s25 + $0x800] sm:$0xff] }
  0x51   : > { %281 = vst [vmem:[%s3426_s26 + $0x208] sm:$0xff] %v280_v1  ;;  %v408_v1 = vld [vmem:[%s3421_s25 + $0x808] sm:$0xff] }
  0x52   : > { %283 = vst [vmem:[%s3426_s26 + $0x210] sm:$0xff] %v282_v2  ;;  %v410_v2 = vld [vmem:[%s3421_s25 + $0x810] sm:$0xff] }
  0x53   : > { %285 = vst [vmem:[%s3426_s26 + $0x218] sm:$0xff] %v284_v3  ;;  %v412_v3 = vld [vmem:[%s3421_s25 + $0x818] sm:$0xff] }
  0x54   : > { %287 = vst [vmem:[%s3426_s26 + $0x220] sm:$0xff] %v286_v4  ;;  %v414_v4 = vld [vmem:[%s3421_s25 + $0x840] sm:$0xff] }
  0x55   : > { %289 = vst [vmem:[%s3426_s26 + $0x228] sm:$0xff] %v288_v5  ;;  %v416_v5 = vld [vmem:[%s3421_s25 + $0x848] sm:$0xff] }
  0x56   : > { %291 = vst [vmem:[%s3426_s26 + $0x230] sm:$0xff] %v290_v6  ;;  %v418_v6 = vld [vmem:[%s3421_s25 + $0x850] sm:$0xff] }
  0x57   : > { %293 = vst [vmem:[%s3426_s26 + $0x238] sm:$0xff] %v292_v7  ;;  %v420_v7 = vld [vmem:[%s3421_s25 + $0x858] sm:$0xff] }
  0x58   : > { %295 = vst [vmem:[%s3426_s26 + $0x240] sm:$0xff] %v294_v8  ;;  %v422_v8 = vld [vmem:[%s3421_s25 + $0x880] sm:$0xff] }
  0x59   : > { %297 = vst [vmem:[%s3426_s26 + $0x248] sm:$0xff] %v296_v9  ;;  %v424_v9 = vld [vmem:[%s3421_s25 + $0x888] sm:$0xff] }
  0x5a   : > { %299 = vst [vmem:[%s3426_s26 + $0x250] sm:$0xff] %v298_v10  ;;  %v426_v10 = vld [vmem:[%s3421_s25 + $0x890] sm:$0xff] }
  0x5b   : > { %301 = vst [vmem:[%s3426_s26 + $0x258] sm:$0xff] %v300_v11  ;;  %v428_v11 = vld [vmem:[%s3421_s25 + $0x898] sm:$0xff] }
  0x5c   : > { %303 = vst [vmem:[%s3426_s26 + $0x260] sm:$0xff] %v302_v12  ;;  %v430_v12 = vld [vmem:[%s3421_s25 + $0x8c0] sm:$0xff] }
  0x5d   : > { %305 = vst [vmem:[%s3426_s26 + $0x268] sm:$0xff] %v304_v13  ;;  %v432_v13 = vld [vmem:[%s3421_s25 + $0x8c8] sm:$0xff] }
  0x5e   : > { %307 = vst [vmem:[%s3426_s26 + $0x270] sm:$0xff] %v306_v14  ;;  %v434_v14 = vld [vmem:[%s3421_s25 + $0x8d0] sm:$0xff] }
  0x5f   : > { %309 = vst [vmem:[%s3426_s26 + $0x278] sm:$0xff] %v308_v15  ;;  %v436_v15 = vld [vmem:[%s3421_s25 + $0x8d8] sm:$0xff] }
  0x60   : > { %311 = vst [vmem:[%s3426_s26 + $0x280] sm:$0xff] %v310_v16  ;;  %v438_v16 = vld [vmem:[%s3421_s25 + $0x900] sm:$0xff] }
  0x61   : > { %313 = vst [vmem:[%s3426_s26 + $0x288] sm:$0xff] %v312_v17  ;;  %v440_v17 = vld [vmem:[%s3421_s25 + $0x908] sm:$0xff] }
  0x62   : > { %315 = vst [vmem:[%s3426_s26 + $0x290] sm:$0xff] %v314_v18  ;;  %v442_v18 = vld [vmem:[%s3421_s25 + $0x910] sm:$0xff] }
  0x63   : > { %317 = vst [vmem:[%s3426_s26 + $0x298] sm:$0xff] %v316_v19  ;;  %v444_v19 = vld [vmem:[%s3421_s25 + $0x918] sm:$0xff] }
  0x64   : > { %319 = vst [vmem:[%s3426_s26 + $0x2a0] sm:$0xff] %v318_v20  ;;  %v446_v20 = vld [vmem:[%s3421_s25 + $0x940] sm:$0xff] }
  0x65   : > { %321 = vst [vmem:[%s3426_s26 + $0x2a8] sm:$0xff] %v320_v21  ;;  %v448_v21 = vld [vmem:[%s3421_s25 + $0x948] sm:$0xff] }
  0x66   : > { %323 = vst [vmem:[%s3426_s26 + $0x2b0] sm:$0xff] %v322_v22  ;;  %v450_v22 = vld [vmem:[%s3421_s25 + $0x950] sm:$0xff] }
  0x67   : > { %325 = vst [vmem:[%s3426_s26 + $0x2b8] sm:$0xff] %v324_v23  ;;  %v452_v23 = vld [vmem:[%s3421_s25 + $0x958] sm:$0xff] }
  0x68   : > { %327 = vst [vmem:[%s3426_s26 + $0x2c0] sm:$0xff] %v326_v24  ;;  %v454_v24 = vld [vmem:[%s3421_s25 + $0x980] sm:$0xff] }
  0x69   : > { %329 = vst [vmem:[%s3426_s26 + $0x2c8] sm:$0xff] %v328_v25  ;;  %v456_v25 = vld [vmem:[%s3421_s25 + $0x988] sm:$0xff] }
  0x6a   : > { %331 = vst [vmem:[%s3426_s26 + $0x2d0] sm:$0xff] %v330_v26  ;;  %v458_v26 = vld [vmem:[%s3421_s25 + $0x990] sm:$0xff] }
  0x6b   : > { %333 = vst [vmem:[%s3426_s26 + $0x2d8] sm:$0xff] %v332_v27  ;;  %v460_v27 = vld [vmem:[%s3421_s25 + $0x998] sm:$0xff] }
  0x6c   : > { %335 = vst [vmem:[%s3426_s26 + $0x2e0] sm:$0xff] %v334_v28  ;;  %v462_v28 = vld [vmem:[%s3421_s25 + $0x9c0] sm:$0xff] }
  0x6d   : > { %337 = vst [vmem:[%s3426_s26 + $0x2e8] sm:$0xff] %v336_v29  ;;  %v464_v29 = vld [vmem:[%s3421_s25 + $0x9c8] sm:$0xff] }
  0x6e   : > { %339 = vst [vmem:[%s3426_s26 + $0x2f0] sm:$0xff] %v338_v30  ;;  %v466_v30 = vld [vmem:[%s3421_s25 + $0x9d0] sm:$0xff] }
  0x6f   : > { %341 = vst [vmem:[%s3426_s26 + $0x2f8] sm:$0xff] %v340_v31  ;;  %v468_v31 = vld [vmem:[%s3421_s25 + $0x9d8] sm:$0xff] }
  0x70   : > { %343 = vst [vmem:[%s3426_s26 + $0x300] sm:$0xff] %v342_v32  ;;  %v470_v32 = vld [vmem:[%s3421_s25 + $0xa00] sm:$0xff] }
  0x71   : > { %345 = vst [vmem:[%s3426_s26 + $0x308] sm:$0xff] %v344_v33  ;;  %v472_v33 = vld [vmem:[%s3421_s25 + $0xa08] sm:$0xff] }
  0x72   : > { %347 = vst [vmem:[%s3426_s26 + $0x310] sm:$0xff] %v346_v34  ;;  %v474_v34 = vld [vmem:[%s3421_s25 + $0xa10] sm:$0xff] }
  0x73   : > { %349 = vst [vmem:[%s3426_s26 + $0x318] sm:$0xff] %v348_v35  ;;  %v476_v35 = vld [vmem:[%s3421_s25 + $0xa18] sm:$0xff] }
  0x74   : > { %351 = vst [vmem:[%s3426_s26 + $0x320] sm:$0xff] %v350_v36  ;;  %v478_v36 = vld [vmem:[%s3421_s25 + $0xa40] sm:$0xff] }
  0x75   : > { %353 = vst [vmem:[%s3426_s26 + $0x328] sm:$0xff] %v352_v37  ;;  %v480_v37 = vld [vmem:[%s3421_s25 + $0xa48] sm:$0xff] }
  0x76   : > { %355 = vst [vmem:[%s3426_s26 + $0x330] sm:$0xff] %v354_v38  ;;  %v482_v38 = vld [vmem:[%s3421_s25 + $0xa50] sm:$0xff] }
  0x77   : > { %357 = vst [vmem:[%s3426_s26 + $0x338] sm:$0xff] %v356_v39  ;;  %v484_v39 = vld [vmem:[%s3421_s25 + $0xa58] sm:$0xff] }
  0x78   : > { %359 = vst [vmem:[%s3426_s26 + $0x340] sm:$0xff] %v358_v40  ;;  %v486_v40 = vld [vmem:[%s3421_s25 + $0xa80] sm:$0xff] }
  0x79   : > { %361 = vst [vmem:[%s3426_s26 + $0x348] sm:$0xff] %v360_v41  ;;  %v488_v41 = vld [vmem:[%s3421_s25 + $0xa88] sm:$0xff] }
  0x7a   : > { %363 = vst [vmem:[%s3426_s26 + $0x350] sm:$0xff] %v362_v42  ;;  %v490_v42 = vld [vmem:[%s3421_s25 + $0xa90] sm:$0xff] }
  0x7b   : > { %365 = vst [vmem:[%s3426_s26 + $0x358] sm:$0xff] %v364_v43  ;;  %v492_v43 = vld [vmem:[%s3421_s25 + $0xa98] sm:$0xff] }
  0x7c   : > { %367 = vst [vmem:[%s3426_s26 + $0x360] sm:$0xff] %v366_v44  ;;  %v494_v44 = vld [vmem:[%s3421_s25 + $0xac0] sm:$0xff] }
  0x7d   : > { %369 = vst [vmem:[%s3426_s26 + $0x368] sm:$0xff] %v368_v45  ;;  %v496_v45 = vld [vmem:[%s3421_s25 + $0xac8] sm:$0xff] }
  0x7e   : > { %371 = vst [vmem:[%s3426_s26 + $0x370] sm:$0xff] %v370_v46  ;;  %v498_v46 = vld [vmem:[%s3421_s25 + $0xad0] sm:$0xff] }
  0x7f   : > { %373 = vst [vmem:[%s3426_s26 + $0x378] sm:$0xff] %v372_v47  ;;  %v500_v47 = vld [vmem:[%s3421_s25 + $0xad8] sm:$0xff] }
  0x80   : > { %375 = vst [vmem:[%s3426_s26 + $0x380] sm:$0xff] %v374_v48  ;;  %v502_v48 = vld [vmem:[%s3421_s25 + $0xb00] sm:$0xff] }
  0x81   : > { %377 = vst [vmem:[%s3426_s26 + $0x388] sm:$0xff] %v376_v49  ;;  %v504_v49 = vld [vmem:[%s3421_s25 + $0xb08] sm:$0xff] }
  0x82   : > { %379 = vst [vmem:[%s3426_s26 + $0x390] sm:$0xff] %v378_v50  ;;  %v506_v50 = vld [vmem:[%s3421_s25 + $0xb10] sm:$0xff] }
  0x83   : > { %381 = vst [vmem:[%s3426_s26 + $0x398] sm:$0xff] %v380_v51  ;;  %v508_v51 = vld [vmem:[%s3421_s25 + $0xb18] sm:$0xff] }
  0x84   : > { %383 = vst [vmem:[%s3426_s26 + $0x3a0] sm:$0xff] %v382_v52  ;;  %v510_v52 = vld [vmem:[%s3421_s25 + $0xb40] sm:$0xff] }
  0x85   : > { %385 = vst [vmem:[%s3426_s26 + $0x3a8] sm:$0xff] %v384_v53  ;;  %v512_v53 = vld [vmem:[%s3421_s25 + $0xb48] sm:$0xff] }
  0x86   : > { %387 = vst [vmem:[%s3426_s26 + $0x3b0] sm:$0xff] %v386_v54  ;;  %v514_v54 = vld [vmem:[%s3421_s25 + $0xb50] sm:$0xff] }
  0x87   : > { %389 = vst [vmem:[%s3426_s26 + $0x3b8] sm:$0xff] %v388_v55  ;;  %v516_v55 = vld [vmem:[%s3421_s25 + $0xb58] sm:$0xff] }
  0x88   : > { %391 = vst [vmem:[%s3426_s26 + $0x3c0] sm:$0xff] %v390_v56  ;;  %v518_v56 = vld [vmem:[%s3421_s25 + $0xb80] sm:$0xff] }
  0x89   : > { %393 = vst [vmem:[%s3426_s26 + $0x3c8] sm:$0xff] %v392_v57  ;;  %v520_v57 = vld [vmem:[%s3421_s25 + $0xb88] sm:$0xff] }
  0x8a   : > { %395 = vst [vmem:[%s3426_s26 + $0x3d0] sm:$0xff] %v394_v58  ;;  %v522_v58 = vld [vmem:[%s3421_s25 + $0xb90] sm:$0xff] }
  0x8b   : > { %397 = vst [vmem:[%s3426_s26 + $0x3d8] sm:$0xff] %v396_v59  ;;  %v524_v59 = vld [vmem:[%s3421_s25 + $0xb98] sm:$0xff] }
  0x8c   : > { %399 = vst [vmem:[%s3426_s26 + $0x3e0] sm:$0xff] %v398_v60  ;;  %v526_v60 = vld [vmem:[%s3421_s25 + $0xbc0] sm:$0xff] }
  0x8d   : > { %401 = vst [vmem:[%s3426_s26 + $0x3e8] sm:$0xff] %v400_v61  ;;  %v528_v61 = vld [vmem:[%s3421_s25 + $0xbc8] sm:$0xff] }
  0x8e   : > { %403 = vst [vmem:[%s3426_s26 + $0x3f0] sm:$0xff] %v402_v62  ;;  %v530_v62 = vld [vmem:[%s3421_s25 + $0xbd0] sm:$0xff] }
  0x8f   : > { %405 = vst [vmem:[%s3426_s26 + $0x3f8] sm:$0xff] %v404_v63  ;;  %v532_v63 = vld [vmem:[%s3421_s25 + $0xbd8] sm:$0xff] }
  0x90   : > { %407 = vst [vmem:[%s3426_s26 + $0x400] sm:$0xff] %v406_v0  ;;  %v534_v0 = vld [vmem:[%s3421_s25 + $0xc00] sm:$0xff] }
  0x91   : > { %409 = vst [vmem:[%s3426_s26 + $0x408] sm:$0xff] %v408_v1  ;;  %v536_v1 = vld [vmem:[%s3421_s25 + $0xc08] sm:$0xff] }
  0x92   : > { %411 = vst [vmem:[%s3426_s26 + $0x410] sm:$0xff] %v410_v2  ;;  %v538_v2 = vld [vmem:[%s3421_s25 + $0xc10] sm:$0xff] }
  0x93   : > { %413 = vst [vmem:[%s3426_s26 + $0x418] sm:$0xff] %v412_v3  ;;  %v540_v3 = vld [vmem:[%s3421_s25 + $0xc18] sm:$0xff] }
  0x94   : > { %415 = vst [vmem:[%s3426_s26 + $0x420] sm:$0xff] %v414_v4 }
  0x95   : > { %417 = vst [vmem:[%s3426_s26 + $0x428] sm:$0xff] %v416_v5 }
  0x96   : > { %419 = vst [vmem:[%s3426_s26 + $0x430] sm:$0xff] %v418_v6 }
  0x97   : > { %421 = vst [vmem:[%s3426_s26 + $0x438] sm:$0xff] %v420_v7 }
  0x98   : > { %423 = vst [vmem:[%s3426_s26 + $0x440] sm:$0xff] %v422_v8 }
  0x99   : > { %425 = vst [vmem:[%s3426_s26 + $0x448] sm:$0xff] %v424_v9 }
  0x9a   : > { %427 = vst [vmem:[%s3426_s26 + $0x450] sm:$0xff] %v426_v10 }
  0x9b   : > { %429 = vst [vmem:[%s3426_s26 + $0x458] sm:$0xff] %v428_v11 }
  0x9c   : > { %431 = vst [vmem:[%s3426_s26 + $0x460] sm:$0xff] %v430_v12 }
  0x9d   : > { %433 = vst [vmem:[%s3426_s26 + $0x468] sm:$0xff] %v432_v13 }
  0x9e   : > { %435 = vst [vmem:[%s3426_s26 + $0x470] sm:$0xff] %v434_v14 }
  0x9f   : > { %437 = vst [vmem:[%s3426_s26 + $0x478] sm:$0xff] %v436_v15 }
  0xa0   : > { %439 = vst [vmem:[%s3426_s26 + $0x480] sm:$0xff] %v438_v16 }
  0xa1   : > { %441 = vst [vmem:[%s3426_s26 + $0x488] sm:$0xff] %v440_v17 }
  0xa2   : > { %443 = vst [vmem:[%s3426_s26 + $0x490] sm:$0xff] %v442_v18 }
  0xa3   : > { %445 = vst [vmem:[%s3426_s26 + $0x498] sm:$0xff] %v444_v19 }
  0xa4   : > { %447 = vst [vmem:[%s3426_s26 + $0x4a0] sm:$0xff] %v446_v20 }
  0xa5   : > { %449 = vst [vmem:[%s3426_s26 + $0x4a8] sm:$0xff] %v448_v21 }
  0xa6   : > { %451 = vst [vmem:[%s3426_s26 + $0x4b0] sm:$0xff] %v450_v22 }
  0xa7   : > { %453 = vst [vmem:[%s3426_s26 + $0x4b8] sm:$0xff] %v452_v23 }
  0xa8   : > { %455 = vst [vmem:[%s3426_s26 + $0x4c0] sm:$0xff] %v454_v24 }
  0xa9   : > { %457 = vst [vmem:[%s3426_s26 + $0x4c8] sm:$0xff] %v456_v25 }
  0xaa   : > { %459 = vst [vmem:[%s3426_s26 + $0x4d0] sm:$0xff] %v458_v26 }
  0xab   : > { %461 = vst [vmem:[%s3426_s26 + $0x4d8] sm:$0xff] %v460_v27 }
  0xac   : > { %463 = vst [vmem:[%s3426_s26 + $0x4e0] sm:$0xff] %v462_v28 }
  0xad   : > { %465 = vst [vmem:[%s3426_s26 + $0x4e8] sm:$0xff] %v464_v29 }
  0xae   : > { %467 = vst [vmem:[%s3426_s26 + $0x4f0] sm:$0xff] %v466_v30 }
  0xaf   : > { %469 = vst [vmem:[%s3426_s26 + $0x4f8] sm:$0xff] %v468_v31 }
  0xb0   : > { %471 = vst [vmem:[%s3426_s26 + $0x500] sm:$0xff] %v470_v32 }
  0xb1   : > { %473 = vst [vmem:[%s3426_s26 + $0x508] sm:$0xff] %v472_v33 }
  0xb2   : > { %475 = vst [vmem:[%s3426_s26 + $0x510] sm:$0xff] %v474_v34 }
  0xb3   : > { %477 = vst [vmem:[%s3426_s26 + $0x518] sm:$0xff] %v476_v35 }
  0xb4   : > { %479 = vst [vmem:[%s3426_s26 + $0x520] sm:$0xff] %v478_v36 }
  0xb5   : > { %481 = vst [vmem:[%s3426_s26 + $0x528] sm:$0xff] %v480_v37 }
  0xb6   : > { %483 = vst [vmem:[%s3426_s26 + $0x530] sm:$0xff] %v482_v38 }
  0xb7   : > { %485 = vst [vmem:[%s3426_s26 + $0x538] sm:$0xff] %v484_v39 }
  0xb8   : > { %487 = vst [vmem:[%s3426_s26 + $0x540] sm:$0xff] %v486_v40 }
  0xb9   : > { %489 = vst [vmem:[%s3426_s26 + $0x548] sm:$0xff] %v488_v41 }
  0xba   : > { %491 = vst [vmem:[%s3426_s26 + $0x550] sm:$0xff] %v490_v42 }
  0xbb   : > { %493 = vst [vmem:[%s3426_s26 + $0x558] sm:$0xff] %v492_v43 }
  0xbc   : > { %495 = vst [vmem:[%s3426_s26 + $0x560] sm:$0xff] %v494_v44 }
  0xbd   : > { %497 = vst [vmem:[%s3426_s26 + $0x568] sm:$0xff] %v496_v45 }
  0xbe   : > { %499 = vst [vmem:[%s3426_s26 + $0x570] sm:$0xff] %v498_v46 }
  0xbf   : > { %501 = vst [vmem:[%s3426_s26 + $0x578] sm:$0xff] %v500_v47 }
  0xc0   : > { %503 = vst [vmem:[%s3426_s26 + $0x580] sm:$0xff] %v502_v48 }
  0xc1   : > { %505 = vst [vmem:[%s3426_s26 + $0x588] sm:$0xff] %v504_v49 }
  0xc2   : > { %507 = vst [vmem:[%s3426_s26 + $0x590] sm:$0xff] %v506_v50 }
  0xc3   : > { %509 = vst [vmem:[%s3426_s26 + $0x598] sm:$0xff] %v508_v51 }
  0xc4   : > { %511 = vst [vmem:[%s3426_s26 + $0x5a0] sm:$0xff] %v510_v52 }
  0xc5   : > { %513 = vst [vmem:[%s3426_s26 + $0x5a8] sm:$0xff] %v512_v53 }
  0xc6   : > { %515 = vst [vmem:[%s3426_s26 + $0x5b0] sm:$0xff] %v514_v54 }
  0xc7   : > { %517 = vst [vmem:[%s3426_s26 + $0x5b8] sm:$0xff] %v516_v55 }
  0xc8   : > { %519 = vst [vmem:[%s3426_s26 + $0x5c0] sm:$0xff] %v518_v56 }
  0xc9   : > { %521 = vst [vmem:[%s3426_s26 + $0x5c8] sm:$0xff] %v520_v57 }
  0xca   : > { %523 = vst [vmem:[%s3426_s26 + $0x5d0] sm:$0xff] %v522_v58 }
  0xcb   : > { %525 = vst [vmem:[%s3426_s26 + $0x5d8] sm:$0xff] %v524_v59 }
  0xcc   : > { %527 = vst [vmem:[%s3426_s26 + $0x5e0] sm:$0xff] %v526_v60 }
  0xcd   : > { %529 = vst [vmem:[%s3426_s26 + $0x5e8] sm:$0xff] %v528_v61 }
  0xce   : > { %531 = vst [vmem:[%s3426_s26 + $0x5f0] sm:$0xff] %v530_v62 }
  0xcf   : > { %533 = vst [vmem:[%s3426_s26 + $0x5f8] sm:$0xff] %v532_v63 }
  0xd0   : > { %535 = vst [vmem:[%s3426_s26 + $0x600] sm:$0xff] %v534_v0 }
  0xd1   : > { %537 = vst [vmem:[%s3426_s26 + $0x608] sm:$0xff] %v536_v1 }
  0xd2   : > { %539 = vst [vmem:[%s3426_s26 + $0x610] sm:$0xff] %v538_v2 }
  0xd3   : > { %541 = vst [vmem:[%s3426_s26 + $0x618] sm:$0xff] %v540_v3 }
  0xd4 PF: > { %p2320_p5 = scmp.ge.s32.totalorder %s3364_s14, 1  ;;  %p546_p6 = scmp.lt.s32.totalorder %s3364_s14, 3 }
  0xd6   : > { %p547_p7 = pnand %p2320_p5, %p546_p6 }
  0xd7   : > { %s553_s27 = sand.u32 (!%p547_p7), 1, %s3356_s12   ;;  %s2321_s7 = sshll.u32 (!%p547_p7), %s2314_s15, 3 }
  0xd8   : > { %550 = sbr.rel (%p547_p7) target bundleno = 595 (0x253), region = 51  ;;  %p578_p8 = scmp.lt.s32.totalorder (!%p547_p7), %s2321_s7, 15 }
  0xd9   : > { %s3295_s30 = smul.u32 (!%p547_p7), 1568, %s553_s27 }
  0xdb   : > { %s3823_s4 = scalar_lea.vmem (!%p547_p7), [#allocation2], %s3295_s30 }
  0xdd   : > { %v584_v4 = vld [vmem:[%s4343_s0] sm:$0xff]  ;;  %v2549_v5 = vld [vmem:[%s3823_s4 + $0x1c0] sm:$0xf]  ;;  %vm1779_vm0 = vcmask 1043456   ;;  %v3158_v21 = vld [vmem:[%s3823_s4 + $0x1c4] sm:$0xf] }
  0xde   : > { %788 = vst [vmem:[#allocation1] ss:$4 sm:$0xff] %v584_v4  ;;  %v3162_v6 = vld [vmem:[%s3823_s4 + $0x1dc] sm:$0xf0]  ;;  %v2551_v23 = vld [vmem:[%s3823_s4 + $0x1e0] sm:$0xf0] }
  0xdf   : > { %v3061_v7 = vld [vmem:[%s3823_s4 + $0x5c0] sm:$0xf]  ;;  %v2550_v8 = vor.u32 %v3162_v6, %v2549_v5  ;;  %v2554_v27 = vor.u32 %v3158_v21, %v2551_v23  ;;  %v3150_v33 = vld [vmem:[%s3823_s4 + $0x184] sm:$0xf]  ;;  %vm1776_vm1 = vcmask 64512   ;;  %s4351_s7 = smov (!%p578_p8, %s2321_s7), 15 }
  0xe0   : > { %v3290_v9 = vld [vmem:[%s3823_s4 + $0x5dc] sm:$0xf0]  ;;  %v2519_v34 = vld [vmem:[%s3823_s4 + $0x1a0] sm:$0xf0]  ;;  %s2322_s8 = sshll.u32 %s4351_s7, 2 }
  0xe1   : > { %v2805_v10 = vld [vmem:[%s3823_s4 + $0x3c0] sm:$0xf]  ;;  %v3062_v12 = vor.u32 %v3290_v9, %v3061_v7  ;;  %1804 = vmatpush.bf16.msra.mxu0 %v2550_v8  ;;  %v2522_v42 = vor.u32 %v3150_v33, %v2519_v34  ;;  %v3142_v46 = vld [vmem:[%s3823_s4 + $0x144] sm:$0xf]  ;;  %s4317_s11 = scalar_lea.vmem %s4346_s3, %s2322_s8 }
  0xe2   : > { %v3226_v11 = vld [vmem:[%s3823_s4 + $0x3dc] sm:$0xf0]  ;;  %v2487_v47 = vld [vmem:[%s3823_s4 + $0x160] sm:$0xf0] }
  0xe3   : > { %v2806_v13 = vor.u32 %v3226_v11, %v2805_v10  ;;  %v3832_v14 = vld [vmem:[%s3823_s4 + $0x600] sm:$0xff]  ;;  %1830 = vmatpush.bf16.msra.mxu2 %v3062_v12  ;;  %v2490_v54 = vor.u32 %v3142_v46, %v2487_v47 }
  0xe4   : > { %v2517_v15 = vld [vmem:[%s3823_s4 + $0x180] sm:$0xf]  ;;  %v1376_v17 = vunpack.c.l.b16 %v3832_v14  ;;  %v3134_v58 = vld [vmem:[%s3823_s4 + $0x104] sm:$0xf] }
  0xe5   : > { %v3154_v16 = vld [vmem:[%s3823_s4 + $0x19c] sm:$0xf0]  ;;  %1817 = vmatpush.bf16.msra.mxu1 %v2806_v13  ;;  %v2455_v59 = vld [vmem:[%s3823_s4 + $0x120] sm:$0xf0] }
  0xe6   : > { %v2518_v18 = vor.u32 %v3154_v16, %v2517_v15  ;;  %v3029_v19 = vld [vmem:[%s3823_s4 + $0x580] sm:$0xf]  ;;  %v1576_v26 = vpack.c.b16 %v1376_v17, %v1376_v17  ;;  %v2458_v4 = vor.u32 %v3134_v58, %v2455_v59  ;;  %v3126_v6 = vld [vmem:[%s3823_s4 + $0xc4] sm:$0xf]  ;;  %v3366_v16 = vmov 0  }
  0xe7   : > { %v3282_v20 = vld [vmem:[%s3823_s4 + $0x59c] sm:$0xf0]  ;;  %v2423_v7 = vld [vmem:[%s3823_s4 + $0xe0] sm:$0xf0]  ;;  %3321 = vset.pattern.permute.xlu0 %v3366_v16 }
  0xe8   : > { %v3030_v22 = vor.u32 %v3282_v20, %v3029_v19  ;;  %v2773_v24 = vld [vmem:[%s3823_s4 + $0x380] sm:$0xf]  ;;  %v1781_v35 = vsel %vm1779_vm0, %v1576_v26, 0  ;;  %1805 = vmatpush.bf16.msra.mxu0 %v2518_v18  ;;  %v3876_v10 = vld.sshfl [vmem:[#allocation1 + $0x18] sm:$0xff pattern:$0x73625140]  ;;  %v2426_v17 = vor.u32 %v3126_v6, %v2423_v7 }
  0xe9   : > { %v3218_v25 = vld [vmem:[%s3823_s4 + $0x39c] sm:$0xf0]  ;;  %1850 = vmatpush.bf16.msra.mxu3 %v1781_v35  ;;  %v3118_v21 = vld [vmem:[%s3823_s4 + $0x84] sm:$0xf]  ;;  %v3155_v7 = vld [vmem:[%s3823_s4 + $0x1a4] sm:$0xf0] }
  0xea   : > { %v2774_v28 = vor.u32 %v3218_v25, %v2773_v24  ;;  %v2485_v29 = vld [vmem:[%s3823_s4 + $0x140] sm:$0xf]  ;;  %1831 = vmatpush.bf16.msra.mxu2 %v3030_v22  ;;  %v2391_v22 = vld [vmem:[%s3823_s4 + $0xa0] sm:$0xf0] }
  0xeb   : > { %v3146_v30 = vld [vmem:[%s3823_s4 + $0x15c] sm:$0xf0]  ;;  %v3110_v33 = vld [vmem:[%s3823_s4 + $0x44] sm:$0xf] }
  0xec   : > { %v2997_v31 = vld [vmem:[%s3823_s4 + $0x540] sm:$0xf]  ;;  %v2486_v36 = vor.u32 %v3146_v30, %v2485_v29  ;;  %1818 = vmatpush.bf16.msra.mxu1 %v2774_v28  ;;  %3091 = vmatmul.msk.bf16.vlgmr.msra.gmra.mxu3 %vm1776_vm1, %v3876_v10  ;;  %v3222_v34 = vld [vmem:[%s3823_s4 + $0x3c4] sm:$0xf] }
  0xed   : > { %v3274_v32 = vld [vmem:[%s3823_s4 + $0x55c] sm:$0xf0]  ;;  %1856 = vmatpush.bf16.msrb.mxu3 %v2554_v27  ;;  %v2807_v35 = vld [vmem:[%s3823_s4 + $0x3e0] sm:$0xf0] }
  0xee   : > { %v2741_v37 = vld [vmem:[%s3823_s4 + $0x340] sm:$0xf]  ;;  %v2998_v39 = vor.u32 %v3274_v32, %v2997_v31  ;;  %1806 = vmatpush.bf16.msra.mxu0 %v2486_v36  ;;  %v2394_v31 = vor.u32 %v3118_v21, %v2391_v22  ;;  %v2359_v36 = vld [vmem:[%s3823_s4 + $0x60] sm:$0xf0]  ;;  %v3147_v21 = vld [vmem:[%s3823_s4 + $0x164] sm:$0xf0] }
  0xef   : > { %v3210_v38 = vld [vmem:[%s3823_s4 + $0x35c] sm:$0xf0]  ;;  %v2327_v46 = vld [vmem:[%s3823_s4 + $0x20] sm:$0xf0] }
  0xf0   : > { %v2453_v40 = vld [vmem:[%s3823_s4 + $0x100] sm:$0xf]  ;;  %v2742_v43 = vor.u32 %v3210_v38, %v2741_v37  ;;  %1832 = vmatpush.bf16.msra.mxu2 %v2998_v39  ;;  %v1377_v39 = vunpack.c.h.b16 %v3832_v14  ;;  %v3214_v47 = vld [vmem:[%s3823_s4 + $0x384] sm:$0xf] }
  0xf1   : > { %v3138_v41 = vld [vmem:[%s3823_s4 + $0x11c] sm:$0xf0]  ;;  %1857 = vmatpush.bf16.msrb.mxu3 %v2522_v42  ;;  %v3063_v42 = vld [vmem:[%s3823_s4 + $0x5e0] sm:$0xf0] }
  0xf2   : > { %v2965_v44 = vld [vmem:[%s3823_s4 + $0x500] sm:$0xf]  ;;  %v2454_v50 = vor.u32 %v3138_v41, %v2453_v40  ;;  %1819 = vmatpush.bf16.msra.mxu1 %v2742_v43  ;;  %v3286_v41 = vld [vmem:[%s3823_s4 + $0x5c4] sm:$0xf] }
  0xf3   : > { %v3266_v45 = vld [vmem:[%s3823_s4 + $0x51c] sm:$0xf0]  ;;  %v3031_v58 = vld [vmem:[%s3823_s4 + $0x5a0] sm:$0xf0] }
  0xf4   : > { %v2709_v48 = vld [vmem:[%s3823_s4 + $0x300] sm:$0xf]  ;;  %v2966_v51 = vor.u32 %v3266_v45, %v2965_v44  ;;  %1807 = vmatpush.bf16.msra.mxu0 %v2454_v50  ;;  %v2810_v44 = vor.u32 %v3222_v34, %v2807_v35  ;;  %v3102_v45 = vld [vmem:[%s3823_s4 + $0x4] sm:$0xf] }
  0xf5   : > { %v3202_v49 = vld [vmem:[%s3823_s4 + $0x31c] sm:$0xf0]  ;;  %1858 = vmatpush.bf16.msrb.mxu3 %v2490_v54  ;;  %v2775_v50 = vld [vmem:[%s3823_s4 + $0x3a0] sm:$0xf0]  ;;  %v3163_v54 = vld [vmem:[%s3823_s4 + $0x1e4] sm:$0xf0] }
  0xf6   : > { %v2421_v52 = vld [vmem:[%s3823_s4 + $0xc0] sm:$0xf]  ;;  %v2710_v55 = vor.u32 %v3202_v49, %v2709_v48  ;;  %1833 = vmatpush.bf16.msra.mxu2 %v2966_v51  ;;  %v2362_v48 = vor.u32 %v3110_v33, %v2359_v36  ;;  %v3904_v49 = vld.sshfl [vmem:[#allocation1] sm:$0xff pattern:$0x73625140]  ;;  %v2778_v59 = vor.u32 %v3214_v47, %v2775_v50 }
  0xf7   : > { %v3130_v53 = vld [vmem:[%s3823_s4 + $0xdc] sm:$0xf0]  ;;  %v3907_v51 = vld.sshfl [vmem:[#allocation1 + $0x10] sm:$0xff pattern:$0x73625140] }
  0xf8   : > { %v2933_v56 = vld [vmem:[%s3823_s4 + $0x4c0] sm:$0xf]  ;;  %v2422_v62 = vor.u32 %v3130_v53, %v2421_v52  ;;  %1820 = vmatpush.bf16.msra.mxu1 %v2710_v55  ;;  %v3066_v52 = vor.u32 %v3286_v41, %v3063_v42  ;;  %v2557_v53 = vld [vmem:[%s3823_s4 + $0x1c8] sm:$0xf]  ;;  %v3278_v55 = vld [vmem:[%s3823_s4 + $0x584] sm:$0xf] }
  0xf9   : > { %v3258_v57 = vld [vmem:[%s3823_s4 + $0x4dc] sm:$0xf0]  ;;  %1859 = vmatpush.bf16.msrb.mxu3 %v2458_v4  ;;  %v2711_v16 = vld [vmem:[%s3823_s4 + $0x320] sm:$0xf0]  ;;  %v3139_v33 = vld [vmem:[%s3823_s4 + $0x124] sm:$0xf0] }
  0xfa   : > { %v2677_v60 = vld [vmem:[%s3823_s4 + $0x2c0] sm:$0xf]  ;;  %v2934_v0 = vor.u32 %v3258_v57, %v2933_v56  ;;  %1808 = vmatpush.bf16.msra.mxu0 %v2422_v62  ;;  %v1577_v56 = vpack.c.b16 %v1377_v39, %v1377_v39  ;;  %v2330_v62 = vor.u32 %v3102_v45, %v2327_v46  ;;  %v3262_v22 = vld [vmem:[%s3823_s4 + $0x504] sm:$0xf]  ;;  %v3131_v45 = vld [vmem:[%s3823_s4 + $0xe4] sm:$0xf0] }
  0xfb   : > { %v3194_v61 = vld [vmem:[%s3823_s4 + $0x2dc] sm:$0xf0]  ;;  %v3254_v34 = vld [vmem:[%s3823_s4 + $0x4c4] sm:$0xf]  ;;  %v3195_v50 = vld [vmem:[%s3823_s4 + $0x2e4] sm:$0xf0] }
  0xfc   : > { %v2389_v63 = vld [vmem:[%s3823_s4 + $0x80] sm:$0xf]  ;;  %v2678_v5 = vor.u32 %v3194_v61, %v2677_v60  ;;  %1834 = vmatpush.bf16.msra.mxu2 %v2934_v0  ;;  %v2813_v60 = vld [vmem:[%s3823_s4 + $0x3c8] sm:$0xf]  ;;  %v2743_v0 = vld [vmem:[%s3823_s4 + $0x360] sm:$0xf0] }
  0xfd   : > { %v3122_v1 = vld [vmem:[%s3823_s4 + $0x9c] sm:$0xf0]  ;;  %1860 = vmatpush.bf16.msrb.mxu3 %v2426_v17  ;;  %v3227_v61 = vld [vmem:[%s3823_s4 + $0x3e4] sm:$0xf0]  ;;  %v1784_v4 = vsel %vm1779_vm0, %v1577_v56, 0 }
  0xfe   : > { %v2901_v2 = vld [vmem:[%s3823_s4 + $0x480] sm:$0xf]  ;;  %v2390_v11 = vor.u32 %v3122_v1, %v2389_v63  ;;  %1821 = vmatpush.bf16.msra.mxu1 %v2678_v5  ;;  %v3206_v63 = vld [vmem:[%s3823_s4 + $0x344] sm:$0xf]  ;;  %v781_v1 = vld [vmem:[%s4345_s2] sm:$0x7]  ;;  %v2814_v6 = vor.u32 %v3227_v61, %v2813_v60 }
  0xff   : > { %v3250_v3 = vld [vmem:[%s3823_s4 + $0x49c] sm:$0xf0]  ;;  %v2525_v5 = vld [vmem:[%s3823_s4 + $0x188] sm:$0xf]  ;;  %784 = vperm.xlu0 %3321, %v781_v1   ;;  %v2935_v35 = vld [vmem:[%s3823_s4 + $0x4e0] sm:$0xf0] }
 0x100   : > { %v2645_v8 = vld [vmem:[%s3823_s4 + $0x280] sm:$0xf]  ;;  %v2902_v12 = vor.u32 %v3250_v3, %v2901_v2  ;;  %1809 = vmatpush.bf16.msra.mxu0 %v2390_v11  ;;  %v2558_v2 = vor.u32 %v3163_v54, %v2557_v53  ;;  %v3034_v3 = vor.u32 %v3278_v55, %v3031_v58  ;;  %v2746_v11 = vor.u32 %v3206_v63, %v2743_v0  ;;  %v3182_v39 = vld [vmem:[%s3823_s4 + $0x284] sm:$0xf]  ;;  %v2397_v56 = vld [vmem:[%s3823_s4 + $0x88] sm:$0xf] }
 0x101   : > { %v3186_v9 = vld [vmem:[%s3823_s4 + $0x29c] sm:$0xf0]  ;;  %1861 = vmatpush.bf16.msrb.mxu3 %v2394_v31  ;;  %v2526_v17 = vor.u32 %v3155_v7, %v2525_v5  ;;  %v2461_v31 = vld [vmem:[%s3823_s4 + $0x108] sm:$0xf]  ;;  %v2938_v42 = vor.u32 %v3254_v34, %v2935_v35  ;;  %v3246_v46 = vld [vmem:[%s3823_s4 + $0x484] sm:$0xf] }
 0x102   : > { %v2357_v13 = vld [vmem:[%s3823_s4 + $0x40] sm:$0xf]  ;;  %v2646_v18 = vor.u32 %v3186_v9, %v2645_v8  ;;  %1835 = vmatpush.bf16.msra.mxu2 %v2902_v12  ;;  %v3270_v8 = vld [vmem:[%s3823_s4 + $0x544] sm:$0xf]  ;;  %v2781_v12 = vld [vmem:[%s3823_s4 + $0x388] sm:$0xf]  ;;  %v2462_v41 = vor.u32 %v3139_v33, %v2461_v31 }
 0x103   : > { %v3114_v15 = vld [vmem:[%s3823_s4 + $0x5c] sm:$0xf0]  ;;  %v2999_v9 = vld [vmem:[%s3823_s4 + $0x560] sm:$0xf0]  ;;  %v3961_v58 = vld [vmem:[%s3823_s4 + $0x608] sm:$0xff] }
 0x104   : > { %v2869_v19 = vld [vmem:[%s3823_s4 + $0x440] sm:$0xf]  ;;  %v2358_v25 = vor.u32 %v3114_v15, %v2357_v13  ;;  %1822 = vmatpush.bf16.msra.mxu1 %v2646_v18  ;;  %v3219_v13 = vld [vmem:[%s3823_s4 + $0x3a4] sm:$0xf0]  ;;  %v3198_v15 = vld [vmem:[%s3823_s4 + $0x304] sm:$0xf]  ;;  %v3002_v18 = vor.u32 %v3270_v8, %v2999_v9 }
 0x105   : > { %v3242_v20 = vld [vmem:[%s3823_s4 + $0x45c] sm:$0xf0]  ;;  %1862 = vmatpush.bf16.msrb.mxu3 %v2362_v48  ;;  %v2903_v47 = vld [vmem:[%s3823_s4 + $0x4a0] sm:$0xf0]  ;;  %v3123_v60 = vld [vmem:[%s3823_s4 + $0xa4] sm:$0xf0] }
 0x106   : > { %v2613_v23 = vld [vmem:[%s3823_s4 + $0x240] sm:$0xf]  ;;  %v2870_v27 = vor.u32 %v3242_v20, %v2869_v19  ;;  %1810 = vmatpush.bf16.msra.mxu0 %v2358_v25  ;;  %v2493_v19 = vld [vmem:[%s3823_s4 + $0x148] sm:$0xf]  ;;  %v2782_v20 = vor.u32 %v3219_v13, %v2781_v12  ;;  %v2615_v53 = vld [vmem:[%s3823_s4 + $0x260] sm:$0xf0]  ;;  %v2906_v55 = vor.u32 %v3246_v46, %v2903_v47  ;;  %v2398_v5 = vor.u32 %v3123_v60, %v2397_v56 }
 0x107   : > { %v3178_v24 = vld [vmem:[%s3823_s4 + $0x25c] sm:$0xf0]  ;;  %v2749_v25 = vld [vmem:[%s3823_s4 + $0x348] sm:$0xf]  ;;  %v3238_v61 = vld [vmem:[%s3823_s4 + $0x444] sm:$0xf] }
 0x108   : > { %v2325_v26 = vld [vmem:[%s3823_s4] sm:$0xf]  ;;  %v2614_v32 = vor.u32 %v3178_v24, %v2613_v23  ;;  %1836 = vmatpush.bf16.msra.mxu2 %v2870_v27  ;;  %v2967_v23 = vld [vmem:[%s3823_s4 + $0x520] sm:$0xf0]  ;;  %v2714_v24 = vor.u32 %v3198_v15, %v2711_v16  ;;  %v2653_v0 = vld [vmem:[%s3823_s4 + $0x288] sm:$0xf] }
 0x109   : > { %v3106_v28 = vld [vmem:[%s3823_s4 + $0x1c] sm:$0xf0]  ;;  %1863 = vmatpush.bf16.msrb.mxu3 %v2330_v62  ;;  %v3190_v27 = vld [vmem:[%s3823_s4 + $0x2c4] sm:$0xf]  ;;  %v3187_v1 = vld [vmem:[%s3823_s4 + $0x2a4] sm:$0xf0] }
 0x10a   : > { %v2837_v29 = vld [vmem:[%s3823_s4 + $0x400] sm:$0xf]  ;;  %v2326_v40 = vor.u32 %v3106_v28, %v2325_v26  ;;  %1823 = vmatpush.bf16.msra.mxu1 %v2614_v32  ;;  %v3211_v26 = vld [vmem:[%s3823_s4 + $0x364] sm:$0xf0]  ;;  %v2679_v28 = vld [vmem:[%s3823_s4 + $0x2e0] sm:$0xf0] }
 0x10b   : > { %v3234_v30 = vld [vmem:[%s3823_s4 + $0x41c] sm:$0xf0]  ;;  %v2750_v32 = vor.u32 %v3211_v26, %v2749_v25  ;;  %v2682_v36 = vor.u32 %v3190_v27, %v2679_v28  ;;  %v2871_v62 = vld [vmem:[%s3823_s4 + $0x460] sm:$0xf0]  ;;  %v2365_v7 = vld [vmem:[%s3823_s4 + $0x48] sm:$0xf] }
 0x10c   : > { %v2581_v37 = vld [vmem:[%s3823_s4 + $0x200] sm:$0xf]  ;;  %v2838_v43 = vor.u32 %v3234_v30, %v2837_v29  ;;  %1811 = vmatpush.bf16.msra.mxu0 %v2326_v40  ;;  %1864 = vmatmul.bf16.vlgmr.msrb.gmra.mxu3 %v3904_v49  ;;  %v2494_v29 = vor.u32 %v3147_v21, %v2493_v19  ;;  %v2970_v30 = vor.u32 %v3262_v22, %v2967_v23  ;;  %v2647_v40 = vld [vmem:[%s3823_s4 + $0x2a0] sm:$0xf0]  ;;  %v3069_v8 = vld [vmem:[%s3823_s4 + $0x5c8] sm:$0xf] }
 0x10d   : > { %v3170_v38 = vld [vmem:[%s3823_s4 + $0x21c] sm:$0xf0]  ;;  %1908 = vmatpush.bf16.msra.mxu3 %v2558_v2  ;;  %v2650_v48 = vor.u32 %v3182_v39, %v2647_v40  ;;  %v3166_v2 = vld [vmem:[%s3823_s4 + $0x204] sm:$0xf]  ;;  %v3291_v9 = vld [vmem:[%s3823_s4 + $0x5e4] sm:$0xf0] }
 0x10e   : > { %v2582_v14 = vor.u32 %v3170_v38, %v2581_v37  ;;  %v3912_v57 = vld.sshfl [vmem:[#allocation1 + $0x8] sm:$0xff pattern:$0x73625140]  ;;  %1837 = vmatpush.bf16.msra.mxu2 %v2838_v43  ;;  %v2717_v37 = vld [vmem:[%s3823_s4 + $0x308] sm:$0xf]  ;;  %v3070_v19 = vor.u32 %v3291_v9, %v3069_v8 }
 0x10f   : > { %1812 = vmatmul.bf16.vlgmr.msra.gmra.mxu0 %v3904_v49  ;;  %v3203_v38 = vld [vmem:[%s3823_s4 + $0x324] sm:$0xf0]  ;;  %v3230_v13 = vld [vmem:[%s3823_s4 + $0x404] sm:$0xf]  ;;  %v3159_v28 = vld [vmem:[%s3823_s4 + $0x1cc] sm:$0xf] }
 0x110   : > { %1869 = vmatpush.bf16.msrb.mxu0 %v2810_v44  ;;  %1824 = vmatpush.bf16.msra.mxu1 %v2582_v14  ;;  %v2429_v43 = vld [vmem:[%s3823_s4 + $0xc8] sm:$0xf]  ;;  %v2718_v44 = vor.u32 %v3203_v38, %v2717_v37  ;;  %v2839_v15 = vld [vmem:[%s3823_s4 + $0x420] sm:$0xf0]  ;;  %v2559_v31 = vld [vmem:[%s3823_s4 + $0x1e8] sm:$0xf0] }
 0x111   : > { %1838 = vmatmul.bf16.vlgmr.msra.gmra.mxu2 %v3907_v51  ;;  %1909 = vmatpush.bf16.msra.mxu3 %v2526_v17  ;;  %v2685_v14 = vld [vmem:[%s3823_s4 + $0x2c8] sm:$0xf]  ;;  %v2430_v54 = vor.u32 %v3131_v45, %v2429_v43  ;;  %v2842_v23 = vor.u32 %v3230_v13, %v2839_v15  ;;  %v3287_v35 = vld [vmem:[%s3823_s4 + $0x5cc] sm:$0xf] }
 0x112   : > { %1902 = vmatpush.bf16.msrb.mxu2 %v1784_v4  ;;  %v1378_v4 = vunpack.c.l.b16 %v3961_v58  ;;  %v3115_v12 = vld [vmem:[%s3823_s4 + $0x64] sm:$0xf0]  ;;  %v2783_v45 = vld [vmem:[%s3823_s4 + $0x3a8] sm:$0xf0] }
 0x113   : > { %1825 = vmatmul.bf16.vlgmr.msra.gmra.mxu1 %v3912_v57  ;;  %v2621_v17 = vld [vmem:[%s3823_s4 + $0x248] sm:$0xf]  ;;  %v2366_v22 = vor.u32 %v3115_v12, %v2365_v7  ;;  %v3151_v47 = vld [vmem:[%s3823_s4 + $0x18c] sm:$0xf] }
 0x114   : > { %1882 = vmatpush.bf16.msrb.mxu1 %v3066_v52  ;;  %1870 = vmatpush.bf16.msrb.mxu0 %v2778_v59  ;;  %v3174_v52 = vld [vmem:[%s3823_s4 + $0x244] sm:$0xf]  ;;  %v2686_v59 = vor.u32 %v3195_v50, %v2685_v14  ;;  %v1578_v21 = vpack.c.b16 %v1378_v4, %v1378_v4  ;;  %v3037_v25 = vld [vmem:[%s3823_s4 + $0x588] sm:$0xf]  ;;  %v3279_v50 = vld [vmem:[%s3823_s4 + $0x58c] sm:$0xf] }
 0x115   : > { %1910 = vmatpush.bf16.msra.mxu3 %v2494_v29  ;;  %v2618_v63 = vor.u32 %v3174_v52, %v2615_v53  ;;  %v3283_v26 = vld [vmem:[%s3823_s4 + $0x5a4] sm:$0xf0]  ;;  %v3223_v29 = vld [vmem:[%s3823_s4 + $0x3cc] sm:$0xf] }
 0x116   : > { %1921 = vmatpush.bf16.msra.mxu2 %v2814_v6  ;;  %v2874_v6 = vor.u32 %v3238_v61, %v2871_v62  ;;  %v3171_v33 = vld [vmem:[%s3823_s4 + $0x224] sm:$0xf0]  ;;  %v3038_v34 = vor.u32 %v3283_v26, %v3037_v25  ;;  %v1787_v37 = vsel %vm1779_vm0, %v1578_v21, 0  ;;  %v3039_v52 = vld [vmem:[%s3823_s4 + $0x5a8] sm:$0xf0] }
 0x117   : > { %v3005_v39 = vld [vmem:[%s3823_s4 + $0x548] sm:$0xf]  ;;  %v2751_v60 = vld [vmem:[%s3823_s4 + $0x368] sm:$0xf0]  ;;  %v3042_v61 = vor.u32 %v3279_v50, %v3039_v52 }
 0x118   : > { %1883 = vmatpush.bf16.msrb.mxu1 %v3034_v3  ;;  %1871 = vmatpush.bf16.msrb.mxu0 %v2746_v11  ;;  %v2583_v3 = vld [vmem:[%s3823_s4 + $0x220] sm:$0xf0]  ;;  %v2654_v11 = vor.u32 %v3187_v1, %v2653_v0  ;;  %v3275_v40 = vld [vmem:[%s3823_s4 + $0x564] sm:$0xf0]  ;;  %v3143_v62 = vld [vmem:[%s3823_s4 + $0x14c] sm:$0xf] }
 0x119   : > { %1911 = vmatpush.bf16.msra.mxu3 %v2462_v41  ;;  %v2586_v16 = vor.u32 %v3166_v2, %v2583_v3  ;;  %v3006_v14 = vor.u32 %v3275_v40, %v3005_v39  ;;  %v2973_v53 = vld [vmem:[%s3823_s4 + $0x508] sm:$0xf]  ;;  %v3271_v1 = vld [vmem:[%s3823_s4 + $0x54c] sm:$0xf] }
 0x11a   : > { %1922 = vmatpush.bf16.msra.mxu2 %v2782_v20  ;;  %v2333_v20 = vld [vmem:[%s3823_s4 + $0x8] sm:$0xf]  ;;  %v3007_v2 = vld [vmem:[%s3823_s4 + $0x568] sm:$0xf0] }
 0x11b   : > { %v2941_v3 = vld [vmem:[%s3823_s4 + $0x4c8] sm:$0xf]  ;;  %v3199_v7 = vld [vmem:[%s3823_s4 + $0x30c] sm:$0xf]  ;;  %v3010_v9 = vor.u32 %v3271_v1, %v3007_v2 }
 0x11c   : > { %1884 = vmatpush.bf16.msrb.mxu1 %v3002_v18  ;;  %1872 = vmatpush.bf16.msrb.mxu0 %v2714_v24  ;;  %v3179_v18 = vld [vmem:[%s3823_s4 + $0x264] sm:$0xf0]  ;;  %v2719_v8 = vld [vmem:[%s3823_s4 + $0x328] sm:$0xf0] }
 0x11d   : > { %1912 = vmatpush.bf16.msra.mxu3 %v2430_v54  ;;  %v3107_v24 = vld [vmem:[%s3823_s4 + $0x24] sm:$0xf0]  ;;  %v2622_v27 = vor.u32 %v3179_v18, %v2621_v17  ;;  %v2463_v12 = vld [vmem:[%s3823_s4 + $0x128] sm:$0xf0] }
 0x11e   : > { %1923 = vmatpush.bf16.msra.mxu2 %v2750_v32  ;;  %v2589_v32 = vld [vmem:[%s3823_s4 + $0x208] sm:$0xf]  ;;  %v2334_v38 = vor.u32 %v3107_v24, %v2333_v20  ;;  %v3263_v15 = vld [vmem:[%s3823_s4 + $0x50c] sm:$0xf] }
 0x11f   : > { %v2590_v43 = vor.u32 %v3171_v33, %v2589_v32  ;;  %v3267_v54 = vld [vmem:[%s3823_s4 + $0x524] sm:$0xf0]  ;;  %v3191_v21 = vld [vmem:[%s3823_s4 + $0x2cc] sm:$0xf] }
 0x120   : > { %1885 = vmatpush.bf16.msrb.mxu1 %v2970_v30  ;;  %1873 = vmatpush.bf16.msrb.mxu0 %v2682_v36  ;;  %v2815_v30 = vld [vmem:[%s3823_s4 + $0x3e8] sm:$0xf0]  ;;  %v2974_v0 = vor.u32 %v3267_v54, %v2973_v53  ;;  %v3259_v4 = vld [vmem:[%s3823_s4 + $0x4e4] sm:$0xf0] }
 0x121   : > { %3092 = vmatmul.msk.bf16.vlgmr.msrb.gmra.mxu2 %vm1776_vm1, %v3876_v10  ;;  %1913 = vmatpush.bf16.msra.mxu3 %v2398_v5  ;;  %v3071_v36 = vld [vmem:[%s3823_s4 + $0x5e8] sm:$0xf0]  ;;  %v2818_v41 = vor.u32 %v3223_v29, %v2815_v30  ;;  %v2942_v13 = vor.u32 %v3259_v4, %v2941_v3  ;;  %v2909_v17 = vld [vmem:[%s3823_s4 + $0x488] sm:$0xf] }
 0x122   : > { %1924 = vmatpush.bf16.msra.mxu2 %v2718_v44  ;;  %v3215_v44 = vld [vmem:[%s3823_s4 + $0x38c] sm:$0xf]  ;;  %v3074_v46 = vor.u32 %v3287_v35, %v3071_v36  ;;  %v3251_v18 = vld [vmem:[%s3823_s4 + $0x4a4] sm:$0xf0]  ;;  %v1379_v35 = vunpack.c.h.b16 %v3961_v58 }
 0x123   : > { %v3127_v24 = vld [vmem:[%s3823_s4 + $0xcc] sm:$0xf]  ;;  %v2910_v26 = vor.u32 %v3251_v18, %v2909_v17  ;;  %v2877_v29 = vld [vmem:[%s3823_s4 + $0x448] sm:$0xf]  ;;  %v3220_v17 = vld [vmem:[%s3823_s4 + $0x3ac] sm:$0xf0] }
 0x124   : > { %1886 = vmatpush.bf16.msrb.mxu1 %v2938_v42  ;;  %1874 = vmatpush.bf16.msrb.mxu0 %v2650_v48  ;;  %v2562_v42 = vor.u32 %v3159_v28, %v2559_v31  ;;  %v2527_v48 = vld [vmem:[%s3823_s4 + $0x1a8] sm:$0xf0]  ;;  %v3243_v30 = vld [vmem:[%s3823_s4 + $0x464] sm:$0xf0] }
 0x125   : > { %1914 = vmatpush.bf16.msra.mxu3 %v2366_v22  ;;  %v2530_v56 = vor.u32 %v3151_v47, %v2527_v48  ;;  %v2687_v22 = vld [vmem:[%s3823_s4 + $0x2e8] sm:$0xf0]  ;;  %v2878_v39 = vor.u32 %v3243_v30, %v2877_v29  ;;  %v3235_v58 = vld [vmem:[%s3823_s4 + $0x424] sm:$0xf0]  ;;  %v1579_v47 = vpack.c.b16 %v1379_v35, %v1379_v35  ;;  %v4046_v48 = vld [vmem:[%s3823_s4 + $0x610] sm:$0xff] }
 0x126   : > { %1925 = vmatpush.bf16.msra.mxu2 %v2686_v59  ;;  %v3207_v59 = vld [vmem:[%s3823_s4 + $0x34c] sm:$0xf]  ;;  %v2690_v31 = vor.u32 %v3191_v21, %v2687_v22  ;;  %v2533_v22 = vld [vmem:[%s3823_s4 + $0x190] sm:$0xf] }
 0x127   : > { %v2754_v5 = vor.u32 %v3207_v59, %v2751_v60  ;;  %v2431_v25 = vld [vmem:[%s3823_s4 + $0xe8] sm:$0xf0]  ;;  %v1790_v1 = vsel %vm1779_vm0, %v1579_v47, 0  ;;  %v2757_v30 = vld [vmem:[%s3823_s4 + $0x350] sm:$0xf] }
 0x128   : > { %1887 = vmatpush.bf16.msrb.mxu1 %v2906_v55  ;;  %1875 = vmatpush.bf16.msrb.mxu0 %v2618_v63  ;;  %v2786_v55 = vor.u32 %v3215_v44, %v2783_v45  ;;  %v2495_v63 = vld [vmem:[%s3823_s4 + $0x168] sm:$0xf0]  ;;  %v2434_v32 = vor.u32 %v3127_v24, %v2431_v25  ;;  %v3284_v24 = vld [vmem:[%s3823_s4 + $0x5ac] sm:$0xf0] }
 0x129   : > { %1915 = vmatpush.bf16.msra.mxu3 %v2334_v38  ;;  %v2943_v28 = vld [vmem:[%s3823_s4 + $0x4e8] sm:$0xf0]  ;;  %v3156_v25 = vld [vmem:[%s3823_s4 + $0x1ac] sm:$0xf0] }
 0x12a   : > { %1926 = vmatpush.bf16.msra.mxu2 %v2654_v11  ;;  %v3135_v11 = vld [vmem:[%s3823_s4 + $0x10c] sm:$0xf]  ;;  %v2501_v35 = vld [vmem:[%s3823_s4 + $0x150] sm:$0xf] }
 0x12b   : > { %v2466_v20 = vor.u32 %v3135_v11, %v2463_v12  ;;  %v3183_v33 = vld [vmem:[%s3823_s4 + $0x28c] sm:$0xf]  ;;  %v3268_v47 = vld [vmem:[%s3823_s4 + $0x52c] sm:$0xf0] }
 0x12c   : > { %1888 = vmatpush.bf16.msrb.mxu1 %v2874_v6  ;;  %1876 = vmatpush.bf16.msrb.mxu0 %v2586_v16  ;;  %v2498_v6 = vor.u32 %v3143_v62, %v2495_v63  ;;  %v2975_v16 = vld [vmem:[%s3823_s4 + $0x528] sm:$0xf0]  ;;  %v3228_v62 = vld [vmem:[%s3823_s4 + $0x3ec] sm:$0xf0]  ;;  %v1380_v63 = vunpack.c.l.b16 %v4046_v48 }
 0x12d   : > { %1960 = vmatpush.bf16.msrb.mxu3 %v2562_v42  ;;  %v2399_v38 = vld [vmem:[%s3823_s4 + $0xa8] sm:$0xf0]  ;;  %v2845_v42 = vld [vmem:[%s3823_s4 + $0x408] sm:$0xf] }
 0x12e   : > { %1927 = vmatpush.bf16.msra.mxu2 %v2622_v27  ;;  %1916 = vmatmul.bf16.vlgmr.msra.gmra.mxu3 %v3904_v49  ;;  %v3255_v27 = vld [vmem:[%s3823_s4 + $0x4cc] sm:$0xf]  ;;  %v2846_v53 = vor.u32 %v3235_v58, %v2845_v42  ;;  %v2725_v42 = vld [vmem:[%s3823_s4 + $0x310] sm:$0xf] }
 0x12f   : > { %1877 = vmatmul.bf16.vlgmr.msrb.gmra.mxu0 %v3912_v57  ;;  %v2946_v36 = vor.u32 %v3255_v27, %v2943_v28  ;;  %v3247_v40 = vld [vmem:[%s3823_s4 + $0x48c] sm:$0xf]  ;;  %v2567_v27 = vld [vmem:[%s3823_s4 + $0x1f0] sm:$0xf0]  ;;  %v3204_v58 = vld [vmem:[%s3823_s4 + $0x32c] sm:$0xf0] }
 0x130   : > { %1934 = vmatpush.bf16.msra.mxu0 %v3070_v19  ;;  %1889 = vmatpush.bf16.msrb.mxu1 %v2842_v23  ;;  %v2722_v19 = vor.u32 %v3199_v7, %v2719_v8  ;;  %v2978_v23 = vor.u32 %v3263_v15, %v2975_v16  ;;  %v3175_v45 = vld [vmem:[%s3823_s4 + $0x24c] sm:$0xf]  ;;  %v3292_v7 = vld [vmem:[%s3823_s4 + $0x5ec] sm:$0xf0] }
 0x131   : > { %1961 = vmatpush.bf16.msrb.mxu3 %v2530_v56  ;;  %v3111_v50 = vld [vmem:[%s3823_s4 + $0x4c] sm:$0xf]  ;;  %v3164_v8 = vld [vmem:[%s3823_s4 + $0x1ec] sm:$0xf0] }
 0x132   : > { %1928 = vmatpush.bf16.msra.mxu2 %v2590_v43  ;;  %v2367_v52 = vld [vmem:[%s3823_s4 + $0x68] sm:$0xf0]  ;;  %v2789_v16 = vld [vmem:[%s3823_s4 + $0x390] sm:$0xf] }
 0x133   : > { %1890 = vmatmul.bf16.vlgmr.msrb.gmra.mxu1 %v3907_v51  ;;  %v3239_v54 = vld [vmem:[%s3823_s4 + $0x44c] sm:$0xf]  ;;  %v2790_v28 = vor.u32 %v3220_v17, %v2789_v16  ;;  %v3128_v16 = vld [vmem:[%s3823_s4 + $0xd4] sm:$0xf] }
 0x134   : > { %1954 = vmatpush.bf16.msra.mxu1 %v1787_v37  ;;  %1935 = vmatpush.bf16.msra.mxu0 %v3038_v34  ;;  %v2655_v34 = vld [vmem:[%s3823_s4 + $0x2a8] sm:$0xf0] }
 0x135   : > { %1929 = vmatmul.bf16.vlgmr.msra.gmra.mxu2 %v3912_v57  ;;  %1962 = vmatpush.bf16.msrb.mxu3 %v2498_v6  ;;  %v3119_v37 = vld [vmem:[%s3823_s4 + $0x8c] sm:$0xf]  ;;  %v2658_v43 = vor.u32 %v3183_v33, %v2655_v34  ;;  %v3077_v6 = vld [vmem:[%s3823_s4 + $0x5d0] sm:$0xf]  ;;  %v2534_v33 = vor.u32 %v3156_v25, %v2533_v22 }
 0x136   : > { %1986 = vmatpush.bf16.msrb.mxu2 %v3074_v46  ;;  %v2402_v44 = vor.u32 %v3119_v37, %v2399_v38  ;;  %v2623_v46 = vld [vmem:[%s3823_s4 + $0x268] sm:$0xf0]  ;;  %v3276_v37 = vld [vmem:[%s3823_s4 + $0x56c] sm:$0xf0] }
 0x137   : > { %v3103_v56 = vld [vmem:[%s3823_s4 + $0xc] sm:$0xf]  ;;  %v2626_v60 = vor.u32 %v3175_v45, %v2623_v46  ;;  %v3148_v38 = vld [vmem:[%s3823_s4 + $0x16c] sm:$0xf0] }
 0x138   : > { %1973 = vmatpush.bf16.msrb.mxu1 %v2818_v41  ;;  %1936 = vmatpush.bf16.msra.mxu0 %v3006_v14  ;;  %v2911_v41 = vld [vmem:[%s3823_s4 + $0x4a8] sm:$0xf0]  ;;  %v2981_v46 = vld [vmem:[%s3823_s4 + $0x510] sm:$0xf] }
 0x139   : > { %1963 = vmatpush.bf16.msrb.mxu3 %v2466_v20  ;;  %v2914_v14 = vor.u32 %v3247_v40, %v2911_v41  ;;  %v2335_v59 = vld [vmem:[%s3823_s4 + $0x28] sm:$0xf0]  ;;  %v2535_v40 = vld [vmem:[%s3823_s4 + $0x1b0] sm:$0xf0] }
 0x13a   : > { %1987 = vmatpush.bf16.msrb.mxu2 %v3042_v61  ;;  %v2821_v61 = vld [vmem:[%s3823_s4 + $0x3d0] sm:$0xf]  ;;  %v3167_v2 = vld [vmem:[%s3823_s4 + $0x20c] sm:$0xf]  ;;  %v2338_v18 = vor.u32 %v3103_v56, %v2335_v59  ;;  %v2982_v59 = vor.u32 %v3268_v47, %v2981_v46 }
 0x13b   : > { %v2591_v3 = vld [vmem:[%s3823_s4 + $0x228] sm:$0xf0]  ;;  %v2822_v12 = vor.u32 %v3228_v62, %v2821_v61  ;;  %v3196_v56 = vld [vmem:[%s3823_s4 + $0x2ec] sm:$0xf0] }
 0x13c   : > { %1974 = vmatpush.bf16.msrb.mxu1 %v2786_v55  ;;  %1937 = vmatpush.bf16.msra.mxu0 %v2974_v0  ;;  %v2879_v55 = vld [vmem:[%s3823_s4 + $0x468] sm:$0xf0]  ;;  %v2370_v0 = vor.u32 %v3111_v50, %v2367_v52  ;;  %v2594_v15 = vor.u32 %v3167_v2, %v2591_v3  ;;  %v3140_v50 = vld [vmem:[%s3823_s4 + $0x12c] sm:$0xf0]  ;;  %v3144_v52 = vld [vmem:[%s3823_s4 + $0x154] sm:$0xf] }
 0x13d   : > { %1964 = vmatpush.bf16.msrb.mxu3 %v2434_v32  ;;  %v2882_v4 = vor.u32 %v3239_v54, %v2879_v55  ;;  %v2847_v11 = vld [vmem:[%s3823_s4 + $0x428] sm:$0xf0]  ;;  %v2503_v54 = vld [vmem:[%s3823_s4 + $0x170] sm:$0xf0]  ;;  %v2693_v55 = vld [vmem:[%s3823_s4 + $0x2d0] sm:$0xf] }
 0x13e   : > { %1988 = vmatpush.bf16.msrb.mxu2 %v3010_v9  ;;  %v3231_v9 = vld [vmem:[%s3823_s4 + $0x40c] sm:$0xf]  ;;  %v2949_v61 = vld [vmem:[%s3823_s4 + $0x4d0] sm:$0xf]  ;;  %v3136_v2 = vld [vmem:[%s3823_s4 + $0x114] sm:$0xf]  ;;  %v2694_v3 = vor.u32 %v3196_v56, %v2693_v55 }
 0x13f   : > { %v2850_v21 = vor.u32 %v3231_v9, %v2847_v11  ;;  %v3260_v62 = vld [vmem:[%s3823_s4 + $0x4ec] sm:$0xf0] }
 0x140   : > { %1975 = vmatpush.bf16.msrb.mxu1 %v2754_v5  ;;  %1938 = vmatpush.bf16.msra.mxu0 %v2942_v13  ;;  %v2565_v5 = vld [vmem:[%s3823_s4 + $0x1d0] sm:$0xf]  ;;  %v1580_v13 = vpack.c.b16 %v1380_v63, %v1380_v63  ;;  %v2506_v63 = vor.u32 %v3144_v52, %v2503_v54  ;;  %v3165_v54 = vld [vmem:[%s3823_s4 + $0x1f4] sm:$0xf0] }
 0x141   : > { %1965 = vmatpush.bf16.msrb.mxu3 %v2402_v44  ;;  %v2566_v20 = vor.u32 %v3164_v8, %v2565_v5  ;;  %v2502_v44 = vor.u32 %v3148_v38, %v2501_v35  ;;  %v2661_v5 = vld [vmem:[%s3823_s4 + $0x290] sm:$0xf]  ;;  %v3288_v35 = vld [vmem:[%s3823_s4 + $0x5d4] sm:$0xf] }
 0x142   : > { %1989 = vmatpush.bf16.msrb.mxu2 %v2978_v23  ;;  %v3045_v23 = vld [vmem:[%s3823_s4 + $0x590] sm:$0xf]  ;;  %v1793_v29 = vsel %vm1779_vm0, %v1580_v13, 0 }
 0x143   : > { %3093 = vmatmul.msk.bf16.vlgmr.msra.gmra.mxu1 %vm1776_vm1, %v3876_v10  ;;  %v3046_v32 = vor.u32 %v3284_v24, %v3045_v23  ;;  %v2917_v9 = vld [vmem:[%s3823_s4 + $0x490] sm:$0xf] }
 0x144   : > { %1976 = vmatpush.bf16.msrb.mxu1 %v2722_v19  ;;  %1939 = vmatpush.bf16.msra.mxu0 %v2910_v26  ;;  %v3078_v19 = vor.u32 %v3292_v7, %v3077_v6  ;;  %v3160_v26 = vld [vmem:[%s3823_s4 + $0x1d4] sm:$0xf]  ;;  %v3188_v6 = vld [vmem:[%s3823_s4 + $0x2ac] sm:$0xf0]  ;;  %v2950_v7 = vor.u32 %v3260_v62, %v2949_v61 }
 0x145   : > { %1966 = vmatpush.bf16.msrb.mxu3 %v2370_v0  ;;  %v2570_v34 = vor.u32 %v3160_v26, %v2567_v27  ;;  %v2437_v0 = vld [vmem:[%s3823_s4 + $0xd0] sm:$0xf]  ;;  %v2662_v17 = vor.u32 %v3188_v6, %v2661_v5  ;;  %v3104_v62 = vld [vmem:[%s3823_s4 + $0x14] sm:$0xf]  ;;  %v2541_v6 = vld [vmem:[%s3823_s4 + $0x198] sm:$0xf] }
 0x146   : > { %1990 = vmatpush.bf16.msrb.mxu2 %v2946_v36  ;;  %v3013_v36 = vld [vmem:[%s3823_s4 + $0x550] sm:$0xf]  ;;  %v3015_v5 = vld [vmem:[%s3823_s4 + $0x570] sm:$0xf0] }
 0x147   : > { %v3252_v11 = vld [vmem:[%s3823_s4 + $0x4ac] sm:$0xf0] }
 0x148   : > { %1977 = vmatpush.bf16.msrb.mxu1 %v2690_v31  ;;  %1940 = vmatpush.bf16.msra.mxu0 %v2878_v39  ;;  %v3212_v31 = vld [vmem:[%s3823_s4 + $0x36c] sm:$0xf0]  ;;  %v3152_v39 = vld [vmem:[%s3823_s4 + $0x194] sm:$0xf] }
 0x149   : > { %1967 = vmatpush.bf16.msrb.mxu3 %v2338_v18  ;;  %v2758_v41 = vor.u32 %v3212_v31, %v2757_v30  ;;  %v2538_v45 = vor.u32 %v3152_v39, %v2535_v40  ;;  %v2405_v13 = vld [vmem:[%s3823_s4 + $0x90] sm:$0xf]  ;;  %v2439_v18 = vld [vmem:[%s3823_s4 + $0xf0] sm:$0xf0]  ;;  %v1381_v30 = vunpack.c.h.b16 %v4046_v48 }
 0x14a   : > { %1991 = vmatpush.bf16.msrb.mxu2 %v2914_v14  ;;  %v2469_v14 = vld [vmem:[%s3823_s4 + $0x110] sm:$0xf]  ;;  %v2442_v25 = vor.u32 %v3128_v16, %v2439_v18  ;;  %v2407_v31 = vld [vmem:[%s3823_s4 + $0xb0] sm:$0xf0] }
 0x14b   : > { %v2885_v23 = vld [vmem:[%s3823_s4 + $0x450] sm:$0xf] }
 0x14c   : > { %1978 = vmatpush.bf16.msrb.mxu1 %v2658_v43  ;;  %1941 = vmatpush.bf16.msra.mxu0 %v2846_v53  ;;  %v3014_v43 = vor.u32 %v3276_v37, %v3013_v36  ;;  %v2726_v53 = vor.u32 %v3204_v58, %v2725_v42  ;;  %v3244_v24 = vld [vmem:[%s3823_s4 + $0x46c] sm:$0xf0]  ;;  %v3079_v36 = vld [vmem:[%s3823_s4 + $0x5f0] sm:$0xf0] }
 0x14d   : > { %2012 = vmatpush.bf16.msra.mxu3 %v2566_v20  ;;  %v3180_v20 = vld [vmem:[%s3823_s4 + $0x26c] sm:$0xf0]  ;;  %v3224_v42 = vld [vmem:[%s3823_s4 + $0x3d4] sm:$0xf]  ;;  %v3082_v46 = vor.u32 %v3288_v35, %v3079_v36 }
 0x14e   : > { %1992 = vmatpush.bf16.msrb.mxu2 %v2882_v4  ;;  %1968 = vmatmul.bf16.vlgmr.msrb.gmra.mxu3 %v3904_v49  ;;  %v2471_v4 = vld [vmem:[%s3823_s4 + $0x130] sm:$0xf0]  ;;  %v2373_v26 = vld [vmem:[%s3823_s4 + $0x50] sm:$0xf] }
 0x14f   : > { %1942 = vmatmul.bf16.vlgmr.msra.gmra.mxu0 %v3907_v51  ;;  %v3116_v27 = vld [vmem:[%s3823_s4 + $0x6c] sm:$0xf0]  ;;  %v3192_v35 = vld [vmem:[%s3823_s4 + $0x2d4] sm:$0xf] }
 0x150   : > { %1979 = vmatpush.bf16.msrb.mxu1 %v2626_v60  ;;  %2006 = vmatpush.bf16.msrb.mxu0 %v1790_v1  ;;  %v2470_v60 = vor.u32 %v3140_v50, %v2469_v14  ;;  %v3132_v1 = vld [vmem:[%s3823_s4 + $0xec] sm:$0xf0]  ;;  %v2374_v37 = vor.u32 %v3116_v27, %v2373_v26  ;;  %v3280_v14 = vld [vmem:[%s3823_s4 + $0x594] sm:$0xf]  ;;  %v2765_v26 = vld [vmem:[%s3823_s4 + $0x358] sm:$0xf] }
 0x151   : > { %2013 = vmatpush.bf16.msra.mxu3 %v2534_v33  ;;  %v2438_v8 = vor.u32 %v3132_v1, %v2437_v0  ;;  %v3172_v33 = vld [vmem:[%s3823_s4 + $0x22c] sm:$0xf0]  ;;  %v3047_v50 = vld [vmem:[%s3823_s4 + $0x5b0] sm:$0xf0]  ;;  %v2829_v0 = vld [vmem:[%s3823_s4 + $0x3d8] sm:$0xf] }
 0x152   : > { %1993 = vmatpush.bf16.msrb.mxu2 %v2850_v21  ;;  %v2918_v21 = vor.u32 %v3252_v11, %v2917_v9  ;;  %v2853_v38 = vld [vmem:[%s3823_s4 + $0x410] sm:$0xf]  ;;  %v3050_v1 = vor.u32 %v3280_v14, %v3047_v50  ;;  %v2695_v36 = vld [vmem:[%s3823_s4 + $0x2f0] sm:$0xf0]  ;;  %v3197_v14 = vld [vmem:[%s3823_s4 + $0x2f4] sm:$0xf0] }
 0x153   : > { %v3236_v48 = vld [vmem:[%s3823_s4 + $0x42c] sm:$0xf0] }
 0x154   : > { %2025 = vmatpush.bf16.msra.mxu0 %v2822_v12  ;;  %1980 = vmatpush.bf16.msrb.mxu1 %v2594_v15  ;;  %v2474_v12 = vor.u32 %v3136_v2, %v2471_v4  ;;  %v3124_v15 = vld [vmem:[%s3823_s4 + $0xac] sm:$0xf0]  ;;  %v2854_v47 = vor.u32 %v3236_v48, %v2853_v38  ;;  %v3229_v2 = vld [vmem:[%s3823_s4 + $0x3f4] sm:$0xf0]  ;;  %v3272_v4 = vld [vmem:[%s3823_s4 + $0x554] sm:$0xf] }
 0x155   : > { %1994 = vmatmul.bf16.vlgmr.msrb.gmra.mxu2 %v3907_v51  ;;  %2014 = vmatpush.bf16.msra.mxu3 %v2502_v44  ;;  %v2406_v22 = vor.u32 %v3124_v15, %v2405_v13  ;;  %v2341_v40 = vld [vmem:[%s3823_s4 + $0x10] sm:$0xf]  ;;  %v2823_v44 = vld [vmem:[%s3823_s4 + $0x3f0] sm:$0xf0]  ;;  %v2830_v11 = vor.u32 %v3229_v2, %v2829_v0  ;;  %v2797_v15 = vld [vmem:[%s3823_s4 + $0x398] sm:$0xf]  ;;  %v3018_v16 = vor.u32 %v3272_v4, %v3015_v5 }
 0x156   : > { %2058 = vmatpush.bf16.msra.mxu2 %v1793_v29  ;;  %v2826_v55 = vor.u32 %v3224_v42, %v2823_v44  ;;  %v2759_v13 = vld [vmem:[%s3823_s4 + $0x370] sm:$0xf0]  ;;  %v3205_v48 = vld [vmem:[%s3823_s4 + $0x334] sm:$0xf0] }
 0x157   : > { %1981 = vmatmul.bf16.vlgmr.msrb.gmra.mxu1 %v3912_v57  ;;  %v3133_v42 = vld [vmem:[%s3823_s4 + $0xf4] sm:$0xf0]  ;;  %v2855_v4 = vld [vmem:[%s3823_s4 + $0x430] sm:$0xf0] }
 0x158   : > { %2038 = vmatpush.bf16.msra.mxu1 %v3078_v19  ;;  %2026 = vmatpush.bf16.msra.mxu0 %v2790_v28  ;;  %v2629_v19 = vld [vmem:[%s3823_s4 + $0x250] sm:$0xf]  ;;  %v3120_v28 = vld [vmem:[%s3823_s4 + $0x94] sm:$0xf]  ;;  %v2381_v5 = vld [vmem:[%s3823_s4 + $0x58] sm:$0xf] }
 0x159   : > { %2015 = vmatpush.bf16.msra.mxu3 %v2470_v60  ;;  %v2630_v29 = vor.u32 %v3180_v20, %v2629_v19  ;;  %v2410_v39 = vor.u32 %v3120_v28, %v2407_v31  ;;  %v2791_v60 = vld [vmem:[%s3823_s4 + $0x3b0] sm:$0xf0]  ;;  %v2477_v31 = vld [vmem:[%s3823_s4 + $0x118] sm:$0xf] }
 0x15a   : > { %2064 = vmatpush.bf16.msrb.mxu2 %v2570_v34  ;;  %v2886_v34 = vor.u32 %v3244_v24, %v2885_v23  ;;  %v3264_v19 = vld [vmem:[%s3823_s4 + $0x514] sm:$0xf] }
 0x15b   : > { %v2983_v20 = vld [vmem:[%s3823_s4 + $0x530] sm:$0xf0] }
 0x15c   : > { %2039 = vmatpush.bf16.msra.mxu1 %v3046_v32  ;;  %2027 = vmatpush.bf16.msra.mxu0 %v2758_v41  ;;  %v2597_v32 = vld [vmem:[%s3823_s4 + $0x210] sm:$0xf]  ;;  %v3200_v24 = vld [vmem:[%s3823_s4 + $0x314] sm:$0xf]  ;;  %v2986_v27 = vor.u32 %v3264_v19, %v2983_v20  ;;  %v3181_v19 = vld [vmem:[%s3823_s4 + $0x274] sm:$0xf0] }
 0x15d   : > { %2016 = vmatpush.bf16.msra.mxu3 %v2438_v8  ;;  %v3108_v41 = vld [vmem:[%s3823_s4 + $0x2c] sm:$0xf0]  ;;  %v2598_v58 = vor.u32 %v3172_v33, %v2597_v32  ;;  %v3141_v32 = vld [vmem:[%s3823_s4 + $0x134] sm:$0xf0] }
 0x15e   : > { %2065 = vmatpush.bf16.msrb.mxu2 %v2538_v45  ;;  %v3112_v45 = vld [vmem:[%s3823_s4 + $0x54] sm:$0xf]  ;;  %v2342_v52 = vor.u32 %v3108_v41, %v2341_v40  ;;  %v2445_v41 = vld [vmem:[%s3823_s4 + $0xd8] sm:$0xf] }
 0x15f   : > { %3094 = vmatmul.msk.bf16.vlgmr.msrb.gmra.mxu0 %vm1776_vm1, %v3876_v10  ;;  %v3248_v40 = vld [vmem:[%s3823_s4 + $0x494] sm:$0xf]  ;;  %v2446_v50 = vor.u32 %v3133_v42, %v2445_v41  ;;  %v2799_v41 = vld [vmem:[%s3823_s4 + $0x3b8] sm:$0xf0] }
 0x160   : > { %2040 = vmatpush.bf16.msra.mxu1 %v3014_v43  ;;  %2028 = vmatpush.bf16.msra.mxu0 %v2726_v53  ;;  %v1581_v43 = vpack.c.b16 %v1381_v30, %v1381_v30  ;;  %v2573_v53 = vld [vmem:[%s3823_s4 + $0x1d8] sm:$0xf]  ;;  %v2951_v30 = vld [vmem:[%s3823_s4 + $0x4f0] sm:$0xf0] }
 0x161   : > { %2017 = vmatpush.bf16.msra.mxu3 %v2406_v22  ;;  %v3149_v22 = vld [vmem:[%s3823_s4 + $0x174] sm:$0xf0] }
 0x162   : > { %2066 = vmatpush.bf16.msrb.mxu2 %v2506_v63  ;;  %v1796_v61 = vsel %vm1779_vm0, %v1581_v43, 0  ;;  %v2343_v63 = vld [vmem:[%s3823_s4 + $0x30] sm:$0xf0]  ;;  %v4180_v43 = vld [vmem:[%s3823_s4 + $0x618] sm:$0xff] }
 0x163   : > { %v2346_v9 = vor.u32 %v3104_v62, %v2343_v63  ;;  %v2631_v62 = vld [vmem:[%s3823_s4 + $0x270] sm:$0xf0]  ;;  %v2669_v63 = vld [vmem:[%s3823_s4 + $0x298] sm:$0xf] }
 0x164   : > { %2041 = vmatpush.bf16.msra.mxu1 %v2982_v59  ;;  %2029 = vmatpush.bf16.msra.mxu0 %v2694_v3  ;;  %v3216_v59 = vld [vmem:[%s3823_s4 + $0x394] sm:$0xf]  ;;  %v2574_v3 = vor.u32 %v3165_v54, %v2573_v53  ;;  %v2413_v54 = vld [vmem:[%s3823_s4 + $0x98] sm:$0xf] }
 0x165   : > { %3095 = vmatmul.msk.bf16.vlgmr.msra.gmra.mxu2 %vm1776_vm1, %v3876_v10  ;;  %v2375_v10 = vld [vmem:[%s3823_s4 + $0x70] sm:$0xf0]  ;;  %2018 = vmatpush.bf16.msra.mxu3 %v2374_v37  ;;  %v2794_v8 = vor.u32 %v3216_v59, %v2791_v60  ;;  %v2733_v37 = vld [vmem:[%s3823_s4 + $0x318] sm:$0xf] }
 0x166   : > { %2067 = vmatpush.bf16.msrb.mxu2 %v2474_v12  ;;  %v2378_v56 = vor.u32 %v3112_v45, %v2375_v10  ;;  %v3208_v12 = vld [vmem:[%s3823_s4 + $0x354] sm:$0xf]  ;;  %v2734_v44 = vor.u32 %v3205_v48, %v2733_v37  ;;  %v3087_v37 = vld [vmem:[%s3823_s4 + $0x5f8] sm:$0xf0] }
 0x167   : > { %v3184_v45 = vld [vmem:[%s3823_s4 + $0x294] sm:$0xf]  ;;  %v3153_v48 = vld [vmem:[%s3823_s4 + $0x19c] sm:$0xf] }
 0x168   : > { %2042 = vmatpush.bf16.msra.mxu1 %v2950_v7  ;;  %2030 = vmatpush.bf16.msra.mxu0 %v2662_v17  ;;  %v3157_v7 = vld [vmem:[%s3823_s4 + $0x1b4] sm:$0xf0]  ;;  %v2663_v10 = vld [vmem:[%s3823_s4 + $0x2b0] sm:$0xf0] }
 0x169   : > { %2019 = vmatpush.bf16.msra.mxu3 %v2342_v52  ;;  %v3221_v17 = vld [vmem:[%s3823_s4 + $0x3b4] sm:$0xf0]  ;;  %v2542_v18 = vor.u32 %v3157_v7, %v2541_v6  ;;  %v3240_v52 = vld [vmem:[%s3823_s4 + $0x454] sm:$0xf]  ;;  %v2666_v59 = vor.u32 %v3184_v45, %v2663_v10 }
 0x16a   : > { %2068 = vmatpush.bf16.msrb.mxu2 %v2442_v25  ;;  %v2798_v23 = vor.u32 %v3221_v17, %v2797_v15  ;;  %v2727_v25 = vld [vmem:[%s3823_s4 + $0x330] sm:$0xf0]  ;;  %v3117_v6 = vld [vmem:[%s3823_s4 + $0x74] sm:$0xf0] }
 0x16b   : > { %v2730_v33 = vor.u32 %v3200_v24, %v2727_v25  ;;  %v2887_v53 = vld [vmem:[%s3823_s4 + $0x470] sm:$0xf0]  ;;  %v3085_v15 = vld [vmem:[%s3823_s4 + $0x5d8] sm:$0xf]  ;;  %v2382_v20 = vor.u32 %v3117_v6, %v2381_v5  ;;  %v3137_v5 = vld [vmem:[%s3823_s4 + $0x11c] sm:$0xf] }
 0x16c   : > { %2043 = vmatpush.bf16.msra.mxu1 %v2918_v21  ;;  %2031 = vmatpush.bf16.msra.mxu0 %v2630_v29  ;;  %v2509_v21 = vld [vmem:[%s3823_s4 + $0x158] sm:$0xf]  ;;  %v3256_v29 = vld [vmem:[%s3823_s4 + $0x4d4] sm:$0xf]  ;;  %v2890_v0 = vor.u32 %v3240_v52, %v2887_v53  ;;  %v3145_v53 = vld [vmem:[%s3823_s4 + $0x15c] sm:$0xf] }
 0x16d   : > { %2077 = vmatpush.bf16.msrb.mxu3 %v2826_v55  ;;  %v2510_v28 = vor.u32 %v3149_v22, %v2509_v21  ;;  %v2954_v38 = vor.u32 %v3256_v29, %v2951_v30  ;;  %v3125_v55 = vld [vmem:[%s3823_s4 + $0xb4] sm:$0xf0]  ;;  %v3161_v21 = vld [vmem:[%s3823_s4 + $0x1dc] sm:$0xf] }
 0x16e   : > { %2069 = vmatpush.bf16.msrb.mxu2 %v2410_v39  ;;  %2020 = vmatmul.bf16.vlgmr.msra.gmra.mxu3 %v3904_v49  ;;  %v2478_v39 = vor.u32 %v3141_v32, %v2477_v31  ;;  %v2414_v2 = vor.u32 %v3125_v55, %v2413_v54  ;;  %v2637_v17 = vld [vmem:[%s3823_s4 + $0x258] sm:$0xf]  ;;  %v2575_v22 = vld [vmem:[%s3823_s4 + $0x1f8] sm:$0xf0] }
 0x16f   : > { %v3109_v24 = vld [vmem:[%s3823_s4 + $0x34] sm:$0xf0]  ;;  %v4218_v31 = vpop.f32.mrf.mxu3  ;;  %v2511_v54 = vld [vmem:[%s3823_s4 + $0x178] sm:$0xf0] }
 0x170   : > { %2044 = vmatpush.bf16.msra.mxu1 %v2886_v34  ;;  %2032 = vmatpush.bf16.msra.mxu0 %v2598_v58  ;;  %v2698_v58 = vor.u32 %v3192_v35, %v2695_v36  ;;  %v3053_v29 = vld [vmem:[%s3823_s4 + $0x598] sm:$0xf]  ;;  %v2578_v35 = vor.u32 %v3161_v21, %v2575_v22  ;;  %v3209_v55 = vld [vmem:[%s3823_s4 + $0x35c] sm:$0xf] }
 0x171   : > { %2078 = vmatpush.bf16.msrb.mxu3 %v2794_v8  ;;  %v4199_v8 = vld.sshfl [vmem:[#allocation1 + $0x18] sm:$0xff pattern:$0x73625140]  ;;  %v3285_v30 = vld [vmem:[%s3823_s4 + $0x5b4] sm:$0xf0] }
 0x172   : > { %2070 = vmatpush.bf16.msrb.mxu2 %v2378_v56  ;;  %v1382_v56 = vunpack.c.l.b16 %v4180_v43  ;;  %v2605_v32 = vld [vmem:[%s3823_s4 + $0x218] sm:$0xf]  ;;  %v3054_v42 = vor.u32 %v3285_v30, %v3053_v29  ;;  %v2479_v6 = vld [vmem:[%s3823_s4 + $0x138] sm:$0xf0] }
 0x173   : > { %2033 = vmatmul.bf16.vlgmr.msra.gmra.mxu0 %v3912_v57  ;;  %v3213_v57 = vld [vmem:[%s3823_s4 + $0x374] sm:$0xf0]  ;;  %v3129_v22 = vld [vmem:[%s3823_s4 + $0xdc] sm:$0xf] }
 0x174   : > { %2090 = vmatpush.bf16.msrb.mxu0 %v3082_v46  ;;  %2045 = vmatpush.bf16.msra.mxu1 %v2854_v47  ;;  %v2766_v34 = vor.u32 %v3213_v57, %v2765_v26  ;;  %v2701_v46 = vld [vmem:[%s3823_s4 + $0x2d8] sm:$0xf]  ;;  %v1582_v7 = vpack.c.b16 %v1382_v56, %v1382_v56  ;;  %v3225_v26 = vld [vmem:[%s3823_s4 + $0x3dc] sm:$0xf] }
 0x175   : > { %v2702_v60 = vor.u32 %v3197_v14, %v2701_v46  ;;  %v3021_v45 = vld [vmem:[%s3823_s4 + $0x558] sm:$0xf]  ;;  %v3281_v46 = vld [vmem:[%s3823_s4 + $0x59c] sm:$0xf] }
 0x176   : > { %2071 = vmatpush.bf16.msrb.mxu2 %v2346_v9  ;;  %v3277_v10 = vld [vmem:[%s3823_s4 + $0x574] sm:$0xf0]  ;;  %v4234_v14 = vld.sshfl [vmem:[#allocation1 + $0x8] sm:$0xff pattern:$0x73625140] }
 0x177   : > { %2046 = vmatmul.bf16.vlgmr.msra.gmra.mxu1 %v3907_v51  ;;  %v2762_v51 = vor.u32 %v3208_v12, %v2759_v13  ;;  %v2599_v12 = vld [vmem:[%s3823_s4 + $0x230] sm:$0xf0]  ;;  %v2767_v56 = vld [vmem:[%s3823_s4 + $0x378] sm:$0xf0] }
 0x178   : > { %2110 = vmatpush.bf16.msrb.mxu1 %v1796_v61  ;;  %2091 = vmatpush.bf16.msrb.mxu0 %v3050_v1  ;;  %v3176_v61 = vld [vmem:[%s3823_s4 + $0x254] sm:$0xf]  ;;  %v3189_v1 = vld [vmem:[%s3823_s4 + $0x2b4] sm:$0xf0]  ;;  %v3257_v29 = vld [vmem:[%s3823_s4 + $0x4dc] sm:$0xf] }
 0x179   : > { %2072 = vmatmul.bf16.vlgmr.msrb.gmra.mxu2 %v3904_v49  ;;  %2079 = vmatpush.bf16.msrb.mxu3 %v2762_v51  ;;  %v2919_v49 = vld [vmem:[%s3823_s4 + $0x4b0] sm:$0xf0]  ;;  %v2634_v9 = vor.u32 %v3176_v61, %v2631_v62  ;;  %v2670_v13 = vor.u32 %v3189_v1, %v2669_v63  ;;  %v1799_v51 = vsel %vm1779_vm0, %v1582_v7, 0  ;;  %v2989_v63 = vld [vmem:[%s3823_s4 + $0x518] sm:$0xf] }
 0x17a   : > { %2129 = vmatpush.bf16.msra.mxu2 %v2830_v11  ;;  %v2922_v47 = vor.u32 %v3248_v40, %v2919_v49  ;;  %v3168_v11 = vld [vmem:[%s3823_s4 + $0x214] sm:$0xf]  ;;  %v4226_v40 = vld.sshfl [vmem:[#allocation1 + $0x10] sm:$0xff pattern:$0x73625140] }
 0x17b   : > { %v2602_v25 = vor.u32 %v3168_v11, %v2599_v12  ;;  %v3217_v49 = vld [vmem:[%s3823_s4 + $0x39c] sm:$0xf] }
 0x17c   : > { %2116 = vmatpush.bf16.msra.mxu1 %v2574_v3  ;;  %2092 = vmatpush.bf16.msrb.mxu0 %v3018_v16  ;;  %v3232_v3 = vld [vmem:[%s3823_s4 + $0x414] sm:$0xf]  ;;  %v3293_v16 = vld [vmem:[%s3823_s4 + $0x5f4] sm:$0xf0]  ;;  %v2802_v52 = vor.u32 %v3217_v49, %v2799_v41  ;;  %v3273_v1 = vld [vmem:[%s3823_s4 + $0x55c] sm:$0xf] }
 0x17d   : > { %2080 = vmatpush.bf16.msrb.mxu3 %v2730_v33  ;;  %v3086_v57 = vor.u32 %v3293_v16, %v3085_v15  ;;  %v3173_v33 = vld [vmem:[%s3823_s4 + $0x234] sm:$0xf0]  ;;  %v2735_v11 = vld [vmem:[%s3823_s4 + $0x338] sm:$0xf0] }
 0x17e   : > { %2130 = vmatpush.bf16.msra.mxu2 %v2798_v23  ;;  %v2349_v23 = vld [vmem:[%s3823_s4 + $0x18] sm:$0xf] }
 0x17f   : > { %v2350_v36 = vor.u32 %v3109_v24, %v2349_v23  ;;  %v4255_v12 = vld.sshfl [vmem:[#allocation1] sm:$0xff pattern:$0x73625140] }
 0x180   : > { %2117 = vmatpush.bf16.msra.mxu1 %v2542_v18  ;;  %2093 = vmatpush.bf16.msrb.mxu0 %v2986_v27  ;;  %v2858_v18 = vor.u32 %v3232_v3, %v2855_v4  ;;  %v2831_v27 = vld [vmem:[%s3823_s4 + $0x3f8] sm:$0xf0]  ;;  %v2770_v4 = vor.u32 %v3209_v55, %v2767_v56  ;;  %v2957_v16 = vld [vmem:[%s3823_s4 + $0x4d8] sm:$0xf] }
 0x181   : > { %2081 = vmatpush.bf16.msrb.mxu3 %v2698_v58  ;;  %v2606_v58 = vor.u32 %v3173_v33, %v2605_v32  ;;  %v3023_v3 = vld [vmem:[%s3823_s4 + $0x578] sm:$0xf0]  ;;  %v2893_v41 = vld [vmem:[%s3823_s4 + $0x458] sm:$0xf] }
 0x182   : > { %2131 = vmatpush.bf16.msra.mxu2 %v2766_v34  ;;  %v3289_v34 = vld [vmem:[%s3823_s4 + $0x5dc] sm:$0xf]  ;;  %v3026_v15 = vor.u32 %v3273_v1, %v3023_v3 }
 0x183   : > { %v3193_v23 = vld [vmem:[%s3823_s4 + $0x2dc] sm:$0xf] }
 0x184   : > { %2118 = vmatpush.bf16.msra.mxu1 %v2510_v28  ;;  %2094 = vmatpush.bf16.msrb.mxu0 %v2954_v38  ;;  %v2638_v28 = vor.u32 %v3181_v19, %v2637_v17  ;;  %v2834_v38 = vor.u32 %v3225_v26, %v2831_v27  ;;  %v3261_v17 = vld [vmem:[%s3823_s4 + $0x4f4] sm:$0xf0]  ;;  %v2482_v19 = vor.u32 %v3137_v5, %v2479_v6  ;;  %v2703_v24 = vld [vmem:[%s3823_s4 + $0x2f8] sm:$0xf0] }
 0x185   : > { %2082 = vmatpush.bf16.msrb.mxu3 %v2666_v59  ;;  %v3022_v59 = vor.u32 %v3277_v10, %v3021_v45  ;;  %v2958_v26 = vor.u32 %v3261_v17, %v2957_v16  ;;  %v2959_v33 = vld [vmem:[%s3823_s4 + $0x4f8] sm:$0xf0] }
 0x186   : > { %2132 = vmatpush.bf16.msra.mxu2 %v2734_v44  ;;  %v3090_v44 = vor.u32 %v3289_v34, %v3087_v37  ;;  %v2706_v34 = vor.u32 %v3193_v23, %v2703_v24  ;;  %v2962_v49 = vor.u32 %v3257_v29, %v2959_v33  ;;  %v2927_v10 = vld [vmem:[%s3823_s4 + $0x4b8] sm:$0xf0] }
 0x187   : > { %3096 = vmatmul.msk.bf16.vlgmr.msrb.gmra.mxu1 %vm1776_vm1, %v4199_v8  ;;  %v3105_v3 = vld [vmem:[%s3823_s4 + $0x1c] sm:$0xf] }
 0x188   : > { %2119 = vmatpush.bf16.msra.mxu1 %v2478_v39  ;;  %2095 = vmatpush.bf16.msrb.mxu0 %v2922_v47  ;;  %v2543_v39 = vld [vmem:[%s3823_s4 + $0x1b8] sm:$0xf0] }
 0x189   : > { %2083 = vmatpush.bf16.msrb.mxu3 %v2634_v9  ;;  %v2546_v47 = vor.u32 %v3153_v48, %v2543_v39  ;;  %v3201_v9 = vld [vmem:[%s3823_s4 + $0x31c] sm:$0xf] }
 0x18a   : > { %2133 = vmatpush.bf16.msra.mxu2 %v2702_v60  ;;  %v1854_v60 = vpop.f32.mrf.mxu3  ;;  %v2738_v21 = vor.u32 %v3201_v9, %v2735_v11  ;;  %v2671_v48 = vld [vmem:[%s3823_s4 + $0x2b8] sm:$0xf0]  ;;  %v4295_v9 = vpop.permute.xlu0 %784 }
 0x18b   : > { %v2861_v60 = vld [vmem:[%s3823_s4 + $0x418] sm:$0xf]  ;;  %v3169_v5 = vld [vmem:[%s3823_s4 + $0x21c] sm:$0xf] }
 0x18c   : > { %2120 = vmatpush.bf16.msra.mxu1 %v2446_v50  ;;  %2096 = vmatpush.bf16.msrb.mxu0 %v2890_v0  ;;  %v3055_v50 = vld [vmem:[%s3823_s4 + $0x5b8] sm:$0xf0]  ;;  %v4242_v61 = vpop.f32.mrf.mxu0  ;;  %v3269_v0 = vld [vmem:[%s3823_s4 + $0x534] sm:$0xf0] }
 0x18d   : > { %2084 = vmatpush.bf16.msrb.mxu3 %v2602_v25  ;;  %v3058_v62 = vor.u32 %v3281_v46, %v3055_v50  ;;  %v3113_v50 = vld [vmem:[%s3823_s4 + $0x5c] sm:$0xf] }
 0x18e   : > { %2134 = vmatpush.bf16.msra.mxu2 %v2670_v13  ;;  %v2990_v13 = vor.u32 %v3269_v0, %v2989_v63  ;;  %v2895_v0 = vld [vmem:[%s3823_s4 + $0x478] sm:$0xf0] }
 0x18f   : > { %v2607_v6 = vld [vmem:[%s3823_s4 + $0x238] sm:$0xf0] }
 0x190   : > { %2121 = vmatpush.bf16.msra.mxu1 %v2414_v2  ;;  %2097 = vmatpush.bf16.msrb.mxu0 %v2858_v18  ;;  %v2514_v2 = vor.u32 %v3145_v53, %v2511_v54  ;;  %v4250_v7 = vpop.f32.mrf.mxu1  ;;  %v3265_v18 = vld [vmem:[%s3823_s4 + $0x51c] sm:$0xf] }
 0x191   : > { %2142 = vmatpush.bf16.msra.mxu3 %v3086_v57  ;;  %v2925_v57 = vld [vmem:[%s3823_s4 + $0x498] sm:$0xf]  ;;  %v3177_v53 = vld [vmem:[%s3823_s4 + $0x25c] sm:$0xf] }
 0x192   : > { %2135 = vmatpush.bf16.msra.mxu2 %v2638_v28  ;;  %2085 = vmatmul.bf16.vlgmr.msrb.gmra.mxu3 %v4234_v14  ;;  %v3253_v28 = vld [vmem:[%s3823_s4 + $0x4b4] sm:$0xf0]  ;;  %v1865_v45 = vpop.f32.mrf.mxu3  ;;  %v2639_v54 = vld [vmem:[%s3823_s4 + $0x278] sm:$0xf0] }
 0x193   : > { %2098 = vmatmul.bf16.vlgmr.msrb.gmra.mxu0 %v4226_v40  ;;  %v2926_v39 = vor.u32 %v3253_v28, %v2925_v57  ;;  %v3233_v17 = vld [vmem:[%s3823_s4 + $0x41c] sm:$0xf]  ;;  %v1866_v24 = vadd.f32 %v1865_v45, %v4295_v9 }
 0x194   : > { %2122 = vmatpush.bf16.msra.mxu1 %v2382_v20  ;;  %2162 = vmatpush.bf16.msra.mxu0 %v1799_v51  ;;  %v2991_v20 = vld [vmem:[%s3823_s4 + $0x538] sm:$0xf0]  ;;  %v4266_v25 = vpop.f32.mrf.mxu2  ;;  %v1815_v32 = vpop.f32.mrf.mxu0 }
 0x195   : > { %2143 = vmatpush.bf16.msra.mxu3 %v3054_v42  ;;  %v2447_v51 = vld [vmem:[%s3823_s4 + $0xf8] sm:$0xf0]  ;;  %v2994_v27 = vor.u32 %v3265_v18, %v2991_v20  ;;  %v3245_v42 = vld [vmem:[%s3823_s4 + $0x474] sm:$0xf0]  ;;  %v2610_v20 = vor.u32 %v3169_v5, %v2607_v6 }
 0x196   : > { %2136 = vmatpush.bf16.msra.mxu2 %v2606_v58  ;;  %v2450_v30 = vor.u32 %v3129_v22, %v2447_v51  ;;  %v3249_v58 = vld [vmem:[%s3823_s4 + $0x49c] sm:$0xf]  ;;  %v2894_v55 = vor.u32 %v3245_v42, %v2893_v41 }
 0x197   : > { %v2863_v18 = vld [vmem:[%s3823_s4 + $0x438] sm:$0xf0] }
 0x198   : > { %2168 = vmatpush.bf16.msrb.mxu0 %v2578_v35  ;;  %2123 = vmatpush.bf16.msra.mxu1 %v2350_v36  ;;  %v3121_v35 = vld [vmem:[%s3823_s4 + $0x9c] sm:$0xf]  ;;  %v1828_v37 = vpop.f32.mrf.mxu1  ;;  %v2866_v22 = vor.u32 %v3233_v17, %v2863_v18 }
 0x199   : > { %2137 = vmatmul.bf16.vlgmr.msra.gmra.mxu2 %v4234_v14  ;;  %2144 = vmatpush.bf16.msra.mxu3 %v3022_v59  ;;  %v2415_v36 = vld [vmem:[%s3823_s4 + $0xb8] sm:$0xf0]  ;;  %v2930_v59 = vor.u32 %v3249_v58, %v2927_v10 }
 0x19a   : > { %2194 = vmatpush.bf16.msrb.mxu2 %v3090_v44  ;;  %v2418_v44 = vor.u32 %v3121_v35, %v2415_v36 }
 0x19b   : > { %2124 = vmatmul.bf16.vlgmr.msra.gmra.mxu1 %v4255_v12 }
 0x19c   : > { %2181 = vmatpush.bf16.msrb.mxu1 %v2834_v38  ;;  %2169 = vmatpush.bf16.msrb.mxu0 %v2546_v47  ;;  %v3185_v38 = vld [vmem:[%s3823_s4 + $0x29c] sm:$0xf]  ;;  %v1383_v47 = vunpack.c.h.b16 %v4180_v43  ;;  %v1841_v56 = vpop.f32.mrf.mxu2 }
 0x19d   : > { %2145 = vmatpush.bf16.msra.mxu3 %v2990_v13  ;;  %v2674_v46 = vor.u32 %v3185_v38, %v2671_v48  ;;  %v3241_v43 = vld [vmem:[%s3823_s4 + $0x45c] sm:$0xf] }
 0x19e   : > { %2195 = vmatpush.bf16.msrb.mxu2 %v3058_v62  ;;  %v3237_v62 = vld [vmem:[%s3823_s4 + $0x434] sm:$0xf0]  ;;  %v1583_v1 = vpack.c.b16 %v1383_v47, %v1383_v47  ;;  %v2898_v13 = vor.u32 %v3241_v43, %v2895_v0 }
 0x19f   : > { %v2862_v11 = vor.u32 %v3237_v62, %v2861_v60 }
 0x1a0   : > { %2182 = vmatpush.bf16.msrb.mxu1 %v2802_v52  ;;  %2170 = vmatpush.bf16.msrb.mxu0 %v2514_v2  ;;  %v2383_v52 = vld [vmem:[%s3823_s4 + $0x78] sm:$0xf0]  ;;  %v2642_v2 = vor.u32 %v3177_v53, %v2639_v54  ;;  %v1802_v16 = vsel %vm1779_vm0, %v1583_v1, 0 }
 0x1a1   : > { %2146 = vmatpush.bf16.msra.mxu3 %v2958_v26  ;;  %v2386_v63 = vor.u32 %v3113_v50, %v2383_v52 }
 0x1a2   : > { %2196 = vmatpush.bf16.msrb.mxu2 %v3026_v15  ;;  %v1867_v15 = vpop.f32.mrf.mxu3 }
 0x1a3   : > { %3097 = vmatmul.msk.bf16.vlgmr.msra.gmra.mxu0 %vm1776_vm1, %v4199_v8 }
 0x1a4   : > { %2183 = vmatpush.bf16.msrb.mxu1 %v2770_v4  ;;  %2171 = vmatpush.bf16.msrb.mxu0 %v2482_v19  ;;  %v2351_v4 = vld [vmem:[%s3823_s4 + $0x38] sm:$0xf0]  ;;  %v1904_v51 = vpop.f32.mrf.mxu2 }
 0x1a5   : > { %2147 = vmatpush.bf16.msra.mxu3 %v2926_v39  ;;  %v2354_v19 = vor.u32 %v3105_v3, %v2351_v4 }
 0x1a6   : > { %2197 = vmatpush.bf16.msrb.mxu2 %v2994_v27 }
 0x1a8   : > { %2184 = vmatpush.bf16.msrb.mxu1 %v2738_v21  ;;  %2172 = vmatpush.bf16.msrb.mxu0 %v2450_v30  ;;  %v1814_v21 = vadd.f32 %v4242_v61, %v4295_v9 }
 0x1a9   : > { %2148 = vmatpush.bf16.msra.mxu3 %v2894_v55 }
 0x1aa   : > { %2198 = vmatpush.bf16.msrb.mxu2 %v2962_v49  ;;  %v1827_v23 = vadd.f32 %v4250_v7, %v1814_v21 }
 0x1ac   : > { %2185 = vmatpush.bf16.msrb.mxu1 %v2706_v34  ;;  %2173 = vmatpush.bf16.msrb.mxu0 %v2418_v44  ;;  %v1878_v26 = vpop.f32.mrf.mxu0  ;;  %v1840_v61 = vadd.f32 %v4266_v25, %v1827_v23  ;;  %v1906_v7 = vpop.f32.mrf.mxu2 }
 0x1ad   : > { %2149 = vmatpush.bf16.msra.mxu3 %v2862_v11  ;;  %v1879_v27 = vadd.f32 %v1878_v26, %v1866_v24 }
 0x1ae   : > { %2199 = vmatpush.bf16.msrb.mxu2 %v2930_v59  ;;  %v1853_v29 = vadd.f32 %v4218_v31, %v1840_v61 }
 0x1b0   : > { %2186 = vmatpush.bf16.msrb.mxu1 %v2674_v46  ;;  %2174 = vmatpush.bf16.msrb.mxu0 %v2386_v63  ;;  %v1891_v57 = vpop.f32.mrf.mxu1 }
 0x1b1   : > { %2214 = vmatpush.bf16.msrb.mxu3 %v1802_v16  ;;  %v1892_v28 = vadd.f32 %v1891_v57, %v1879_v27  ;;  %v1917_v33 = vpop.f32.mrf.mxu3 }
 0x1b2   : > { %2200 = vmatpush.bf16.msrb.mxu2 %v2898_v13  ;;  %2150 = vmatmul.bf16.vlgmr.msra.gmra.mxu3 %v4226_v40 }
 0x1b3   : > { %v1905_v30 = vadd.f32 %v1904_v51, %v1892_v28 }
 0x1b4   : > { %2187 = vmatpush.bf16.msrb.mxu1 %v2642_v2  ;;  %2175 = vmatpush.bf16.msrb.mxu0 %v2354_v19 }
 0x1b5   : > { %3322 = vtanh.f32 %v1905_v30 }
 0x1b6   : > { %2201 = vmatpush.bf16.msrb.mxu2 %v2866_v22  ;;  %3324 = vtanh.f32 %v1853_v29 }
 0x1b7   : > { %2176 = vmatmul.bf16.vlgmr.msrb.gmra.mxu0 %v4255_v12  ;;  %v1880_v12 = vpop.f32.mrf.mxu0 }
 0x1b8   : > { %2188 = vmatpush.bf16.msrb.mxu1 %v2610_v20  ;;  %v1893_v32 = vpop.f32.mrf.mxu1  ;;  %v1930_v25 = vpop.f32.mrf.mxu2 }
 0x1b9   : > { %2202 = vmatmul.bf16.vlgmr.msrb.gmra.mxu2 %v4226_v40  ;;  %v1919_v36 = vpop.f32.mrf.mxu3 }
 0x1bb   : > { %2189 = vmatmul.bf16.vlgmr.msrb.gmra.mxu1 %v4234_v14  ;;  %v3323_v14 = vpop.eup %3322 }
 0x1bc   : > { %v2236_v31 = vrot.slane %v3323_v14, 4  ;;  %v3325_v40 = vpop.eup %3324 }
 0x1be   : > { %v2240_v34 = vsel %vm1779_vm0, %v3325_v40, %v2236_v31 }
 0x1bf   : > { %2248 = vst [vmem:[%s4317_s11] sm:$0x77] %v2240_v34 }
 0x1c0   : > { %v1956_v35 = vpop.f32.mrf.mxu1  ;;  %v1932_v37 = vpop.f32.mrf.mxu2 }
 0x1c2   : > { %3098 = vmatmul.msk.bf16.vlgmr.msrb.gmra.mxu3 %vm1776_vm1, %v4199_v8  ;;  %v1918_v8 = vadd.f32 %v1917_v33, %v4295_v9 }
 0x1c4   : > { %v1931_v41 = vadd.f32 %v1930_v25, %v1918_v8 }
 0x1c8   : > { %v1958_v38 = vpop.f32.mrf.mxu1 }
 0x1cc   : > { %v1943_v48 = vpop.f32.mrf.mxu0 }
 0x1cd   : > { %v1944_v10 = vadd.f32 %v1943_v48, %v1931_v41 }
 0x1cf   : > { %v1957_v52 = vadd.f32 %v1956_v35, %v1944_v10 }
 0x1d1   : > { %v1969_v42 = vpop.f32.mrf.mxu3 }
 0x1d2   : > { %v1970_v58 = vadd.f32 %v1969_v42, %v4295_v9 }
 0x1d4   : > { %v1982_v39 = vpop.f32.mrf.mxu1  ;;  %v1945_v49 = vpop.f32.mrf.mxu0 }
 0x1d5   : > { %v1983_v46 = vadd.f32 %v1982_v39, %v1970_v58 }
 0x1d8   : > { %v1995_v44 = vpop.f32.mrf.mxu2 }
 0x1d9   : > { %v1996_v50 = vadd.f32 %v1995_v44, %v1983_v46  ;;  %v1971_v54 = vpop.f32.mrf.mxu3 }
 0x1dc   : > { %v1984_v45 = vpop.f32.mrf.mxu1  ;;  %v2008_v47 = vpop.f32.mrf.mxu0 }
 0x1dd   : > { %v2009_v53 = vadd.f32 %v2008_v47, %v1996_v50 }
 0x1df   : > { %3326 = vtanh.f32 %v2009_v53 }
 0x1e0   : > { %v1997_v55 = vpop.f32.mrf.mxu2  ;;  %3328 = vtanh.f32 %v1957_v52 }
 0x1e4   : > { %v2010_v56 = vpop.f32.mrf.mxu0 }
 0x1e5   : > { %v3327_v59 = vpop.eup %3326 }
 0x1e6   : > { %v2237_v60 = vrot.slane %v3327_v59, 4  ;;  %v3329_v62 = vpop.eup %3328 }
 0x1e8   : > { %v2060_v63 = vpop.f32.mrf.mxu2  ;;  %v2241_v43 = vsel %vm1779_vm0, %v3329_v62, %v2237_v60 }
 0x1e9   : > { %2249 = vst [vmem:[%s4317_s11 + $0x8] sm:$0x77] %v2241_v43 }
 0x1f0   : > { %v2034_v1 = vpop.f32.mrf.mxu0  ;;  %v2062_v2 = vpop.f32.mrf.mxu2 }
 0x1f1   : > { %v2021_v3 = vpop.f32.mrf.mxu3 }
 0x1f2   : > { %v2022_v18 = vadd.f32 %v2021_v3, %v4295_v9 }
 0x1f4   : > { %v2047_v0 = vpop.f32.mrf.mxu1  ;;  %v2035_v19 = vadd.f32 %v2034_v1, %v2022_v18 }
 0x1f6   : > { %v2048_v23 = vadd.f32 %v2047_v0, %v2035_v19 }
 0x1f8   : > { %v2036_v5 = vpop.f32.mrf.mxu0  ;;  %v2061_v61 = vadd.f32 %v2060_v63, %v2048_v23 }
 0x1f9   : > { %v2023_v11 = vpop.f32.mrf.mxu3 }
 0x1fc   : > { %v2049_v4 = vpop.f32.mrf.mxu1  ;;  %v2073_v6 = vpop.f32.mrf.mxu2 }
 0x1fd   : > { %v2074_v20 = vadd.f32 %v2073_v6, %v4295_v9 }
 0x204   : > { %v2112_v13 = vpop.f32.mrf.mxu1  ;;  %v2075_v15 = vpop.f32.mrf.mxu2 }
 0x20c   : > { %v2114_v16 = vpop.f32.mrf.mxu1 }
 0x210   : > { %v2099_v17 = vpop.f32.mrf.mxu0 }
 0x215   : > { %v2086_v51 = vpop.f32.mrf.mxu3 }
 0x216   : > { %v2087_v24 = vadd.f32 %v2086_v51, %v2074_v20 }
 0x218   : > { %v2101_v21 = vpop.f32.mrf.mxu0  ;;  %v2125_v22 = vpop.f32.mrf.mxu1  ;;  %v2100_v26 = vadd.f32 %v2099_v17, %v2087_v24 }
 0x219   : > { %v2126_v36 = vadd.f32 %v2125_v22, %v4295_v9 }
 0x21a   : > { %v2113_v27 = vadd.f32 %v2112_v13, %v2100_v26 }
 0x21c   : > { %v2138_v57 = vpop.f32.mrf.mxu2  ;;  %3330 = vtanh.f32 %v2113_v27 }
 0x21d   : > { %v2088_v29 = vpop.f32.mrf.mxu3  ;;  %3332 = vtanh.f32 %v2061_v61  ;;  %v2139_v8 = vadd.f32 %v2138_v57, %v2126_v36 }
 0x220   : > { %v2164_v28 = vpop.f32.mrf.mxu0  ;;  %v2127_v7 = vpop.f32.mrf.mxu1 }
 0x222   : > { %v3331_v30 = vpop.eup %3330 }
 0x223   : > { %v2238_v32 = vrot.slane %v3331_v30, 4  ;;  %v3333_v33 = vpop.eup %3332 }
 0x224   : > { %v2140_v12 = vpop.f32.mrf.mxu2 }
 0x225   : > { %v2242_v25 = vsel %vm1779_vm0, %v3333_v33, %v2238_v32 }
 0x226   : > { %2250 = vst [vmem:[%s4317_s11 + $0x10] sm:$0x77] %v2242_v25 }
 0x228   : > { %v2166_v14 = vpop.f32.mrf.mxu0 }
 0x234   : > { %v2177_v31 = vpop.f32.mrf.mxu0 }
 0x235   : > { %v2151_v34 = vpop.f32.mrf.mxu3  ;;  %v2178_v37 = vadd.f32 %v2177_v31, %v4295_v9 }
 0x236   : > { %v2152_v41 = vadd.f32 %v2151_v34, %v2139_v8 }
 0x238   : > { %v2190_v40 = vpop.f32.mrf.mxu1  ;;  %v2165_v45 = vadd.f32 %v2164_v28, %v2152_v41 }
 0x239   : > { %v2191_v49 = vadd.f32 %v2190_v40, %v2178_v37 }
 0x23c   : > { %v2179_v35 = vpop.f32.mrf.mxu0  ;;  %v2203_v38 = vpop.f32.mrf.mxu2 }
 0x23d   : > { %v2153_v39 = vpop.f32.mrf.mxu3  ;;  %v2204_v42 = vadd.f32 %v2203_v38, %v2191_v49 }
 0x240   : > { %v2192_v48 = vpop.f32.mrf.mxu1 }
 0x244   : > { %v2205_v58 = vpop.f32.mrf.mxu2 }
 0x245   : > { %v2216_v44 = vpop.f32.mrf.mxu3 }
 0x246   : > { %v2217_v10 = vadd.f32 %v2216_v44, %v2204_v42 }
 0x248   : > { %3334 = vtanh.f32 %v2217_v10 }
 0x249   : > { %3336 = vtanh.f32 %v2165_v45 }
 0x24d   : > { %v2218_v46 = vpop.f32.mrf.mxu3 }
 0x24e   : > { %v3335_v47 = vpop.eup %3334 }
 0x24f   : > { %v2239_v50 = vrot.slane %v3335_v47, 4  ;;  %v3337_v52 = vpop.eup %3336 }
 0x251   : > { %v2243_v9 = vsel %vm1779_vm0, %v3337_v52, %v2239_v50 }
 0x252   : > { %2251 = vst [vmem:[%s4317_s11 + $0x18] sm:$0x77] %v2243_v9 }
 0x253 PF: > { %p10_p9 = scmp.ge.s32.totalorder %s3404_s16, 4   ;;  %s4347_s12 = smov %s3360_s13 }
 0x254   : > { %s4348_s13 = smov %s3413_s19  ;;  %s4349_s14 = smov %s3404_s16 }
 0x255   :  { %12 = sbr.rel (!%p10_p9) target bundleno = 2 (0x2), region = 90 }

</bundles_post_ra>
